<compile_context>
chip_gen: v7x
topology: tpu7x:2x2x1
jax: 0.10.0
libtpu: 0.0.40
codegen_flags: <defaults>
</compile_context>

<pallas_src>
import functools
import math

import jax
import jax.numpy as jnp
from jax import lax
from jax.experimental import pallas as pl
from jax.experimental.pallas import tpu as pltpu

NEG_BIG = 1e12


def _egp_kernel(heads, head_size, block_q,
                seq_ref, w1_ref, b1_ref, w2_ref, w2t_ref, b2r_ref, b2c_ref,
                mrow_ref, mcol_ref, cos_ref, sin_ref,
                out_ref,
                q_sc, kT_sc, biasr_sc, biasc_sc):
    """One (batch, query-tile) grid step of the EfficientGlobalPointer head."""
    D = head_size
    W = 2 * D
    qi = pl.program_id(1)
    S = q_sc.shape[0]

    # ---- once per batch element: dense_1, dense_2 bias, RoPE(q,k) -> scratch ----
    @pl.when(qi == 0)
    def _():
        x = seq_ref[0]                                                  # (S, H)
        proj = jnp.dot(x, w1_ref[...],
                       preferred_element_type=jnp.float32) + b1_ref[...]  # (S, 2D) f32
        # dense_2 acts on the *pre-RoPE* projection; /2 is folded into W2/b2.
        # Kept in f32 (tiny matmuls, cold path) for bit-closeness of the bias.
        biasr_sc[...] = jnp.dot(proj, w2_ref[...],
                                preferred_element_type=jnp.float32) + b2r_ref[...]
        biasc_sc[...] = lax.dot_general(w2t_ref[...], proj, (((1,), (1,)), ((), ())),
                                        preferred_element_type=jnp.float32) + b2c_ref[...]
        # RoPE (rotate interleaved pairs) applied once at full (S, 2D) width.
        # D is even, so the +/-1 lane pairing never crosses the q|k boundary.
        # 1/sqrt(D) is pre-folded into the q half of cos/sin (host side).
        lane = lax.broadcasted_iota(jnp.int32, (S, W), 1)
        v_next = pltpu.roll(proj, W - 1, axis=1)                        # proj[..., c+1]
        v_prev = pltpu.roll(proj, 1, axis=1)                            # proj[..., c-1]
        v2 = jnp.where((lane % 2) == 0, -v_next, v_prev)
        prot = proj * cos_ref[...] + v2 * sin_ref[...]
        q_sc[...] = prot[:, :D].astype(q_sc.dtype)                      # (S, D) pre-scaled q
        kT_sc[...] = prot[:, D:].T.astype(kT_sc.dtype)                  # (D, S) native (K, N)

    # ---- every step: one query tile against all keys ----
    q0 = pl.multiple_of(qi * block_q, block_q)
    q = q_sc[pl.ds(q0, block_q), :]                                     # (TQ, D)
    qk = jnp.dot(q, kT_sc[...],
                 preferred_element_type=jnp.float32)                    # (TQ, S), /sqrt(D) folded

    # pad + strictly-lower-triangular mask, built once per tile, shared by heads.
    pad2d = mcol_ref[0] * mrow_ref[0]                                   # (TQ,1)*(1,S)
    row = q0 + lax.broadcasted_iota(jnp.int32, (block_q, 1), 0)
    col = lax.broadcasted_iota(jnp.int32, (1, S), 1)
    neg_count = jnp.where(row > col, 2.0, 1.0)                          # tril gets an extra -1e12
    masked_qk = qk * pad2d + (pad2d - neg_count) * NEG_BIG              # == ref formula at pad==1

    for h in range(heads):                                              # heads is small: unrolled
        cb = biasc_sc[2 * h:2 * h + 1, :]                               # (1, S)  key-position bias
        rb = biasr_sc[pl.ds(q0, block_q), 2 * h + 1:2 * h + 2]          # (TQ, 1) query-position bias
        out_ref[0, h] = (masked_qk + rb + cb).astype(out_ref.dtype)


def efficient_global_pointer_pallas(seq_out, attention_mask, W1, b1, W2, b2,
                                    heads, head_size, block_q=None,
                                    out_dtype=jnp.float32, return_padded=False):
    """EfficientGlobalPointer head on TPU via Pallas.

    seq_out: (B, S, H) encoder output (bf16 or f32)
    W1, b1 : dense_1 params (H, 2*head_size), (2*head_size,)
    W2, b2 : dense_2 params (2*head_size, 2*heads), (2*heads,)
    returns logits (B, heads, S, S) in `out_dtype` (padded to S_pad if
    return_padded=True, which avoids a full-tensor slice copy when S % 128 != 0).
    """
    B, S, H = seq_out.shape
    D = head_size
    assert D % 2 == 0, "RoPE rotate-pairs requires an even head_size"
    Wd = 2 * D
    assert W1.shape == (H, Wd) and W2.shape == (Wd, 2 * heads)

    # Pad S to a multiple of 128: lane-dense logits stores + even query tiling.
    S_pad = ((S + 127) // 128) * 128
    if block_q is None:
        block_q = 128                       # MXU M-tile on all gens; VMEM-safe (v5e/v7x)
    block_q = min(block_q, S_pad)
    assert S_pad % block_q == 0 and block_q % 8 == 0
    nq = S_pad // block_q

    seq_p = jnp.pad(seq_out, ((0, 0), (0, S_pad - S), (0, 0)))
    mask_p = jnp.pad(attention_mask.astype(jnp.float32), ((0, 0), (0, S_pad - S)))
    mrow = mask_p[:, None, :]                          # (B, 1, S_pad)  key side
    mcol = mask_p[:, :, None]                          # (B, S_pad, 1)  query side

    # De-interleave dense_1's q/k columns ([..., ::2] / [..., 1::2]) into
    # contiguous [q | k]; permute dense_2 rows to match; fold /2 into W2/b2.
    perm = jnp.concatenate([jnp.arange(0, Wd, 2), jnp.arange(1, Wd, 2)])
    W1p = W1[:, perm]
    b1p = b1[perm].astype(jnp.float32).reshape(1, Wd)
    W2p = W2[perm, :].astype(jnp.float32) * 0.5        # (Wd, 2*heads), f32, /2 folded
    W2t = W2p.T                                        # (2*heads, Wd)
    b2r = (b2.astype(jnp.float32) * 0.5).reshape(1, 2 * heads)
    b2c = b2r.reshape(2 * heads, 1)

    qk_dtype = jnp.bfloat16 if seq_out.dtype == jnp.bfloat16 else jnp.float32

    # RoPE tables at full (S_pad, 2D) width; 1/sqrt(D) folded into the q half.
    # Stored in the q/k compute dtype (bf16 costs nothing: q/k are bf16 anyway).
    pos = jnp.arange(S_pad, dtype=jnp.float32)
    theta = jnp.power(10000.0, -2.0 * jnp.arange(D // 2, dtype=jnp.float32) / D)
    ang = pos[:, None] * theta[None, :]
    cos_d = jnp.repeat(jnp.cos(ang), 2, axis=-1)
    sin_d = jnp.repeat(jnp.sin(ang), 2, axis=-1)
    scale = 1.0 / math.sqrt(D)
    cos_f = jnp.concatenate([cos_d * scale, cos_d], axis=-1).astype(qk_dtype)
    sin_f = jnp.concatenate([sin_d * scale, sin_d], axis=-1).astype(qk_dtype)

    # Explicit VMEM budget (v5e default scoped limit is only 16 MiB; v7x has
    # 64 MiB physical): estimate resident bytes and add headroom.
    def nbytes(dt):
        return jnp.dtype(dt).itemsize
    qk_b, out_b, seq_b = nbytes(qk_dtype), nbytes(out_dtype), nbytes(seq_out.dtype)
    est = (2 * heads * block_q * S_pad * out_b          # out block, double buffered
           + 2 * S_pad * H * seq_b                      # seq block (worst case 2 bufs)
           + 2 * S_pad * Wd * qk_b                      # cos + sin
           + H * Wd * nbytes(W1p.dtype)                 # dense_1 weight
           + S_pad * 128 * qk_b                         # q scratch (lane-padded to 128)
           + D * S_pad * qk_b                           # kT scratch (lane-dense)
           + S_pad * 128 * 4                            # biasr scratch (lane-padded)
           + max(8, 2 * heads) * S_pad * 4)             # biasc scratch
    vmem_limit = int(min(max(2 * est, 32 * 1024 * 1024), 100 * 1024 * 1024))

    kernel = functools.partial(_egp_kernel, heads, D, block_q)

    def build(use_single_buffering):
        def buf1():
            return {"pipeline_mode": pl.Buffered(1)} if use_single_buffering else {}

        def inv_spec(shape):                               # grid-invariant operand
            nd = len(shape)
            return pl.BlockSpec(shape, lambda *_: (0,) * nd, **buf1())

        return pl.pallas_call(
            kernel,
            out_shape=jax.ShapeDtypeStruct((B, heads, S_pad, S_pad), out_dtype),
            grid=(B, nq),
            in_specs=[
                # sequence output: only read at qi==0 -> single buffer is enough
                pl.BlockSpec((1, S_pad, H), lambda b, qi: (b, 0, 0), **buf1()),
                inv_spec((H, Wd)),                                        # dense_1 W (permuted)
                inv_spec((1, Wd)),                                        # dense_1 b
                inv_spec((Wd, 2 * heads)),                                # dense_2 W (/2 folded, f32)
                inv_spec((2 * heads, Wd)),                                # dense_2 W^T
                inv_spec((1, 2 * heads)),                                 # dense_2 b (row layout)
                inv_spec((2 * heads, 1)),                                 # dense_2 b (col layout)
                pl.BlockSpec((1, 1, S_pad), lambda b, qi: (b, 0, 0)),     # mask, key side (per batch)
                pl.BlockSpec((1, block_q, 1), lambda b, qi: (b, qi, 0)),  # mask, query tile
                inv_spec((S_pad, Wd)),                                    # cos (q half pre-scaled)
                inv_spec((S_pad, Wd)),                                    # sin (q half pre-scaled)
            ],
            out_specs=pl.BlockSpec((1, heads, block_q, S_pad),
                                   lambda b, qi: (b, 0, qi, 0)),
            scratch_shapes=[
                pltpu.VMEM((S_pad, D), qk_dtype),              # RoPE'd q (pre-scaled)
                pltpu.VMEM((D, S_pad), qk_dtype),              # RoPE'd k, transposed (K, N)
                pltpu.VMEM((S_pad, 2 * heads), jnp.float32),   # bias, per-query layout
                pltpu.VMEM((2 * heads, S_pad), jnp.float32),   # bias, per-key layout
            ],
            compiler_params=pltpu.CompilerParams(
                dimension_semantics=("parallel", "arbitrary"),
                vmem_limit_bytes=vmem_limit),
        )

    args = (seq_p, W1p, b1p, W2p, W2t, b2r, b2c, mrow, mcol, cos_f, sin_f)
    try:
        out = build(True)(*args)
    except Exception:
        # pl.Buffered(1) unsupported on this JAX build/backend.  Any error that
        # is unrelated to Buffered re-raises from the default-buffered build
        # below, so nothing is silently swallowed.
        out = build(False)(*args)

    if return_padded or S == S_pad:
        return out
    return out[:, :, :S, :S]


def _efficient_global_pointer_reference(seq_out, attention_mask, W1, b1, W2, b2,
                                        heads, head_size):
    """Pure-JAX (f32) mirror of the canonical PyTorch EfficientGlobalPointer head."""
    D = head_size
    x = seq_out.astype(jnp.float32)
    B, S, H = x.shape
    inputs = x @ W1.astype(jnp.float32) + b1.astype(jnp.float32)        # (B, S, 2D)
    qw, kw = inputs[..., 0::2], inputs[..., 1::2]                       # (B, S, D)

    pos = jnp.arange(S, dtype=jnp.float32)
    theta = jnp.power(10000.0, -2.0 * jnp.arange(D // 2, dtype=jnp.float32) / D)
    ang = pos[:, None] * theta[None, :]
    cos_pos = jnp.repeat(jnp.cos(ang), 2, -1)[None]
    sin_pos = jnp.repeat(jnp.sin(ang), 2, -1)[None]

    def rot(v):
        v2 = jnp.stack([-v[..., 1::2], v[..., 0::2]], axis=-1).reshape(v.shape)
        return v * cos_pos + v2 * sin_pos

    qw, kw = rot(qw), rot(kw)
    logits = jnp.einsum('bmd,bnd->bmn', qw, kw) / (D ** 0.5)            # (B, S, S)

    bias = jnp.einsum('bnh->bhn',
                      inputs @ W2.astype(jnp.float32) + b2.astype(jnp.float32)) / 2.0
    logits = (logits[:, None, :, :]
              + bias[:, 0::2][:, :, None, :]                            # per-key bias
              + bias[:, 1::2][:, :, :, None])                           # per-query bias

    m = attention_mask.astype(jnp.float32)
    pad2d = m[:, None, :, None] * m[:, None, None, :]
    logits = logits * pad2d - (1.0 - pad2d) * NEG_BIG
    tri = jnp.tril(jnp.ones((S, S), jnp.float32), -1)
    logits = logits - tri[None, None] * NEG_BIG
    return logits


if __name__ == "__main__":
    B, S, H = 2, 8, 32            # batch, seq, hidden_size
    VOCAB = 100
    NUM_LABELS = 3                # config.num_labels (number of pointer heads)
    HEAD_SIZE = 64                # default head_size from the module

    key = jax.random.PRNGKey(0)
    k1, k2, k3, k4, k5, k6, k7 = jax.random.split(key, 7)

    input_ids = jax.random.randint(k1, (B, S), 0, VOCAB)
    attention_mask = jnp.array([[1] * S, [1] * 6 + [0] * 2], dtype=jnp.float32)

    # TODO(synk): the real encoder is an external pluggable module (e.g. BERT);
    # here it is a deterministic synthetic embedding + linear + tanh encoder.
    emb_table = jax.random.normal(k2, (VOCAB, H), jnp.float32) * 0.02
    W_enc = jax.random.normal(k3, (H, H), jnp.float32) * 0.05
    sequence_output = jnp.tanh(emb_table[input_ids] @ W_enc)            # (B, S, H)

    # EfficientGlobalPointer params:
    #   dense_1: hidden -> 2*head_size (shared q/k); dense_2: 2*head_size -> 2*num_labels
    W1 = jax.random.normal(k4, (H, 2 * HEAD_SIZE), jnp.float32) * 0.05
    b1 = jax.random.normal(k5, (2 * HEAD_SIZE,), jnp.float32) * 0.02
    W2 = jax.random.normal(k6, (2 * HEAD_SIZE, 2 * NUM_LABELS), jnp.float32) * 0.05
    b2 = jax.random.normal(k7, (2 * NUM_LABELS,), jnp.float32) * 0.02

    # bf16 activations/weights into the kernel (MXU-native), f32 accumulation inside.
    seq_bf = sequence_output.astype(jnp.bfloat16)
    W1_bf = W1.astype(jnp.bfloat16)
    W2_bf = W2.astype(jnp.bfloat16)

    # block_q=64 at this tiny S exercises the multi-tile path (S is padded to 128).
    logits = efficient_global_pointer_pallas(seq_bf, attention_mask,
                                             W1_bf, b1, W2_bf, b2,
                                             NUM_LABELS, HEAD_SIZE, block_q=64)
    logits = jax.block_until_ready(logits)

    ref = _efficient_global_pointer_reference(seq_bf, attention_mask,
                                              W1_bf, b1, W2_bf, b2,
                                              NUM_LABELS, HEAD_SIZE)
    rel_err = jnp.max(jnp.abs(logits - ref) / (1.0 + jnp.abs(ref)))
    assert logits.shape == (B, NUM_LABELS, S, S), logits.shape
    assert bool(rel_err < 1e-2), f"mismatch vs reference: {rel_err}"
    print("KERNEL_OK")
</pallas_src>

<mosaic_0001>
module attributes {stable_mosaic.version = 11 : i64} {
  func.func @_egp_kernel(%arg0: i32, %arg1: i32, %arg2: memref<1x128x32xbf16, #tpu.memory_space<vmem>>, %arg3: memref<32x128xbf16, #tpu.memory_space<vmem>>, %arg4: memref<1x128xf32, #tpu.memory_space<vmem>>, %arg5: memref<128x6xf32, #tpu.memory_space<vmem>>, %arg6: memref<6x128xf32, #tpu.memory_space<vmem>>, %arg7: memref<1x6xf32, #tpu.memory_space<vmem>>, %arg8: memref<6x1xf32, #tpu.memory_space<vmem>>, %arg9: memref<1x1x128xf32, #tpu.memory_space<vmem>>, %arg10: memref<1x64x1xf32, #tpu.memory_space<vmem>>, %arg11: memref<128x128xbf16, #tpu.memory_space<vmem>>, %arg12: memref<128x128xbf16, #tpu.memory_space<vmem>>, %arg13: memref<1x3x64x128xf32, #tpu.memory_space<vmem>>, %arg14: memref<128x64xbf16, #tpu.memory_space<vmem>>, %arg15: memref<64x128xbf16, #tpu.memory_space<vmem>>, %arg16: memref<128x6xf32, #tpu.memory_space<vmem>>, %arg17: memref<6x128xf32, #tpu.memory_space<vmem>>) attributes {dimension_semantics = [#tpu.dimension_semantics<parallel>, #tpu.dimension_semantics<arbitrary>], iteration_bounds = array<i64: 2, 2>, scalar_prefetch = 0 : i64, scratch_operands = 4 : i64, tpu.core_type = #tpu.core_type<tc>, window_params = [{pipeline_mode = #tpu.pipeline_mode<synchronous>, transform_indices = @transform_0, window_bounds = array<i64: 1, 128, 32>}, {pipeline_mode = #tpu.pipeline_mode<synchronous>, transform_indices = @transform_1, window_bounds = array<i64: 32, 128>}, {pipeline_mode = #tpu.pipeline_mode<synchronous>, transform_indices = @transform_2, window_bounds = array<i64: 1, 128>}, {pipeline_mode = #tpu.pipeline_mode<synchronous>, transform_indices = @transform_3, window_bounds = array<i64: 128, 6>}, {pipeline_mode = #tpu.pipeline_mode<synchronous>, transform_indices = @transform_4, window_bounds = array<i64: 6, 128>}, {pipeline_mode = #tpu.pipeline_mode<synchronous>, transform_indices = @transform_5, window_bounds = array<i64: 1, 6>}, {pipeline_mode = #tpu.pipeline_mode<synchronous>, transform_indices = @transform_6, window_bounds = array<i64: 6, 1>}, {transform_indices = @transform_7, window_bounds = array<i64: 1, 1, 128>}, {transform_indices = @transform_8, window_bounds = array<i64: 1, 64, 1>}, {pipeline_mode = #tpu.pipeline_mode<synchronous>, transform_indices = @transform_9, window_bounds = array<i64: 128, 128>}, {pipeline_mode = #tpu.pipeline_mode<synchronous>, transform_indices = @transform_10, window_bounds = array<i64: 128, 128>}, {transform_indices = @transform_11, window_bounds = array<i64: 1, 3, 64, 128>}]} {
    %c0_i32 = arith.constant 0 : i32
    %0 = arith.cmpi eq, %arg1, %c0_i32 : i32
    %1 = arith.extui %0 : i1 to i32
    %c0_i32_0 = arith.constant 0 : i32
    %2 = arith.cmpi ne, %1, %c0_i32_0 : i32
    scf.if %2 {
      %c0_28 = arith.constant 0 : index
      %c0_29 = arith.constant 0 : index
      %c0_30 = arith.constant 0 : index
      %61 = vector.load %arg2[%c0_28, %c0_29, %c0_30] : memref<1x128x32xbf16, #tpu.memory_space<vmem>>, vector<1x128x32xbf16>
      %62 = vector.shape_cast %61 : vector<1x128x32xbf16> to vector<128x32xbf16>
      %c0_31 = arith.constant 0 : index
      %c0_32 = arith.constant 0 : index
      %63 = vector.load %arg3[%c0_31, %c0_32] : memref<32x128xbf16, #tpu.memory_space<vmem>>, vector<32x128xbf16>
      %cst_33 = arith.constant dense<0.000000e+00> : vector<128x128xf32>
      %64 = tpu.matmul %62, %63, %cst_33 {dimension_numbers = #tpu.dot_dimension_numbers<[1], [0], [0], [1], [0, 0, 1, 1], [], []>} : vector<128x32xbf16>, vector<32x128xbf16>, vector<128x128xf32> -> vector<128x128xf32>
      %c0_34 = arith.constant 0 : index
      %c0_35 = arith.constant 0 : index
      %65 = vector.load %arg4[%c0_34, %c0_35] : memref<1x128xf32, #tpu.memory_space<vmem>>, vector<1x128xf32>
      %66 = vector.broadcast %65 : vector<1x128xf32> to vector<128x128xf32>
      %67 = arith.addf %64, %66 : vector<128x128xf32>
      %c0_36 = arith.constant 0 : index
      %c0_37 = arith.constant 0 : index
      %68 = vector.load %arg5[%c0_36, %c0_37] : memref<128x6xf32, #tpu.memory_space<vmem>>, vector<128x6xf32>
      %cst_38 = arith.constant dense<0.000000e+00> : vector<128x6xf32>
      %69 = tpu.matmul %67, %68, %cst_38 {dimension_numbers = #tpu.dot_dimension_numbers<[1], [0], [0], [1], [0, 0, 1, 1], [], []>} : vector<128x128xf32>, vector<128x6xf32>, vector<128x6xf32> -> vector<128x6xf32>
      %c0_39 = arith.constant 0 : index
      %c0_40 = arith.constant 0 : index
      %70 = vector.load %arg7[%c0_39, %c0_40] : memref<1x6xf32, #tpu.memory_space<vmem>>, vector<1x6xf32>
      %71 = vector.broadcast %70 : vector<1x6xf32> to vector<128x6xf32>
      %72 = arith.addf %69, %71 : vector<128x6xf32>
      %c0_41 = arith.constant 0 : index
      %c0_42 = arith.constant 0 : index
      %73 = vector.load %arg16[%c0_41, %c0_42] : memref<128x6xf32, #tpu.memory_space<vmem>>, vector<128x6xf32>
      tpu.vector_store %arg16[%c0_41, %c0_42], %72 {strides = array<i32>} : memref<128x6xf32, #tpu.memory_space<vmem>>, vector<128x6xf32>,
      %c0_43 = arith.constant 0 : index
      %c0_44 = arith.constant 0 : index
      %74 = vector.load %arg6[%c0_43, %c0_44] : memref<6x128xf32, #tpu.memory_space<vmem>>, vector<6x128xf32>
      %cst_45 = arith.constant dense<0.000000e+00> : vector<6x128xf32>
      %75 = tpu.matmul %74, %67, %cst_45 {dimension_numbers = #tpu.dot_dimension_numbers<[1], [1], [0], [0], [0, 0, 1, 0], [], []>} : vector<6x128xf32>, vector<128x128xf32>, vector<6x128xf32> -> vector<6x128xf32>
      %c0_46 = arith.constant 0 : index
      %c0_47 = arith.constant 0 : index
      %76 = vector.load %arg8[%c0_46, %c0_47] : memref<6x1xf32, #tpu.memory_space<vmem>>, vector<6x1xf32>
      %77 = vector.broadcast %76 : vector<6x1xf32> to vector<6x128xf32>
      %78 = arith.addf %75, %77 : vector<6x128xf32>
      %c0_48 = arith.constant 0 : index
      %c0_49 = arith.constant 0 : index
      %79 = vector.load %arg17[%c0_48, %c0_49] : memref<6x128xf32, #tpu.memory_space<vmem>>, vector<6x128xf32>
      tpu.vector_store %arg17[%c0_48, %c0_49], %78 {strides = array<i32>} : memref<6x128xf32, #tpu.memory_space<vmem>>, vector<6x128xf32>,
      %80 = tpu.iota {dimensions = array<i32: 1>} : vector<128x128xi32>
      %c127_i32 = arith.constant 127 : i32
      %81 = tpu.dynamic_rotate %67 by %c127_i32 dim 1 : vector<128x128xf32>, i32 -> vector<128x128xf32>
      %c1_i32 = arith.constant 1 : i32
      %82 = tpu.dynamic_rotate %67 by %c1_i32 dim 1 : vector<128x128xf32>, i32 -> vector<128x128xf32>
      %c2_i32 = arith.constant 2 : i32
      %c0_i32_50 = arith.constant 0 : i32
      %83 = arith.cmpi eq, %c2_i32, %c0_i32_50 : i32
      %c1_i32_51 = arith.constant 1 : i32
      %84 = arith.select %83, %c1_i32_51, %c2_i32 : i32
      %85 = vector.broadcast %84 : i32 to vector<128x128xi32>
      %86 = arith.remsi %80, %85 : vector<128x128xi32>
      %c0_i32_52 = arith.constant 0 : i32
      %87 = vector.broadcast %c0_i32_52 : i32 to vector<128x128xi32>
      %88 = arith.cmpi ne, %86, %87 : vector<128x128xi32>
      %c0_i32_53 = arith.constant 0 : i32
      %89 = vector.broadcast %c0_i32_53 : i32 to vector<128x128xi32>
      %90 = arith.cmpi slt, %86, %89 : vector<128x128xi32>
      %c0_i32_54 = arith.constant 0 : i32
      %91 = arith.cmpi slt, %84, %c0_i32_54 : i32
      %92 = vector.broadcast %91 : i1 to vector<128x128xi1>
      %93 = vector.broadcast %92 : vector<128x128xi1> to vector<128x128xi1>
      %94 = arith.xori %90, %93 : vector<128x128xi1>
      %95 = arith.andi %94, %88 : vector<128x128xi1>
      %96 = vector.broadcast %84 : i32 to vector<128x128xi32>
      %97 = arith.addi %86, %96 : vector<128x128xi32>
      %98 = arith.select %95, %97, %86 : vector<128x128xi1>, vector<128x128xi32>
      %c0_i32_55 = arith.constant 0 : i32
      %99 = vector.broadcast %c0_i32_55 : i32 to vector<128x128xi32>
      %100 = arith.cmpi eq, %98, %99 : vector<128x128xi32>
      %cst_56 = arith.constant 0.000000e+00 : f32
      %101 = vector.broadcast %cst_56 : f32 to vector<128x128xf32>
      %102 = arith.subf %101, %81 : vector<128x128xf32>
      %103 = arith.select %100, %102, %82 : vector<128x128xi1>, vector<128x128xf32>
      %c0_57 = arith.constant 0 : index
      %c0_58 = arith.constant 0 : index
      %104 = vector.load %arg11[%c0_57, %c0_58] : memref<128x128xbf16, #tpu.memory_space<vmem>>, vector<128x128xbf16>
      %105 = arith.extf %104 : vector<128x128xbf16> to vector<128x128xf32>
      %106 = arith.mulf %67, %105 : vector<128x128xf32>
      %c0_59 = arith.constant 0 : index
      %c0_60 = arith.constant 0 : index
      %107 = vector.load %arg12[%c0_59, %c0_60] : memref<128x128xbf16, #tpu.memory_space<vmem>>, vector<128x128xbf16>
      %108 = arith.extf %107 : vector<128x128xbf16> to vector<128x128xf32>
      %109 = arith.mulf %103, %108 : vector<128x128xf32>
      %110 = arith.addf %106, %109 : vector<128x128xf32>
      %111 = vector.extract_strided_slice %110 {offsets = [0, 0], sizes = [128, 64], strides = [1, 1]} : vector<128x128xf32> to vector<128x64xf32>
      %112 = arith.truncf %111 : vector<128x64xf32> to vector<128x64xbf16>
      %c0_61 = arith.constant 0 : index
      %c0_62 = arith.constant 0 : index
      %113 = vector.load %arg14[%c0_61, %c0_62] : memref<128x64xbf16, #tpu.memory_space<vmem>>, vector<128x64xbf16>
      tpu.vector_store %arg14[%c0_61, %c0_62], %112 {strides = array<i32>} : memref<128x64xbf16, #tpu.memory_space<vmem>>, vector<128x64xbf16>,
      %114 = vector.extract_strided_slice %110 {offsets = [0, 64], sizes = [128, 64], strides = [1, 1]} : vector<128x128xf32> to vector<128x64xf32>
      %115 = tpu.transpose %114, [1, 0] : vector<128x64xf32> -> vector<64x128xf32>
      %116 = arith.truncf %115 : vector<64x128xf32> to vector<64x128xbf16>
      %c0_63 = arith.constant 0 : index
      %c0_64 = arith.constant 0 : index
      %117 = vector.load %arg15[%c0_63, %c0_64] : memref<64x128xbf16, #tpu.memory_space<vmem>>, vector<64x128xbf16>
      tpu.vector_store %arg15[%c0_63, %c0_64], %116 {strides = array<i32>} : memref<64x128xbf16, #tpu.memory_space<vmem>>, vector<64x128xbf16>,
    } else {
    }
    %c64_i32 = arith.constant 64 : i32
    %3 = arith.muli %arg1, %c64_i32 : i32
    %4 = tpu.assume_multiple %3, 64 : i32
    %5 = arith.index_cast %4 : i32 to index
    %c0 = arith.constant 0 : index
    %6 = vector.load %arg14[%5, %c0] : memref<128x64xbf16, #tpu.memory_space<vmem>>, vector<64x64xbf16>
    %c0_1 = arith.constant 0 : index
    %c0_2 = arith.constant 0 : index
    %7 = vector.load %arg15[%c0_1, %c0_2] : memref<64x128xbf16, #tpu.memory_space<vmem>>, vector<64x128xbf16>
    %cst = arith.constant dense<0.000000e+00> : vector<64x128xf32>
    %8 = tpu.matmul %6, %7, %cst {dimension_numbers = #tpu.dot_dimension_numbers<[1], [0], [0], [1], [0, 0, 1, 1], [], []>} : vector<64x64xbf16>, vector<64x128xbf16>, vector<64x128xf32> -> vector<64x128xf32>
    %c0_3 = arith.constant 0 : index
    %c0_4 = arith.constant 0 : index
    %c0_5 = arith.constant 0 : index
    %9 = vector.load %arg10[%c0_3, %c0_4, %c0_5] : memref<1x64x1xf32, #tpu.memory_space<vmem>>, vector<1x64x1xf32>
    %10 = vector.shape_cast %9 : vector<1x64x1xf32> to vector<64x1xf32>
    %c0_6 = arith.constant 0 : index
    %c0_7 = arith.constant 0 : index
    %c0_8 = arith.constant 0 : index
    %11 = vector.load %arg9[%c0_6, %c0_7, %c0_8] : memref<1x1x128xf32, #tpu.memory_space<vmem>>, vector<1x1x128xf32>
    %12 = vector.shape_cast %11 : vector<1x1x128xf32> to vector<1x128xf32>
    %13 = vector.broadcast %10 : vector<64x1xf32> to vector<64x128xf32>
    %14 = vector.broadcast %12 : vector<1x128xf32> to vector<64x128xf32>
    %15 = arith.mulf %13, %14 : vector<64x128xf32>
    %16 = tpu.iota {dimensions = array<i32: 0>} : vector<64x1xi32>
    %17 = vector.broadcast %4 : i32 to vector<64x1xi32>
    %18 = arith.addi %17, %16 : vector<64x1xi32>
    %19 = tpu.iota {dimensions = array<i32: 1>} : vector<1x128xi32>
    %20 = vector.broadcast %18 : vector<64x1xi32> to vector<64x128xi32>
    %21 = vector.broadcast %19 : vector<1x128xi32> to vector<64x128xi32>
    %22 = arith.cmpi sgt, %20, %21 : vector<64x128xi32>
    %cst_9 = arith.constant 2.000000e+00 : f32
    %cst_10 = arith.constant 1.000000e+00 : f32
    %23 = vector.broadcast %cst_9 : f32 to vector<64x128xf32>
    %24 = vector.broadcast %cst_10 : f32 to vector<64x128xf32>
    %25 = arith.select %22, %23, %24 : vector<64x128xi1>, vector<64x128xf32>
    %26 = arith.mulf %8, %15 : vector<64x128xf32>
    %27 = arith.subf %15, %25 : vector<64x128xf32>
    %cst_11 = arith.constant 9.99999995E+11 : f32
    %28 = vector.broadcast %cst_11 : f32 to vector<64x128xf32>
    %29 = arith.mulf %27, %28 : vector<64x128xf32>
    %30 = arith.addf %26, %29 : vector<64x128xf32>
    %c0_12 = arith.constant 0 : index
    %c0_13 = arith.constant 0 : index
    %31 = vector.load %arg17[%c0_12, %c0_13] : memref<6x128xf32, #tpu.memory_space<vmem>>, vector<1x128xf32>
    %32 = arith.index_cast %4 : i32 to index
    %c1 = arith.constant 1 : index
    %33 = vector.load %arg16[%32, %c1] : memref<128x6xf32, #tpu.memory_space<vmem>>, vector<64x1xf32>
    %34 = vector.broadcast %33 : vector<64x1xf32> to vector<64x128xf32>
    %35 = arith.addf %30, %34 : vector<64x128xf32>
    %36 = vector.broadcast %31 : vector<1x128xf32> to vector<64x128xf32>
    %37 = arith.addf %35, %36 : vector<64x128xf32>
    %c0_14 = arith.constant 0 : index
    %c0_15 = arith.constant 0 : index
    %c0_16 = arith.constant 0 : index
    %c0_17 = arith.constant 0 : index
    %38 = vector.load %arg13[%c0_14, %c0_15, %c0_16, %c0_17] : memref<1x3x64x128xf32, #tpu.memory_space<vmem>>, vector<1x1x64x128xf32>
    %39 = vector.shape_cast %38 : vector<1x1x64x128xf32> to vector<64x128xf32>
    %40 = vector.shape_cast %37 : vector<64x128xf32> to vector<1x1x64x128xf32>
    tpu.vector_store %arg13[%c0_14, %c0_15, %c0_16, %c0_17], %40 {strides = array<i32>} : memref<1x3x64x128xf32, #tpu.memory_space<vmem>>, vector<1x1x64x128xf32>,
    %c2 = arith.constant 2 : index
    %c0_18 = arith.constant 0 : index
    %41 = vector.load %arg17[%c2, %c0_18] : memref<6x128xf32, #tpu.memory_space<vmem>>, vector<1x128xf32>
    %42 = arith.index_cast %4 : i32 to index
    %c3 = arith.constant 3 : index
    %43 = vector.load %arg16[%42, %c3] : memref<128x6xf32, #tpu.memory_space<vmem>>, vector<64x1xf32>
    %44 = vector.broadcast %43 : vector<64x1xf32> to vector<64x128xf32>
    %45 = arith.addf %30, %44 : vector<64x128xf32>
    %46 = vector.broadcast %41 : vector<1x128xf32> to vector<64x128xf32>
    %47 = arith.addf %45, %46 : vector<64x128xf32>
    %c0_19 = arith.constant 0 : index
    %c1_20 = arith.constant 1 : index
    %c0_21 = arith.constant 0 : index
    %c0_22 = arith.constant 0 : index
    %48 = vector.load %arg13[%c0_19, %c1_20, %c0_21, %c0_22] : memref<1x3x64x128xf32, #tpu.memory_space<vmem>>, vector<1x1x64x128xf32>
    %49 = vector.shape_cast %48 : vector<1x1x64x128xf32> to vector<64x128xf32>
    %50 = vector.shape_cast %47 : vector<64x128xf32> to vector<1x1x64x128xf32>
    tpu.vector_store %arg13[%c0_19, %c1_20, %c0_21, %c0_22], %50 {strides = array<i32>} : memref<1x3x64x128xf32, #tpu.memory_space<vmem>>, vector<1x1x64x128xf32>,
    %c4 = arith.constant 4 : index
    %c0_23 = arith.constant 0 : index
    %51 = vector.load %arg17[%c4, %c0_23] : memref<6x128xf32, #tpu.memory_space<vmem>>, vector<1x128xf32>
    %52 = arith.index_cast %4 : i32 to index
    %c5 = arith.constant 5 : index
    %53 = vector.load %arg16[%52, %c5] : memref<128x6xf32, #tpu.memory_space<vmem>>, vector<64x1xf32>
    %54 = vector.broadcast %53 : vector<64x1xf32> to vector<64x128xf32>
    %55 = arith.addf %30, %54 : vector<64x128xf32>
    %56 = vector.broadcast %51 : vector<1x128xf32> to vector<64x128xf32>
    %57 = arith.addf %55, %56 : vector<64x128xf32>
    %c0_24 = arith.constant 0 : index
    %c2_25 = arith.constant 2 : index
    %c0_26 = arith.constant 0 : index
    %c0_27 = arith.constant 0 : index
    %58 = vector.load %arg13[%c0_24, %c2_25, %c0_26, %c0_27] : memref<1x3x64x128xf32, #tpu.memory_space<vmem>>, vector<1x1x64x128xf32>
    %59 = vector.shape_cast %58 : vector<1x1x64x128xf32> to vector<64x128xf32>
    %60 = vector.shape_cast %57 : vector<64x128xf32> to vector<1x1x64x128xf32>
    tpu.vector_store %arg13[%c0_24, %c2_25, %c0_26, %c0_27], %60 {strides = array<i32>} : memref<1x3x64x128xf32, #tpu.memory_space<vmem>>, vector<1x1x64x128xf32>,
    return
  }
  func.func @transform_0(%arg0: i32, %arg1: i32) -> (i32, i32, i32) {
    %c0_i32 = arith.constant 0 : i32
    %c0_i32_0 = arith.constant 0 : i32
    %c0_i32_1 = arith.constant 0 : i32
    return %arg0, %c0_i32, %c0_i32_0 : i32, i32, i32
  }
  func.func @transform_1(%arg0: i32, %arg1: i32) -> (i32, i32) {
    %c0_i32 = arith.constant 0 : i32
    %c0_i32_0 = arith.constant 0 : i32
    %c0_i32_1 = arith.constant 0 : i32
    return %c0_i32, %c0_i32_0 : i32, i32
  }
  func.func @transform_2(%arg0: i32, %arg1: i32) -> (i32, i32) {
    %c0_i32 = arith.constant 0 : i32
    %c0_i32_0 = arith.constant 0 : i32
    %c0_i32_1 = arith.constant 0 : i32
    return %c0_i32, %c0_i32_0 : i32, i32
  }
  func.func @transform_3(%arg0: i32, %arg1: i32) -> (i32, i32) {
    %c0_i32 = arith.constant 0 : i32
    %c0_i32_0 = arith.constant 0 : i32
    %c0_i32_1 = arith.constant 0 : i32
    return %c0_i32, %c0_i32_0 : i32, i32
  }
  func.func @transform_4(%arg0: i32, %arg1: i32) -> (i32, i32) {
    %c0_i32 = arith.constant 0 : i32
    %c0_i32_0 = arith.constant 0 : i32
    %c0_i32_1 = arith.constant 0 : i32
    return %c0_i32, %c0_i32_0 : i32, i32
  }
  func.func @transform_5(%arg0: i32, %arg1: i32) -> (i32, i32) {
    %c0_i32 = arith.constant 0 : i32
    %c0_i32_0 = arith.constant 0 : i32
    %c0_i32_1 = arith.constant 0 : i32
    return %c0_i32, %c0_i32_0 : i32, i32
  }
  func.func @transform_6(%arg0: i32, %arg1: i32) -> (i32, i32) {
    %c0_i32 = arith.constant 0 : i32
    %c0_i32_0 = arith.constant 0 : i32
    %c0_i32_1 = arith.constant 0 : i32
    return %c0_i32, %c0_i32_0 : i32, i32
  }
  func.func @transform_7(%arg0: i32, %arg1: i32) -> (i32, i32, i32) {
    %c0_i32 = arith.constant 0 : i32
    %c0_i32_0 = arith.constant 0 : i32
    %c0_i32_1 = arith.constant 0 : i32
    return %arg0, %c0_i32, %c0_i32_0 : i32, i32, i32
  }
  func.func @transform_8(%arg0: i32, %arg1: i32) -> (i32, i32, i32) {
    %c0_i32 = arith.constant 0 : i32
    %c0_i32_0 = arith.constant 0 : i32
    return %arg0, %arg1, %c0_i32 : i32, i32, i32
  }
  func.func @transform_9(%arg0: i32, %arg1: i32) -> (i32, i32) {
    %c0_i32 = arith.constant 0 : i32
    %c0_i32_0 = arith.constant 0 : i32
    %c0_i32_1 = arith.constant 0 : i32
    return %c0_i32, %c0_i32_0 : i32, i32
  }
  func.func @transform_10(%arg0: i32, %arg1: i32) -> (i32, i32) {
    %c0_i32 = arith.constant 0 : i32
    %c0_i32_0 = arith.constant 0 : i32
    %c0_i32_1 = arith.constant 0 : i32
    return %c0_i32, %c0_i32_0 : i32, i32
  }
  func.func @transform_11(%arg0: i32, %arg1: i32) -> (i32, i32, i32, i32) {
    %c0_i32 = arith.constant 0 : i32
    %c0_i32_0 = arith.constant 0 : i32
    %c0_i32_1 = arith.constant 0 : i32
    return %arg0, %c0_i32, %arg1, %c0_i32_0 : i32, i32, i32, i32
  }
}

module attributes {stable_mosaic.version = 11 : i64} {
  func.func @_egp_kernel(%arg0: i32, %arg1: i32, %arg2: memref<1x128x32xbf16, #tpu.memory_space<vmem>>, %arg3: memref<32x128xbf16, #tpu.memory_space<vmem>>, %arg4: memref<1x128xf32, #tpu.memory_space<vmem>>, %arg5: memref<128x6xf32, #tpu.memory_space<vmem>>, %arg6: memref<6x128xf32, #tpu.memory_space<vmem>>, %arg7: memref<1x6xf32, #tpu.memory_space<vmem>>, %arg8: memref<6x1xf32, #tpu.memory_space<vmem>>, %arg9: memref<1x1x128xf32, #tpu.memory_space<vmem>>, %arg10: memref<1x64x1xf32, #tpu.memory_space<vmem>>, %arg11: memref<128x128xbf16, #tpu.memory_space<vmem>>, %arg12: memref<128x128xbf16, #tpu.memory_space<vmem>>, %arg13: memref<1x3x64x128xf32, #tpu.memory_space<vmem>>, %arg14: memref<128x64xbf16, #tpu.memory_space<vmem>>, %arg15: memref<64x128xbf16, #tpu.memory_space<vmem>>, %arg16: memref<128x6xf32, #tpu.memory_space<vmem>>, %arg17: memref<6x128xf32, #tpu.memory_space<vmem>>) attributes {dimension_semantics = [#tpu.dimension_semantics<parallel>, #tpu.dimension_semantics<arbitrary>], iteration_bounds = array<i64: 2, 2>, scalar_prefetch = 0 : i64, scratch_operands = 4 : i64, tpu.core_type = #tpu.core_type<tc>, window_params = [{transform_indices = @transform_0, window_bounds = array<i64: 1, 128, 32>}, {pipeline_mode = #tpu.pipeline_mode<synchronous>, transform_indices = @transform_1, window_bounds = array<i64: 32, 128>}, {pipeline_mode = #tpu.pipeline_mode<synchronous>, transform_indices = @transform_2, window_bounds = array<i64: 1, 128>}, {pipeline_mode = #tpu.pipeline_mode<synchronous>, transform_indices = @transform_3, window_bounds = array<i64: 128, 6>}, {pipeline_mode = #tpu.pipeline_mode<synchronous>, transform_indices = @transform_4, window_bounds = array<i64: 6, 128>}, {pipeline_mode = #tpu.pipeline_mode<synchronous>, transform_indices = @transform_5, window_bounds = array<i64: 1, 6>}, {pipeline_mode = #tpu.pipeline_mode<synchronous>, transform_indices = @transform_6, window_bounds = array<i64: 6, 1>}, {transform_indices = @transform_7, window_bounds = array<i64: 1, 1, 128>}, {transform_indices = @transform_8, window_bounds = array<i64: 1, 64, 1>}, {pipeline_mode = #tpu.pipeline_mode<synchronous>, transform_indices = @transform_9, window_bounds = array<i64: 128, 128>}, {pipeline_mode = #tpu.pipeline_mode<synchronous>, transform_indices = @transform_10, window_bounds = array<i64: 128, 128>}, {transform_indices = @transform_11, window_bounds = array<i64: 1, 3, 64, 128>}]} {
    %c0_i32 = arith.constant 0 : i32
    %0 = arith.cmpi eq, %arg1, %c0_i32 : i32
    %1 = arith.extui %0 : i1 to i32
    %c0_i32_0 = arith.constant 0 : i32
    %2 = arith.cmpi ne, %1, %c0_i32_0 : i32
    scf.if %2 {
      %c0_28 = arith.constant 0 : index
      %c0_29 = arith.constant 0 : index
      %c0_30 = arith.constant 0 : index
      %61 = vector.load %arg2[%c0_28, %c0_29, %c0_30] : memref<1x128x32xbf16, #tpu.memory_space<vmem>>, vector<1x128x32xbf16>
      %62 = vector.shape_cast %61 : vector<1x128x32xbf16> to vector<128x32xbf16>
      %c0_31 = arith.constant 0 : index
      %c0_32 = arith.constant 0 : index
      %63 = vector.load %arg3[%c0_31, %c0_32] : memref<32x128xbf16, #tpu.memory_space<vmem>>, vector<32x128xbf16>
      %cst_33 = arith.constant dense<0.000000e+00> : vector<128x128xf32>
      %64 = tpu.matmul %62, %63, %cst_33 {dimension_numbers = #tpu.dot_dimension_numbers<[1], [0], [0], [1], [0, 0, 1, 1], [], []>} : vector<128x32xbf16>, vector<32x128xbf16>, vector<128x128xf32> -> vector<128x128xf32>
      %c0_34 = arith.constant 0 : index
      %c0_35 = arith.constant 0 : index
      %65 = vector.load %arg4[%c0_34, %c0_35] : memref<1x128xf32, #tpu.memory_space<vmem>>, vector<1x128xf32>
      %66 = vector.broadcast %65 : vector<1x128xf32> to vector<128x128xf32>
      %67 = arith.addf %64, %66 : vector<128x128xf32>
      %c0_36 = arith.constant 0 : index
      %c0_37 = arith.constant 0 : index
      %68 = vector.load %arg5[%c0_36, %c0_37] : memref<128x6xf32, #tpu.memory_space<vmem>>, vector<128x6xf32>
      %cst_38 = arith.constant dense<0.000000e+00> : vector<128x6xf32>
      %69 = tpu.matmul %67, %68, %cst_38 {dimension_numbers = #tpu.dot_dimension_numbers<[1], [0], [0], [1], [0, 0, 1, 1], [], []>} : vector<128x128xf32>, vector<128x6xf32>, vector<128x6xf32> -> vector<128x6xf32>
      %c0_39 = arith.constant 0 : index
      %c0_40 = arith.constant 0 : index
      %70 = vector.load %arg7[%c0_39, %c0_40] : memref<1x6xf32, #tpu.memory_space<vmem>>, vector<1x6xf32>
      %71 = vector.broadcast %70 : vector<1x6xf32> to vector<128x6xf32>
      %72 = arith.addf %69, %71 : vector<128x6xf32>
      %c0_41 = arith.constant 0 : index
      %c0_42 = arith.constant 0 : index
      %73 = vector.load %arg16[%c0_41, %c0_42] : memref<128x6xf32, #tpu.memory_space<vmem>>, vector<128x6xf32>
      tpu.vector_store %arg16[%c0_41, %c0_42], %72 {strides = array<i32>} : memref<128x6xf32, #tpu.memory_space<vmem>>, vector<128x6xf32>,
      %c0_43 = arith.constant 0 : index
      %c0_44 = arith.constant 0 : index
      %74 = vector.load %arg6[%c0_43, %c0_44] : memref<6x128xf32, #tpu.memory_space<vmem>>, vector<6x128xf32>
      %cst_45 = arith.constant dense<0.000000e+00> : vector<6x128xf32>
      %75 = tpu.matmul %74, %67, %cst_45 {dimension_numbers = #tpu.dot_dimension_numbers<[1], [1], [0], [0], [0, 0, 1, 0], [], []>} : vector<6x128xf32>, vector<128x128xf32>, vector<6x128xf32> -> vector<6x128xf32>
      %c0_46 = arith.constant 0 : index
      %c0_47 = arith.constant 0 : index
      %76 = vector.load %arg8[%c0_46, %c0_47] : memref<6x1xf32, #tpu.memory_space<vmem>>, vector<6x1xf32>
      %77 = vector.broadcast %76 : vector<6x1xf32> to vector<6x128xf32>
      %78 = arith.addf %75, %77 : vector<6x128xf32>
      %c0_48 = arith.constant 0 : index
      %c0_49 = arith.constant 0 : index
      %79 = vector.load %arg17[%c0_48, %c0_49] : memref<6x128xf32, #tpu.memory_space<vmem>>, vector<6x128xf32>
      tpu.vector_store %arg17[%c0_48, %c0_49], %78 {strides = array<i32>} : memref<6x128xf32, #tpu.memory_space<vmem>>, vector<6x128xf32>,
      %80 = tpu.iota {dimensions = array<i32: 1>} : vector<128x128xi32>
      %c127_i32 = arith.constant 127 : i32
      %81 = tpu.dynamic_rotate %67 by %c127_i32 dim 1 : vector<128x128xf32>, i32 -> vector<128x128xf32>
      %c1_i32 = arith.constant 1 : i32
      %82 = tpu.dynamic_rotate %67 by %c1_i32 dim 1 : vector<128x128xf32>, i32 -> vector<128x128xf32>
      %c2_i32 = arith.constant 2 : i32
      %c0_i32_50 = arith.constant 0 : i32
      %83 = arith.cmpi eq, %c2_i32, %c0_i32_50 : i32
      %c1_i32_51 = arith.constant 1 : i32
      %84 = arith.select %83, %c1_i32_51, %c2_i32 : i32
      %85 = vector.broadcast %84 : i32 to vector<128x128xi32>
      %86 = arith.remsi %80, %85 : vector<128x128xi32>
      %c0_i32_52 = arith.constant 0 : i32
      %87 = vector.broadcast %c0_i32_52 : i32 to vector<128x128xi32>
      %88 = arith.cmpi ne, %86, %87 : vector<128x128xi32>
      %c0_i32_53 = arith.constant 0 : i32
      %89 = vector.broadcast %c0_i32_53 : i32 to vector<128x128xi32>
      %90 = arith.cmpi slt, %86, %89 : vector<128x128xi32>
      %c0_i32_54 = arith.constant 0 : i32
      %91 = arith.cmpi slt, %84, %c0_i32_54 : i32
      %92 = vector.broadcast %91 : i1 to vector<128x128xi1>
      %93 = vector.broadcast %92 : vector<128x128xi1> to vector<128x128xi1>
      %94 = arith.xori %90, %93 : vector<128x128xi1>
      %95 = arith.andi %94, %88 : vector<128x128xi1>
      %96 = vector.broadcast %84 : i32 to vector<128x128xi32>
      %97 = arith.addi %86, %96 : vector<128x128xi32>
      %98 = arith.select %95, %97, %86 : vector<128x128xi1>, vector<128x128xi32>
      %c0_i32_55 = arith.constant 0 : i32
      %99 = vector.broadcast %c0_i32_55 : i32 to vector<128x128xi32>
      %100 = arith.cmpi eq, %98, %99 : vector<128x128xi32>
      %cst_56 = arith.constant 0.000000e+00 : f32
      %101 = vector.broadcast %cst_56 : f32 to vector<128x128xf32>
      %102 = arith.subf %101, %81 : vector<128x128xf32>
      %103 = arith.select %100, %102, %82 : vector<128x128xi1>, vector<128x128xf32>
      %c0_57 = arith.constant 0 : index
      %c0_58 = arith.constant 0 : index
      %104 = vector.load %arg11[%c0_57, %c0_58] : memref<128x128xbf16, #tpu.memory_space<vmem>>, vector<128x128xbf16>
      %105 = arith.extf %104 : vector<128x128xbf16> to vector<128x128xf32>
      %106 = arith.mulf %67, %105 : vector<128x128xf32>
      %c0_59 = arith.constant 0 : index
      %c0_60 = arith.constant 0 : index
      %107 = vector.load %arg12[%c0_59, %c0_60] : memref<128x128xbf16, #tpu.memory_space<vmem>>, vector<128x128xbf16>
      %108 = arith.extf %107 : vector<128x128xbf16> to vector<128x128xf32>
      %109 = arith.mulf %103, %108 : vector<128x128xf32>
      %110 = arith.addf %106, %109 : vector<128x128xf32>
      %111 = vector.extract_strided_slice %110 {offsets = [0, 0], sizes = [128, 64], strides = [1, 1]} : vector<128x128xf32> to vector<128x64xf32>
      %112 = arith.truncf %111 : vector<128x64xf32> to vector<128x64xbf16>
      %c0_61 = arith.constant 0 : index
      %c0_62 = arith.constant 0 : index
      %113 = vector.load %arg14[%c0_61, %c0_62] : memref<128x64xbf16, #tpu.memory_space<vmem>>, vector<128x64xbf16>
      tpu.vector_store %arg14[%c0_61, %c0_62], %112 {strides = array<i32>} : memref<128x64xbf16, #tpu.memory_space<vmem>>, vector<128x64xbf16>,
      %114 = vector.extract_strided_slice %110 {offsets = [0, 64], sizes = [128, 64], strides = [1, 1]} : vector<128x128xf32> to vector<128x64xf32>
      %115 = tpu.transpose %114, [1, 0] : vector<128x64xf32> -> vector<64x128xf32>
      %116 = arith.truncf %115 : vector<64x128xf32> to vector<64x128xbf16>
      %c0_63 = arith.constant 0 : index
      %c0_64 = arith.constant 0 : index
      %117 = vector.load %arg15[%c0_63, %c0_64] : memref<64x128xbf16, #tpu.memory_space<vmem>>, vector<64x128xbf16>
      tpu.vector_store %arg15[%c0_63, %c0_64], %116 {strides = array<i32>} : memref<64x128xbf16, #tpu.memory_space<vmem>>, vector<64x128xbf16>,
    } else {
    }
    %c64_i32 = arith.constant 64 : i32
    %3 = arith.muli %arg1, %c64_i32 : i32
    %4 = tpu.assume_multiple %3, 64 : i32
    %5 = arith.index_cast %4 : i32 to index
    %c0 = arith.constant 0 : index
    %6 = vector.load %arg14[%5, %c0] : memref<128x64xbf16, #tpu.memory_space<vmem>>, vector<64x64xbf16>
    %c0_1 = arith.constant 0 : index
    %c0_2 = arith.constant 0 : index
    %7 = vector.load %arg15[%c0_1, %c0_2] : memref<64x128xbf16, #tpu.memory_space<vmem>>, vector<64x128xbf16>
    %cst = arith.constant dense<0.000000e+00> : vector<64x128xf32>
    %8 = tpu.matmul %6, %7, %cst {dimension_numbers = #tpu.dot_dimension_numbers<[1], [0], [0], [1], [0, 0, 1, 1], [], []>} : vector<64x64xbf16>, vector<64x128xbf16>, vector<64x128xf32> -> vector<64x128xf32>
    %c0_3 = arith.constant 0 : index
    %c0_4 = arith.constant 0 : index
    %c0_5 = arith.constant 0 : index
    %9 = vector.load %arg10[%c0_3, %c0_4, %c0_5] : memref<1x64x1xf32, #tpu.memory_space<vmem>>, vector<1x64x1xf32>
    %10 = vector.shape_cast %9 : vector<1x64x1xf32> to vector<64x1xf32>
    %c0_6 = arith.constant 0 : index
    %c0_7 = arith.constant 0 : index
    %c0_8 = arith.constant 0 : index
    %11 = vector.load %arg9[%c0_6, %c0_7, %c0_8] : memref<1x1x128xf32, #tpu.memory_space<vmem>>, vector<1x1x128xf32>
    %12 = vector.shape_cast %11 : vector<1x1x128xf32> to vector<1x128xf32>
    %13 = vector.broadcast %10 : vector<64x1xf32> to vector<64x128xf32>
    %14 = vector.broadcast %12 : vector<1x128xf32> to vector<64x128xf32>
    %15 = arith.mulf %13, %14 : vector<64x128xf32>
    %16 = tpu.iota {dimensions = array<i32: 0>} : vector<64x1xi32>
    %17 = vector.broadcast %4 : i32 to vector<64x1xi32>
    %18 = arith.addi %17, %16 : vector<64x1xi32>
    %19 = tpu.iota {dimensions = array<i32: 1>} : vector<1x128xi32>
    %20 = vector.broadcast %18 : vector<64x1xi32> to vector<64x128xi32>
    %21 = vector.broadcast %19 : vector<1x128xi32> to vector<64x128xi32>
    %22 = arith.cmpi sgt, %20, %21 : vector<64x128xi32>
    %cst_9 = arith.constant 2.000000e+00 : f32
    %cst_10 = arith.constant 1.000000e+00 : f32
    %23 = vector.broadcast %cst_9 : f32 to vector<64x128xf32>
    %24 = vector.broadcast %cst_10 : f32 to vector<64x128xf32>
    %25 = arith.select %22, %23, %24 : vector<64x128xi1>, vector<64x128xf32>
    %26 = arith.mulf %8, %15 : vector<64x128xf32>
    %27 = arith.subf %15, %25 : vector<64x128xf32>
    %cst_11 = arith.constant 9.99999995E+11 : f32
    %28 = vector.broadcast %cst_11 : f32 to vector<64x128xf32>
    %29 = arith.mulf %27, %28 : vector<64x128xf32>
    %30 = arith.addf %26, %29 : vector<64x128xf32>
    %c0_12 = arith.constant 0 : index
    %c0_13 = arith.constant 0 : index
    %31 = vector.load %arg17[%c0_12, %c0_13] : memref<6x128xf32, #tpu.memory_space<vmem>>, vector<1x128xf32>
    %32 = arith.index_cast %4 : i32 to index
    %c1 = arith.constant 1 : index
    %33 = vector.load %arg16[%32, %c1] : memref<128x6xf32, #tpu.memory_space<vmem>>, vector<64x1xf32>
    %34 = vector.broadcast %33 : vector<64x1xf32> to vector<64x128xf32>
    %35 = arith.addf %30, %34 : vector<64x128xf32>
    %36 = vector.broadcast %31 : vector<1x128xf32> to vector<64x128xf32>
    %37 = arith.addf %35, %36 : vector<64x128xf32>
    %c0_14 = arith.constant 0 : index
    %c0_15 = arith.constant 0 : index
    %c0_16 = arith.constant 0 : index
    %c0_17 = arith.constant 0 : index
    %38 = vector.load %arg13[%c0_14, %c0_15, %c0_16, %c0_17] : memref<1x3x64x128xf32, #tpu.memory_space<vmem>>, vector<1x1x64x128xf32>
    %39 = vector.shape_cast %38 : vector<1x1x64x128xf32> to vector<64x128xf32>
    %40 = vector.shape_cast %37 : vector<64x128xf32> to vector<1x1x64x128xf32>
    tpu.vector_store %arg13[%c0_14, %c0_15, %c0_16, %c0_17], %40 {strides = array<i32>} : memref<1x3x64x128xf32, #tpu.memory_space<vmem>>, vector<1x1x64x128xf32>,
    %c2 = arith.constant 2 : index
    %c0_18 = arith.constant 0 : index
    %41 = vector.load %arg17[%c2, %c0_18] : memref<6x128xf32, #tpu.memory_space<vmem>>, vector<1x128xf32>
    %42 = arith.index_cast %4 : i32 to index
    %c3 = arith.constant 3 : index
    %43 = vector.load %arg16[%42, %c3] : memref<128x6xf32, #tpu.memory_space<vmem>>, vector<64x1xf32>
    %44 = vector.broadcast %43 : vector<64x1xf32> to vector<64x128xf32>
    %45 = arith.addf %30, %44 : vector<64x128xf32>
    %46 = vector.broadcast %41 : vector<1x128xf32> to vector<64x128xf32>
    %47 = arith.addf %45, %46 : vector<64x128xf32>
    %c0_19 = arith.constant 0 : index
    %c1_20 = arith.constant 1 : index
    %c0_21 = arith.constant 0 : index
    %c0_22 = arith.constant 0 : index
    %48 = vector.load %arg13[%c0_19, %c1_20, %c0_21, %c0_22] : memref<1x3x64x128xf32, #tpu.memory_space<vmem>>, vector<1x1x64x128xf32>
    %49 = vector.shape_cast %48 : vector<1x1x64x128xf32> to vector<64x128xf32>
    %50 = vector.shape_cast %47 : vector<64x128xf32> to vector<1x1x64x128xf32>
    tpu.vector_store %arg13[%c0_19, %c1_20, %c0_21, %c0_22], %50 {strides = array<i32>} : memref<1x3x64x128xf32, #tpu.memory_space<vmem>>, vector<1x1x64x128xf32>,
    %c4 = arith.constant 4 : index
    %c0_23 = arith.constant 0 : index
    %51 = vector.load %arg17[%c4, %c0_23] : memref<6x128xf32, #tpu.memory_space<vmem>>, vector<1x128xf32>
    %52 = arith.index_cast %4 : i32 to index
    %c5 = arith.constant 5 : index
    %53 = vector.load %arg16[%52, %c5] : memref<128x6xf32, #tpu.memory_space<vmem>>, vector<64x1xf32>
    %54 = vector.broadcast %53 : vector<64x1xf32> to vector<64x128xf32>
    %55 = arith.addf %30, %54 : vector<64x128xf32>
    %56 = vector.broadcast %51 : vector<1x128xf32> to vector<64x128xf32>
    %57 = arith.addf %55, %56 : vector<64x128xf32>
    %c0_24 = arith.constant 0 : index
    %c2_25 = arith.constant 2 : index
    %c0_26 = arith.constant 0 : index
    %c0_27 = arith.constant 0 : index
    %58 = vector.load %arg13[%c0_24, %c2_25, %c0_26, %c0_27] : memref<1x3x64x128xf32, #tpu.memory_space<vmem>>, vector<1x1x64x128xf32>
    %59 = vector.shape_cast %58 : vector<1x1x64x128xf32> to vector<64x128xf32>
    %60 = vector.shape_cast %57 : vector<64x128xf32> to vector<1x1x64x128xf32>
    tpu.vector_store %arg13[%c0_24, %c2_25, %c0_26, %c0_27], %60 {strides = array<i32>} : memref<1x3x64x128xf32, #tpu.memory_space<vmem>>, vector<1x1x64x128xf32>,
    return
  }
  func.func @transform_0(%arg0: i32, %arg1: i32) -> (i32, i32, i32) {
    %c0_i32 = arith.constant 0 : i32
    %c0_i32_0 = arith.constant 0 : i32
    %c0_i32_1 = arith.constant 0 : i32
    return %arg0, %c0_i32, %c0_i32_0 : i32, i32, i32
  }
  func.func @transform_1(%arg0: i32, %arg1: i32) -> (i32, i32) {
    %c0_i32 = arith.constant 0 : i32
    %c0_i32_0 = arith.constant 0 : i32
    %c0_i32_1 = arith.constant 0 : i32
    return %c0_i32, %c0_i32_0 : i32, i32
  }
  func.func @transform_2(%arg0: i32, %arg1: i32) -> (i32, i32) {
    %c0_i32 = arith.constant 0 : i32
    %c0_i32_0 = arith.constant 0 : i32
    %c0_i32_1 = arith.constant 0 : i32
    return %c0_i32, %c0_i32_0 : i32, i32
  }
  func.func @transform_3(%arg0: i32, %arg1: i32) -> (i32, i32) {
    %c0_i32 = arith.constant 0 : i32
    %c0_i32_0 = arith.constant 0 : i32
    %c0_i32_1 = arith.constant 0 : i32
    return %c0_i32, %c0_i32_0 : i32, i32
  }
  func.func @transform_4(%arg0: i32, %arg1: i32) -> (i32, i32) {
    %c0_i32 = arith.constant 0 : i32
    %c0_i32_0 = arith.constant 0 : i32
    %c0_i32_1 = arith.constant 0 : i32
    return %c0_i32, %c0_i32_0 : i32, i32
  }
  func.func @transform_5(%arg0: i32, %arg1: i32) -> (i32, i32) {
    %c0_i32 = arith.constant 0 : i32
    %c0_i32_0 = arith.constant 0 : i32
    %c0_i32_1 = arith.constant 0 : i32
    return %c0_i32, %c0_i32_0 : i32, i32
  }
  func.func @transform_6(%arg0: i32, %arg1: i32) -> (i32, i32) {
    %c0_i32 = arith.constant 0 : i32
    %c0_i32_0 = arith.constant 0 : i32
    %c0_i32_1 = arith.constant 0 : i32
    return %c0_i32, %c0_i32_0 : i32, i32
  }
  func.func @transform_7(%arg0: i32, %arg1: i32) -> (i32, i32, i32) {
    %c0_i32 = arith.constant 0 : i32
    %c0_i32_0 = arith.constant 0 : i32
    %c0_i32_1 = arith.constant 0 : i32
    return %arg0, %c0_i32, %c0_i32_0 : i32, i32, i32
  }
  func.func @transform_8(%arg0: i32, %arg1: i32) -> (i32, i32, i32) {
    %c0_i32 = arith.constant 0 : i32
    %c0_i32_0 = arith.constant 0 : i32
    return %arg0, %arg1, %c0_i32 : i32, i32, i32
  }
  func.func @transform_9(%arg0: i32, %arg1: i32) -> (i32, i32) {
    %c0_i32 = arith.constant 0 : i32
    %c0_i32_0 = arith.constant 0 : i32
    %c0_i32_1 = arith.constant 0 : i32
    return %c0_i32, %c0_i32_0 : i32, i32
  }
  func.func @transform_10(%arg0: i32, %arg1: i32) -> (i32, i32) {
    %c0_i32 = arith.constant 0 : i32
    %c0_i32_0 = arith.constant 0 : i32
    %c0_i32_1 = arith.constant 0 : i32
    return %c0_i32, %c0_i32_0 : i32, i32
  }
  func.func @transform_11(%arg0: i32, %arg1: i32) -> (i32, i32, i32, i32) {
    %c0_i32 = arith.constant 0 : i32
    %c0_i32_0 = arith.constant 0 : i32
    %c0_i32_1 = arith.constant 0 : i32
    return %arg0, %c0_i32, %arg1, %c0_i32_0 : i32, i32, i32, i32
  }
}

</mosaic_0001>

<bundles_post_ra>
// kernel: tpu_custom_call.1
= control target key start
LH: loop header
LB: loop body
LE: loop exit
PB: predicated region body
PF: predicated region fallthrough
CT: control target
= control target key end

     0   :  { %s3200_s0 = inlined_call_operand.vmem [shape: bf16[2,128,32], index: 0, kind: input, shape index: {}]   ;;  %s3201_s1 = inlined_call_operand.vmem [shape: bf16[32,128], index: 1, kind: input, shape index: {}]   ;;  %s3202_s2 = inlined_call_operand.vmem [shape: f32[1,128], index: 2, kind: input, shape index: {}]   ;;  %s3203_s3 = inlined_call_operand.vmem [shape: f32[128,6], index: 3, kind: input, shape index: {}]   ;;  %s3204_s4 = inlined_call_operand.vmem [shape: f32[6,128], index: 4, kind: input, shape index: {}]   ;;  %s3205_s5 = inlined_call_operand.vmem [shape: f32[1,6], index: 5, kind: input, shape index: {}]   ;;  %s3206_s6 = inlined_call_operand.vmem [shape: f32[6,1], index: 6, kind: input, shape index: {}]   ;;  %s3207_s7 = inlined_call_operand.vmem [shape: f32[2,1,128], index: 7, kind: input, shape index: {}]   ;;  %s3208_s8 = inlined_call_operand.vmem [shape: f32[2,128,1], index: 8, kind: input, shape index: {}]   ;;  %s3209_s9 = inlined_call_operand.vmem [shape: bf16[128,128], index: 9, kind: input, shape index: {}]   ;;  %s3210_s10 = inlined_call_operand.vmem [shape: bf16[128,128], index: 10, kind: input, shape index: {}]   ;;  %s3211_s11 = inlined_call_operand.hbm [shape: f32[2,3,128,128], index: 11, kind: output, shape index: {}]  }
   0x1   :  { %3225 = sst [smem:[#allocation22_spill]] %s3211_s11 }
   0x2   :  { %16 = vsyncpa [#allocation7], 0 }
   0x3   :  { %18 = vsyncpa [#allocation7 + $0x1], 0  ;;  %s2534_s17 = smov 0   ;;  %s2536_s18 = smov 0  }
   0x4   :  { %s2538_s19 = smov 0   ;;  %s2540_s20 = smov 0  }
   0x5   :  { %s2542_s21 = smov 0   ;;  %s2544_s22 = smov 0  }
   0x6   :  { %s2546_s23 = smov 0   ;;  %s2548_s24 = smov 0  }
   0x7 LB: > { %3226 = sst [smem:[#allocation11_spill]] %s2426_s17  ;;  %s1874_s25 = sadd.s32 4294967295, %s2454_s24   ;;  %s2454_s24 = sphi %s2548_s24, %s24_s24   ;;  %s2450_s23 = sphi %s2546_s23, %s3253_s23   ;;  %s2446_s22 = sphi %s2544_s22, %s3256_s22   ;;  %s2442_s21 = sphi %s2542_s21, %s3251_s21   ;;  %s2438_s20 = sphi %s2540_s20, %s3250_s20   ;;  %s2434_s19 = sphi %s2538_s19, %s3249_s19   ;;  %s2430_s18 = sphi %s2536_s18, %s3255_s18   ;;  %s2426_s17 = sphi %s2534_s17, %s3254_s17  }
   0x8   : > { %3227 = sst [smem:[#allocation12_spill]] %s2434_s19  ;;  %s1875_s26 = sadd.s32 4294967294, %s2454_s24  }
   0x9   : > { %3228 = sst [smem:[#allocation13_spill]] %s2442_s21  ;;  %s33_s27 = sadd.s32 1, %s2446_s22 }
   0xa   : > { %3229 = sst [smem:[#allocation14_spill]] %s2446_s22  ;;  %p34_p0 = scmp.ge.s32.totalorder %s33_s27, 2 }
   0xb   : > { %3230 = sst [smem:[#allocation15_spill]] %s2450_s23  ;;  %s36_s28 = sadd.s32 1, %s2450_s23 }
   0xc   : > { %3231 = sst [smem:[#allocation16_spill]] %s2454_s24  ;;  %p303_p1 = scmp.ne.s32.totalorder %s2434_s19, %s2430_s18 }
   0xd   : > { %p304_p2 = scmp.eq.s32.totalorder %s1874_s25, 3  ;;  %s3258_s27 = smov (%p34_p0, %s33_s27), 0 }
   0xe   : > { %3232 = sst [smem:[#allocation17_spill]] %s3258_s27  ;;  %s3260_s28 = smov (!%p34_p0, %s36_s28), %s2450_s23 }
   0xf   : > { %s289_s29 = ssub.s32 %s2446_s22, %s3258_s27  ;;  %p2585_p3 = por %p304_p2, %p303_p1 }
  0x10   : > { %p38_p4 = scmp.ge.s32.totalorder %s3260_s28, 2  ;;  %p309_p5 = scmp.ne.s32.totalorder %s2430_s18, %s2426_s17 }
  0x11   : > { %s3233_s30 = scalar_select %p2585_p3, 1, 0 }
  0x12   : > { %p310_p6 = scmp.eq.s32.totalorder %s1875_s26, 3  ;;  %p1878_p7 = scmp.ge.s32.totalorder %s2454_s24, 1 }
  0x13   : > { %3234 = sst [smem:[#allocation18_spill]] %s3233_s30  ;;  %s3262_s28 = smov (%p38_p4, %s3260_s28), 0 }
  0x14   : > { %3235 = sst [smem:[#allocation19_spill]] %s3262_s28  ;;  %p2594_p8 = por %p310_p6, %p309_p5 }
  0x15   : > { %p379_p9 = scmp.lt.s32.totalorder %s2454_s24, 5  ;;  %s288_s13 = ssub.s32 %s2450_s23, %s3262_s28 }
  0x16   : > { %s3236_s12 = scalar_select %p2594_p8, 1, 0 }
  0x17   : > { %s293_s14 = sadd.s32 1, %s2434_s19  ;;  %s290_s15 = sor.u32 %s289_s29, %s288_s13 }
  0x18   : > { %3237 = sst [smem:[#allocation20_spill]] %s3236_s12  ;;  %p380_p10 = pnand %p1878_p7, %p379_p9 }
  0x19   : > { %p291_p11 = scmp.eq.s32.totalorder %s290_s15, 0  ;;  %s3216_s25 = sand.u32 (!%p380_p10), 1, %s2430_s18  }
  0x1a   : > { %383 = sbr.rel (%p380_p10) target bundleno = 928 (0x3a0), region = 64  ;;  %p431_p12 = scmp.lt.s32.totalorder (!%p380_p10), %s2442_s21, 1 }
  0x1b   : > { %s2603_s16 = scalar_select %p291_p11, %s2434_s19, %s293_s14  }
  0x1c   : > { %s2272_s26 = smul.u32 (!%p380_p10), 192, %s3216_s25  ;;  %s2610_s27 = sshll.u32 (!%p380_p10), %s2438_s20, 3 }
  0x1d   : > { %3238 = sst [smem:[#allocation21_spill]] %s2603_s16  ;;  %p442_p13 = scmp.lt.s32.totalorder (!%p380_p10), %s2610_s27, 15 }
  0x1e   : > { %p1884_p0 = scmp.ne.s32.totalorder (!%p380_p10), %s2438_s20, 0 }
  0x21   : > { %s2613_s28 = scalar_select %p431_p12, %s2442_s21, 1 }
  0x22   : > { %s443_s19 = scalar_select %p442_p13, %s2610_s27, 15 }
  0x23   : > { %s1935_s29 = sshll.u32 %s2613_s28, 6  ;;  %s438_s15 = scalar_lea.vmem %s3207_s7, %s2613_s28  ;;  %v2370_v0 = vld [vmem:[%s3201_s1] sm:$0xff] (!%p1884_p0)   ;;  %v2371_v1 = vld [vmem:[%s3201_s1 + $0x8] sm:$0xff] (!%p1884_p0)   ;;  %vm534_vm0 = vcmask (!%p1884_p0), 261120   ;;  %v658_v7 = vld [vmem:[%s3203_s3 + $0x10] sm:$0xff] (!%p1884_p0)  ;;  %v2456_v34 = vmov (!%p1884_p0), 0.0|0.0  }
  0x24   : > { %s2624_s16 = scalar_lea.vmem %s3200_s0, %s1935_s29  ;;  %s1882_s25 = sshll.u32 %s2613_s28, 4  ;;  %2081 = vmatprep.subr.bf16.mxu1 (!%p1884_p0), %v2370_v0  ;;  %v656_v5 = vld [vmem:[%s3203_s3] sm:$0xff] (!%p1884_p0)  ;;  %v657_v6 = vld [vmem:[%s3203_s3 + $0x8] sm:$0xff] (!%p1884_p0)  ;;  %v659_v9 = vld [vmem:[%s3203_s3 + $0x18] sm:$0xff] (!%p1884_p0)  ;;  %2240 = vmatprep.subr.bf16.mxu0 (!%p1884_p0), %v2456_v34  ;;  %vm2459_vm1 = vmmov (!%p1884_p0), 0   ;;  %vm1150_vm3 = vcmask (!%p1884_p0), 523264  }
  0x25   : > { %s445_s12 = sadd.s32 %s1882_s25, %s443_s19  ;;  %s2633_s21 = scalar_lea.vmem [#allocation6], %s2272_s26  ;;  %v2372_v2 = vld [vmem:[%s2624_s16] sm:$0xff] (!%p1884_p0)   ;;  %2082 = vmatpush3.bf16.msra.mxu1 (!%p1884_p0), %v2370_v0  ;;  %v2373_v3 = vld [vmem:[%s2624_s16 + $0x8] sm:$0xff] (!%p1884_p0)   ;;  %v2374_v4 = vld [vmem:[%s2624_s16 + $0x10] sm:$0xff] (!%p1884_p0)   ;;  %v2208_v8 = vpack.c.bf16 (!%p1884_p0), %v657_v6, %v656_v5  ;;  %v2212_v10 = vpack.c.bf16 (!%p1884_p0), %v659_v9, %v658_v7  ;;  %vm824_vm4 = vcmask (!%p1884_p0), 48128  }
  0x26   : > { %s1883_s17 = sshll.u32 %s445_s12, 3  ;;  %454 = sbr.rel (%p1884_p0) target bundleno = 665 (0x299), region = 68  ;;  %2083 = vmatprep.subr.bf16.mxu1 (!%p1884_p0), %v2371_v1  ;;  %2085 = vmatprep.mubr.msk.bf16.mxu1 (!%p1884_p0), %vm534_vm0, %v2372_v2  ;;  %v660_v11 = vld [vmem:[%s3203_s3 + $0x20] sm:$0xff] (!%p1884_p0)  ;;  %v661_v12 = vld [vmem:[%s3203_s3 + $0x28] sm:$0xff] (!%p1884_p0)  ;;  %v2375_v13 = vld [vmem:[%s2624_s16 + $0x18] sm:$0xff] (!%p1884_p0)  }
  0x27   : > { %s2631_s30 = scalar_lea.vmem %s3208_s8, %s1883_s17  ;;  %v2376_v14 = vld [vmem:[%s2624_s16 + $0x20] sm:$0xff] (!%p1884_p0)   ;;  %v2216_v15 = vpack.c.bf16 (!%p1884_p0), %v661_v12, %v660_v11  ;;  %v662_v16 = vld [vmem:[%s3203_s3 + $0x30] sm:$0xff] (!%p1884_p0)  ;;  %v663_v17 = vld [vmem:[%s3203_s3 + $0x38] sm:$0xff] (!%p1884_p0)  ;;  %s2457_s14 = smov (!%p1884_p0), 1   ;;  %v2460_v12 = vmov (!%p1884_p0), 0.0  }
  0x28   : > { %v2220_v18 = vpack.c.bf16 (!%p1884_p0), %v663_v17, %v662_v16  ;;  %v664_v19 = vld [vmem:[%s3203_s3 + $0x40] sm:$0xff] (!%p1884_p0)  ;;  %v665_v20 = vld [vmem:[%s3203_s3 + $0x48] sm:$0xff] (!%p1884_p0)  ;;  %v2378_v22 = vld [vmem:[%s2624_s16 + $0x30] sm:$0xff] (!%p1884_p0)   ;;  %s2458_s22 = smov (!%p1884_p0), 127   ;;  %2189 = vmatprep.mubr.msk.f32.mxu0 (!%p1884_p0), %vm2459_vm1, %v2460_v12  ;;  %s2461_s13 = smov (!%p1884_p0), 64  }
  0x29   : > { %2084 = vmatpush3.bf16.msra.mxu1 (!%p1884_p0), %v2371_v1  ;;  %v2377_v21 = vld [vmem:[%s2624_s16 + $0x28] sm:$0xff] (!%p1884_p0)   ;;  %v2224_v23 = vpack.c.bf16 (!%p1884_p0), %v665_v20, %v664_v19  ;;  %v666_v24 = vld [vmem:[%s3203_s3 + $0x50] sm:$0xff] (!%p1884_p0)  ;;  %v667_v25 = vld [vmem:[%s3203_s3 + $0x58] sm:$0xff] (!%p1884_p0) }
  0x2a   : > { %2209 = vmatprep.subr.bf16.mxu1 (!%p1884_p0), %v2208_v8  ;;  %v2228_v26 = vpack.c.bf16 (!%p1884_p0), %v667_v25, %v666_v24  ;;  %v668_v27 = vld [vmem:[%s3203_s3 + $0x60] sm:$0xff] (!%p1884_p0)  ;;  %v669_v28 = vld [vmem:[%s3203_s3 + $0x68] sm:$0xff] (!%p1884_p0)  ;;  %v2379_v29 = vld [vmem:[%s2624_s16 + $0x38] sm:$0xff] (!%p1884_p0)  }
  0x2b   : > { %v2232_v30 = vpack.c.bf16 (!%p1884_p0), %v669_v28, %v668_v27  ;;  %v670_v31 = vld [vmem:[%s3203_s3 + $0x70] sm:$0xff] (!%p1884_p0)  ;;  %v671_v32 = vld [vmem:[%s3203_s3 + $0x78] sm:$0xff] (!%p1884_p0)  ;;  %v2710_v35 = vld [vmem:[%s3202_s2] ss:$0 sm:$0xff] (!%p1884_p0) }
  0x2c   : > { %2086 = vmatmul.mubr.msk.bf16.vlgmr.msra.gmra.mrb[0].mxu1 (!%p1884_p0), %vm534_vm0, %v2373_v3  ;;  %v2236_v33 = vpack.c.bf16 (!%p1884_p0), %v671_v32, %v670_v31  ;;  %v1937_v19 = vld [vmem:[%s3209_s9] sm:$0xff] (!%p1884_p0)   ;;  %v2000_v28 = vld [vmem:[%s3209_s9 + $0x8] sm:$0xff] (!%p1884_p0)  }
  0x2d   : > { %2089 = vmatprep.mubr.msk.bf16.mxu1 %vm534_vm0, %v2374_v4  ;;  %2211 = vmatpush3.bf16.msra.mxu1 %v2208_v8  ;;  %v1969_v20 = vld [vmem:[%s3210_s10] sm:$0xff]  }
  0x2e   : > { %2213 = vmatprep.subr.bf16.mxu1 %v2212_v10  ;;  %v1970_v27 = vunpack.c.l.bf16 %v1969_v20 }
  0x31   : > { %2215 = vmatpush3.bf16.msra.mxu1 %v2212_v10 }
  0x32   : > { %2217 = vmatprep.subr.bf16.mxu1 %v2216_v15 }
  0x34   : > { %2090 = vmatmul.mubr.msk.bf16.gmra.mrb[4].mxu1 %vm534_vm0, %v2375_v13  ;;  %v841_v13 = vld [vmem:[%s3204_s4] sm:$0x3f] }
  0x35   : > { %2093 = vmatprep.mubr.msk.bf16.mxu1 %vm534_vm0, %v2376_v14  ;;  %2219 = vmatpush3.bf16.msra.mxu1 %v2216_v15  ;;  %v919_v14 = vlaneseq }
  0x36   : > { %2221 = vmatprep.subr.bf16.mxu1 %v2220_v18 }
  0x37   : > { %v920_v15 = vand.u32 127, %v919_v14  ;;  %v2009_v14 = vld [vmem:[%s3210_s10 + $0x18] sm:$0xff]  }
  0x39   : > { %2223 = vmatpush3.bf16.msra.mxu1 %v2220_v18  ;;  %v989_v17 = vand.u32 1, %v920_v15 }
  0x3a   : > { %2225 = vmatprep.subr.bf16.mxu1 %v2224_v23 }
  0x3b   : > { %vm2875_vm2 = vcmp.eq.s32.totalorder %v989_v17, 0  ;;  %v2002_v17 = vld [vmem:[%s3209_s9 + $0x18] sm:$0xff]  }
  0x3c   : > { %2094 = vmatmul.mubr.msk.bf16.gmra.mrb[8].mxu1 %vm534_vm0, %v2377_v21 }
  0x3d   : > { %2097 = vmatprep.mubr.msk.bf16.mxu1 %vm534_vm0, %v2378_v22  ;;  %2227 = vmatpush3.bf16.msra.mxu1 %v2224_v23  ;;  %v2007_v22 = vld [vmem:[%s3210_s10 + $0x8] sm:$0xff]  }
  0x3e   : > { %2229 = vmatprep.subr.bf16.mxu1 %v2228_v26 }
  0x41   : > { %2231 = vmatpush3.bf16.msra.mxu1 %v2228_v26  ;;  %v1938_v26 = vunpack.c.l.bf16 %v1937_v19 }
  0x42   : > { %2233 = vmatprep.subr.bf16.mxu1 %v2232_v30 }
  0x44   : > { %2098 = vmatmul.mubr.msk.bf16.gmra.mrb[12].mxu1 %vm534_vm0, %v2379_v29 }
  0x45   : > { %2235 = vmatpush3.bf16.msra.mxu1 %v2232_v30  ;;  %v1974_v30 = vunpack.c.l.bf16 %v2007_v22 }
  0x46   : > { %2237 = vmatprep.subr.bf16.mxu1 %v2236_v33 }
  0x49   : > { %2239 = vmatpush3.bf16.msra.mxu1 %v2236_v33  ;;  %v1942_v33 = vunpack.c.l.bf16 %v2000_v28 }
  0xff   : > { %v2087_v36 = vpop.f32.mrb[0].mxu1 }
 0x100   : > { %v2713_v37 = vadd.f32 %v2087_v36, %v2710_v35  ;;  %v593_v38 = vpop.f32.mrb[1].mxu1 }
 0x101   : > { %v2716_v39 = vadd.f32 %v2710_v35, %v593_v38  ;;  %v2088_v40 = vpop.f32.mrb[2].mxu1 }
 0x102   : > { %v2719_v41 = vadd.f32 %v2088_v40, %v2710_v35  ;;  %957 = vrot.lane.b32.xlu0 %v2713_v37, %s2457_s14  ;;  %925 = vrot.lane.b32.xlu1 %v2713_v37, %s2458_s22  ;;  %v596_v42 = vpop.f32.mrb[3].mxu1 }
 0x103   : > { %v2726_v43 = vadd.f32 %v2710_v35, %v596_v42  ;;  %2133 = vmatprep.mubr.f32.mxu1 %v2716_v39  ;;  %v1062_v38 = vmul.f32 %v1938_v26, %v2716_v39  ;;  %v1943_v42 = vunpack.c.h.bf16 %v2000_v28  ;;  %v1951_v26 = vunpack.c.h.bf16 %v2002_v17 }
 0x104   : > { %v2244_v44 = vpack.c.bf16 %v2719_v41, %v2713_v37  ;;  %v1983_v28 = vunpack.c.h.bf16 %v2009_v14 }
 0x105   : > { %2134 = vmatmul.mubr.f32.vlgmr.msra.gmra.mrb[16].mxu1 %v2726_v43  ;;  %v2241_v45 = vpack.c.bf16 %v2726_v43, %v2716_v39 }
 0x106   : > { %953 = vrot.lane.b32.xlu1 %v2716_v39, %s2457_s14  ;;  %921 = vrot.lane.b32.xlu0 %v2716_v39, %s2458_s22  ;;  %v1971_v39 = vunpack.c.h.bf16 %v1969_v20  ;;  %v1982_v20 = vunpack.c.l.bf16 %v2009_v14 }
 0x107   : > { %2136 = vmatprep.mubr.f32.mxu1 %v2713_v37  ;;  %v2091_v46 = vpop.f32.mrb[4].mxu1  ;;  %2242 = vmatpush3.bf16.xpose.msra.mxu0 %v2241_v45 }
 0x108   : > { %v2740_v47 = vadd.f32 %v2091_v46, %v2710_v35  ;;  %v609_v48 = vpop.f32.mrb[5].mxu1  ;;  %2243 = vmatprep.subr.bf16.mxu0 %v2456_v34 }
 0x109   : > { %v2744_v49 = vadd.f32 %v2710_v35, %v609_v48  ;;  %v2092_v50 = vpop.f32.mrb[6].mxu1  ;;  %2137 = vmatmul.mubr.f32.gmra.mrb[18].mxu1 %v2719_v41 }
 0x10a   : > { %v2748_v51 = vadd.f32 %v2092_v50, %v2710_v35  ;;  %v612_v52 = vpop.f32.mrb[7].mxu1  ;;  %927 = vrot.lane.b32.xlu1 %v2719_v41, %s2458_s22  ;;  %959 = vrot.lane.b32.xlu0 %v2719_v41, %s2457_s14 }
 0x10b   : > { %v2755_v53 = vadd.f32 %v2710_v35, %v612_v52  ;;  %2139 = vmatprep.mubr.f32.mxu1 %v2744_v49 }
 0x10c   : > { %v2250_v54 = vpack.c.bf16 %v2748_v51, %v2740_v47 }
 0x10d   : > { %2140 = vmatmul.mubr.f32.gmra.mrb[20].mxu1 %v2755_v53  ;;  %v2247_v55 = vpack.c.bf16 %v2755_v53, %v2744_v49 }
 0x10e   : > { %933 = vrot.lane.b32.xlu1 %v2740_v47, %s2458_s22  ;;  %923 = vrot.lane.b32.xlu0 %v2726_v43, %s2458_s22 }
 0x10f   : > { %2142 = vmatprep.mubr.f32.mxu1 %v2740_v47  ;;  %2245 = vmatpush3.bf16.xpose.msra.mxu0 %v2244_v44  ;;  %v2095_v56 = vpop.f32.mrb[8].mxu1 }
 0x110   : > { %v625_v57 = vpop.f32.mrb[9].mxu1  ;;  %2246 = vmatprep.subr.bf16.mxu0 %v2456_v34  ;;  %v2778_v60 = vadd.f32 %v2095_v56, %v2710_v35  ;;  %v1064_v56 = vmul.f32 %v1942_v33, %v2713_v37 }
 0x111   : > { %2143 = vmatmul.mubr.f32.gmra.mrb[22].mxu1 %v2748_v51  ;;  %v2771_v58 = vadd.f32 %v2710_v35, %v625_v57  ;;  %v2096_v59 = vpop.f32.mrb[10].mxu1 }
 0x112   : > { %929 = vrot.lane.b32.xlu1 %v2744_v49, %s2458_s22  ;;  %955 = vrot.lane.b32.xlu0 %v2726_v43, %s2457_s14  ;;  %v2781_v61 = vadd.f32 %v2096_v59, %v2710_v35  ;;  %v628_v62 = vpop.f32.mrb[11].mxu1 }
 0x113   : > { %v2784_v63 = vadd.f32 %v2710_v35, %v628_v62  ;;  %2145 = vmatprep.mubr.f32.mxu1 %v2771_v58  ;;  %v1939_v62 = vunpack.c.h.bf16 %v1937_v19 }
 0x114   : > { %v2256_v0 = vpack.c.bf16 %v2781_v61, %v2778_v60 }
 0x115   : > { %2146 = vmatmul.mubr.f32.gmra.mrb[24].mxu1 %v2784_v63  ;;  %v2253_v1 = vpack.c.bf16 %v2784_v63, %v2771_v58  ;;  %v1063_v37 = vmul.f32 %v1939_v62, %v2726_v43 }
 0x116   : > { %935 = vrot.lane.b32.xlu1 %v2748_v51, %s2458_s22  ;;  %965 = vrot.lane.b32.xlu0 %v2740_v47, %s2457_s14 }
 0x117   : > { %2248 = vmatpush3.bf16.xpose.msra.mxu0 %v2247_v55  ;;  %2148 = vmatprep.mubr.f32.mxu1 %v2778_v60  ;;  %v2099_v2 = vpop.f32.mrb[12].mxu1  ;;  %v1065_v55 = vmul.f32 %v1943_v42, %v2719_v41  ;;  %v2008_v41 = vld [vmem:[%s3210_s10 + $0x10] sm:$0xff]  }
 0x118   : > { %2249 = vmatprep.subr.bf16.mxu0 %v2456_v34  ;;  %v641_v3 = vpop.f32.mrb[13].mxu1  ;;  %v2807_v6 = vadd.f32 %v2099_v2, %v2710_v35  ;;  %v1979_v42 = vunpack.c.h.bf16 %v2008_v41 }
 0x119   : > { %2149 = vmatmul.mubr.f32.gmra.mrb[26].mxu1 %v2781_v61  ;;  %v2800_v4 = vadd.f32 %v2710_v35, %v641_v3  ;;  %v2100_v5 = vpop.f32.mrb[14].mxu1 }
 0x11a   : > { %931 = vrot.lane.b32.xlu1 %v2755_v53, %s2458_s22  ;;  %961 = vrot.lane.b32.xlu0 %v2744_v49, %s2457_s14  ;;  %v2810_v7 = vadd.f32 %v2100_v5, %v2710_v35  ;;  %v644_v8 = vpop.f32.mrb[15].mxu1 }
 0x11b   : > { %v2813_v9 = vadd.f32 %v2710_v35, %v644_v8  ;;  %2151 = vmatprep.mubr.f32.mxu1 %v2800_v4  ;;  %v1975_v35 = vunpack.c.h.bf16 %v2007_v22 }
 0x11c   : > { %v2262_v10 = vpack.c.bf16 %v2810_v7, %v2807_v6 }
 0x11d   : > { %2152 = vmatmul.mubr.f32.gmra.mrb[28].mxu1 %v2813_v9  ;;  %v2259_v11 = vpack.c.bf16 %v2813_v9, %v2800_v4 }
 0x11e   : > { %941 = vrot.lane.b32.xlu1 %v2778_v60, %s2458_s22  ;;  %967 = vrot.lane.b32.xlu0 %v2748_v51, %s2457_s14 }
 0x11f   : > { %2251 = vmatpush3.bf16.xpose.msra.mxu0 %v2250_v54  ;;  %2154 = vmatprep.mubr.f32.mxu1 %v2807_v6 }
 0x120   : > { %2252 = vmatprep.subr.bf16.mxu0 %v2456_v34 }
 0x121   : > { %2155 = vmatmul.mubr.f32.gmra.mrb[30].mxu1 %v2810_v7 }
 0x122   : > { %937 = vrot.lane.b32.xlu1 %v2771_v58, %s2458_s22  ;;  %963 = vrot.lane.b32.xlu0 %v2755_v53, %s2457_s14 }
 0x126   : > { %943 = vrot.lane.b32.xlu1 %v2781_v61, %s2458_s22  ;;  %973 = vrot.lane.b32.xlu0 %v2778_v60, %s2457_s14 }
 0x127   : > { %2254 = vmatpush3.bf16.xpose.msra.mxu0 %v2253_v1 }
 0x128   : > { %2255 = vmatprep.subr.bf16.mxu0 %v2456_v34 }
 0x12a   : > { %939 = vrot.lane.b32.xlu1 %v2784_v63, %s2458_s22  ;;  %969 = vrot.lane.b32.xlu0 %v2771_v58, %s2457_s14 }
 0x12e   : > { %949 = vrot.lane.b32.xlu1 %v2807_v6, %s2458_s22  ;;  %975 = vrot.lane.b32.xlu0 %v2781_v61, %s2457_s14 }
 0x12f   : > { %2257 = vmatpush3.bf16.xpose.msra.mxu0 %v2256_v0 }
 0x130   : > { %2258 = vmatprep.subr.bf16.mxu0 %v2456_v34 }
 0x132   : > { %945 = vrot.lane.b32.xlu1 %v2800_v4, %s2458_s22  ;;  %971 = vrot.lane.b32.xlu0 %v2784_v63, %s2457_s14 }
 0x136   : > { %951 = vrot.lane.b32.xlu1 %v2810_v7, %s2458_s22  ;;  %977 = vrot.lane.b32.xlu0 %v2800_v4, %s2457_s14 }
 0x137   : > { %2260 = vmatpush3.bf16.xpose.msra.mxu0 %v2259_v11 }
 0x138   : > { %2261 = vmatprep.subr.bf16.mxu0 %v2456_v34 }
 0x13a   : > { %947 = vrot.lane.b32.xlu1 %v2813_v9, %s2458_s22  ;;  %979 = vrot.lane.b32.xlu0 %v2813_v9, %s2457_s14 }
 0x13e   : > { %983 = vrot.lane.b32.xlu1 %v2810_v7, %s2457_s14  ;;  %981 = vrot.lane.b32.xlu0 %v2807_v6, %s2457_s14 }
 0x13f   : > { %2263 = vmatpush3.bf16.xpose.msra.mxu0 %v2262_v10  ;;  %v2001_v10 = vld [vmem:[%s3209_s9 + $0x10] sm:$0xff]  }
 0x140   : > { %v1946_v43 = vunpack.c.l.bf16 %v2001_v10 }
 0x146   : > { %2190 = vmatmul.mubr.f32.vlgmr.msra.gmra.mrb[0].mxu0 %v841_v13 }
 0x174   : > { %v958_v16 = vpop.permute.xlu0 %957  ;;  %v926_v18 = vpop.permute.xlu1 %925 }
 0x175   : > { %v1000_v21 = vsub.f32 0.0, %v926_v18 }
 0x177   : > { %v1016_v31 = vsel %vm2875_vm2, %v1000_v21, %v958_v16  ;;  %v1978_v16 = vunpack.c.l.bf16 %v2008_v41 }
 0x178   : > { %v954_v24 = vpop.permute.xlu1 %953  ;;  %v922_v25 = vpop.permute.xlu0 %921  ;;  %v1112_v46 = vmul.f32 %v1974_v30, %v1016_v31  ;;  %v1950_v30 = vunpack.c.l.bf16 %v2002_v17 }
 0x179   : > { %v998_v29 = vsub.f32 0.0, %v922_v25 }
 0x17a   : > { %v1128_v59 = vadd.f32 %v1112_v46, %v1064_v56 }
 0x17b   : > { %v1014_v32 = vsel %vm2875_vm2, %v998_v29, %v954_v24  ;;  %v1066_v29 = vmul.f32 %v1946_v43, %v2744_v49 }
 0x17c   : > { %v928_v34 = vpop.permute.xlu1 %927  ;;  %v960_v36 = vpop.permute.xlu0 %959  ;;  %v1110_v40 = vmul.f32 %v1970_v27, %v1014_v32 }
 0x17d   : > { %v1001_v44 = vsub.f32 0.0, %v928_v34 }
 0x17e   : > { %v1126_v45 = vadd.f32 %v1110_v40, %v1062_v38  ;;  %v1947_v38 = vunpack.c.h.bf16 %v2001_v10 }
 0x17f   : > { %v1017_v48 = vsel %vm2875_vm2, %v1001_v44, %v960_v36  ;;  %v1069_v44 = vmul.f32 %v1951_v26, %v2748_v51 }
 0x180   : > { %v1113_v50 = vmul.f32 %v1975_v35, %v1017_v48  ;;  %v934_v52 = vpop.permute.xlu1 %933  ;;  %v924_v54 = vpop.permute.xlu0 %923  ;;  %1175 = vrot.lane.b32.xlu0 %v1126_v45, %s2461_s13  ;;  %v1067_v51 = vmul.f32 %v1947_v38, %v2755_v53 }
 0x181   : > { %v999_v0 = vsub.f32 0.0, %v924_v54  ;;  %v1004_v18 = vsub.f32 0.0, %v934_v52 }
 0x182   : > { %v1129_v57 = vadd.f32 %v1113_v50, %v1065_v55  ;;  %v2462_v55 = vmov 0  }
 0x183   : > { %2369 = vset.pattern.permute.xlu0 %v2462_v55  ;;  %v2006_v55 = vld [vmem:[%s3209_s9 + $0x38] sm:$0xff]  }
 0x184   : > { %v930_v1 = vpop.permute.xlu1 %929  ;;  %1181 = vrot.lane.b32.xlu1 %v1129_v57, %s2461_s13  ;;  %v956_v2 = vpop.permute.xlu0 %955  ;;  %v1143_v3 = vpack.c.bf16 %v1129_v57, %v1128_v59  ;;  %1179 = vrot.lane.b32.xlu0 %v1128_v59, %s2461_s13 }
 0x185   : > { %v1015_v5 = vsel %vm2875_vm2, %v999_v0, %v956_v2  ;;  %v1002_v19 = vsub.f32 0.0, %v930_v1  ;;  %v2011_v1 = vld [vmem:[%s3210_s10 + $0x28] sm:$0xff]  }
 0x186   : > { %v1111_v8 = vmul.f32 %v1971_v39, %v1015_v5  ;;  %1152 = vst.msk [vmem:[#allocation2 + $0x8] sm:$0xff] %vm1150_vm3, %v1143_v3  ;;  %v2003_v39 = vld [vmem:[%s3209_s9 + $0x20] sm:$0xff]   ;;  %v2004_v5 = vld [vmem:[%s3209_s9 + $0x28] sm:$0xff]   ;;  %v1990_v41 = vunpack.c.l.bf16 %v2011_v1 }
 0x187   : > { %v1954_v3 = vunpack.c.l.bf16 %v2003_v39  ;;  %v1959_v14 = vunpack.c.h.bf16 %v2004_v5  ;;  %v1958_v17 = vunpack.c.l.bf16 %v2004_v5 }
 0x188   : > { %v936_v11 = vpop.permute.xlu1 %935  ;;  %v966_v12 = vpop.permute.xlu0 %965  ;;  %v1127_v13 = vadd.f32 %v1111_v8, %v1063_v37 }
 0x189   : > { %v1020_v24 = vsel %vm2875_vm2, %v1004_v18, %v966_v12  ;;  %v1005_v31 = vsub.f32 0.0, %v936_v11  ;;  %v1070_v43 = vmul.f32 %v1954_v3, %v2771_v58  ;;  %v2005_v58 = vld [vmem:[%s3209_s9 + $0x30] sm:$0xff]  }
 0x18a   : > { %1177 = vrot.lane.b32.xlu1 %v1127_v13, %s2461_s13  ;;  %v1142_v15 = vpack.c.bf16 %v1127_v13, %v1126_v45  ;;  %v1116_v32 = vmul.f32 %v1982_v20, %v1020_v24  ;;  %v1068_v45 = vmul.f32 %v1950_v30, %v2740_v47  ;;  %v2010_v47 = vld [vmem:[%s3210_s10 + $0x20] sm:$0xff]   ;;  %v1962_v38 = vunpack.c.l.bf16 %v2005_v58 }
 0x18b   : > { %v1986_v2 = vunpack.c.l.bf16 %v2010_v47 }
 0x18c   : > { %1151 = vst.msk [vmem:[#allocation2] sm:$0xff] %vm1150_vm3, %v1142_v15  ;;  %v932_v21 = vpop.permute.xlu1 %931  ;;  %v962_v22 = vpop.permute.xlu0 %961  ;;  %v1132_v52 = vadd.f32 %v1116_v32, %v1068_v45 }
 0x18d   : > { %v1018_v25 = vsel %vm2875_vm2, %v1002_v19, %v962_v22  ;;  %v1003_v46 = vsub.f32 0.0, %v932_v21 }
 0x18e   : > { %v1114_v27 = vmul.f32 %v1978_v16, %v1018_v25  ;;  %v1991_v16 = vunpack.c.h.bf16 %v2011_v1  ;;  %v1955_v25 = vunpack.c.h.bf16 %v2003_v39  ;;  %v1963_v39 = vunpack.c.h.bf16 %v2005_v58 }
 0x18f   : > { %v1967_v1 = vunpack.c.h.bf16 %v2006_v55 }
 0x190   : > { %v942_v33 = vpop.permute.xlu1 %941  ;;  %v968_v34 = vpop.permute.xlu0 %967  ;;  %v1130_v35 = vadd.f32 %v1114_v27, %v1066_v29  ;;  %v1987_v27 = vunpack.c.h.bf16 %v2010_v47  ;;  %v1072_v29 = vmul.f32 %v1958_v17, %v2778_v60 }
 0x191   : > { %v1021_v36 = vsel %vm2875_vm2, %v1005_v31, %v968_v34  ;;  %v1008_v8 = vsub.f32 0.0, %v942_v33  ;;  %v2012_v31 = vld [vmem:[%s3210_s10 + $0x30] sm:$0xff]  }
 0x192   : > { %v1117_v40 = vmul.f32 %v1983_v28, %v1021_v36  ;;  %1183 = vrot.lane.b32.xlu0 %v1130_v35, %s2461_s13  ;;  %v1073_v28 = vmul.f32 %v1959_v14, %v2781_v61 }
 0x194   : > { %v938_v49 = vpop.permute.xlu1 %937  ;;  %v964_v48 = vpop.permute.xlu0 %963  ;;  %v1133_v50 = vadd.f32 %v1117_v40, %v1069_v44  ;;  %v1994_v40 = vunpack.c.l.bf16 %v2012_v31 }
 0x195   : > { %v1019_v54 = vsel %vm2875_vm2, %v1003_v46, %v964_v48  ;;  %v1006_v37 = vsub.f32 0.0, %v938_v49 }
 0x196   : > { %v1115_v56 = vmul.f32 %v1979_v42, %v1019_v54  ;;  %1189 = vrot.lane.b32.xlu1 %v1133_v50, %s2461_s13  ;;  %v1145_v57 = vpack.c.bf16 %v1133_v50, %v1132_v52  ;;  %1187 = vrot.lane.b32.xlu0 %v1132_v52, %s2461_s13  ;;  %v1071_v42 = vmul.f32 %v1955_v25, %v2784_v63  ;;  %v2013_v63 = vld [vmem:[%s3210_s10 + $0x38] sm:$0xff]  }
 0x197   : > { %v1074_v54 = vmul.f32 %v1962_v38, %v2800_v4  ;;  %v1999_v4 = vunpack.c.h.bf16 %v2013_v63 }
 0x198   : > { %1154 = vst.msk [vmem:[#allocation2 + $0x18] sm:$0xff] %vm1150_vm3, %v1145_v57  ;;  %v944_v59 = vpop.permute.xlu1 %943  ;;  %v974_v62 = vpop.permute.xlu0 %973  ;;  %v1131_v0 = vadd.f32 %v1115_v56, %v1067_v51  ;;  %v1995_v57 = vunpack.c.h.bf16 %v2012_v31 }
 0x199   : > { %v1024_v12 = vsel %vm2875_vm2, %v1008_v8, %v974_v62  ;;  %v1009_v18 = vsub.f32 0.0, %v944_v59  ;;  %v1966_v62 = vunpack.c.l.bf16 %v2006_v55 }
 0x19a   : > { %1185 = vrot.lane.b32.xlu1 %v1131_v0, %s2461_s13  ;;  %v1144_v53 = vpack.c.bf16 %v1131_v0, %v1130_v35  ;;  %v1120_v19 = vmul.f32 %v1990_v41, %v1024_v12  ;;  %v1998_v0 = vunpack.c.l.bf16 %v2013_v63  ;;  %v1075_v41 = vmul.f32 %v1963_v39, %v2813_v9  ;;  %v842_v9 = vld [vmem:[%s3206_s6] sm:$0x3f] }
 0x19b   : > { %v1076_v12 = vmul.f32 %v1966_v62, %v2807_v6  ;;  %v1904_v6 = vld [vmem:[%s3205_s5] ss:$0 sm:$0xff] }
 0x19c   : > { %1153 = vst.msk [vmem:[#allocation2 + $0x10] sm:$0xff] %vm1150_vm3, %v1144_v53  ;;  %v940_v10 = vpop.permute.xlu1 %939  ;;  %v970_v11 = vpop.permute.xlu0 %969  ;;  %v1136_v35 = vadd.f32 %v1120_v19, %v1072_v29 }
 0x19d   : > { %v1022_v13 = vsel %vm2875_vm2, %v1006_v37, %v970_v11  ;;  %v1007_v30 = vsub.f32 0.0, %v940_v10 }
 0x19e   : > { %v1118_v15 = vmul.f32 %v1986_v2, %v1022_v13 }
 0x1a0   : > { %v950_v20 = vpop.permute.xlu1 %949  ;;  %v976_v21 = vpop.permute.xlu0 %975  ;;  %v1134_v22 = vadd.f32 %v1118_v15, %v1070_v43  ;;  %v1077_v15 = vmul.f32 %v1967_v1, %v2810_v7 }
 0x1a1   : > { %v1025_v24 = vsel %vm2875_vm2, %v1009_v18, %v976_v21  ;;  %v1012_v53 = vsub.f32 0.0, %v950_v20 }
 0x1a2   : > { %v1121_v26 = vmul.f32 %v1991_v16, %v1025_v24  ;;  %1191 = vrot.lane.b32.xlu0 %v1134_v22, %s2461_s13 }
 0x1a4   : > { %v946_v32 = vpop.permute.xlu1 %945  ;;  %v972_v33 = vpop.permute.xlu0 %971  ;;  %v1137_v34 = vadd.f32 %v1121_v26, %v1073_v28 }
 0x1a5   : > { %v1023_v36 = vsel %vm2875_vm2, %v1007_v30, %v972_v33  ;;  %v1010_v44 = vsub.f32 0.0, %v946_v32 }
 0x1a6   : > { %v1119_v61 = vmul.f32 %v1987_v27, %v1023_v36  ;;  %1197 = vrot.lane.b32.xlu1 %v1137_v34, %s2461_s13  ;;  %v1147_v60 = vpack.c.bf16 %v1137_v34, %v1136_v35  ;;  %1195 = vrot.lane.b32.xlu0 %v1136_v35, %s2461_s13 }
 0x1a8   : > { %1156 = vst.msk [vmem:[#allocation2 + $0x28] sm:$0xff] %vm1150_vm3, %v1147_v60  ;;  %v952_v45 = vpop.permute.xlu1 %951  ;;  %v978_v46 = vpop.permute.xlu0 %977  ;;  %v1135_v49 = vadd.f32 %v1119_v61, %v1071_v42 }
 0x1a9   : > { %v1026_v48 = vsel %vm2875_vm2, %v1010_v44, %v978_v46  ;;  %v1013_v2 = vsub.f32 0.0, %v952_v45 }
 0x1aa   : > { %v1122_v50 = vmul.f32 %v1994_v40, %v1026_v48  ;;  %1193 = vrot.lane.b32.xlu1 %v1135_v49, %s2461_s13  ;;  %v1146_v52 = vpack.c.bf16 %v1135_v49, %v1134_v22 }
 0x1ac   : > { %1155 = vst.msk [vmem:[#allocation2 + $0x20] sm:$0xff] %vm1150_vm3, %v1146_v52  ;;  %v948_v56 = vpop.permute.xlu1 %947  ;;  %v980_v51 = vpop.permute.xlu0 %979  ;;  %v1138_v47 = vadd.f32 %v1122_v50, %v1074_v54 }
 0x1ad   : > { %v1011_v59 = vsub.f32 0.0, %v948_v56 }
 0x1ae   : > { %1199 = vrot.lane.b32.xlu0 %v1138_v47, %s2461_s13 }
 0x1af   : > { %v1027_v3 = vsel %vm2875_vm2, %v1011_v59, %v980_v51 }
 0x1b0   : > { %v1123_v5 = vmul.f32 %v1995_v57, %v1027_v3  ;;  %v984_v8 = vpop.permute.xlu1 %983  ;;  %v982_v37 = vpop.permute.xlu0 %981 }
 0x1b1   : > { %v1029_v10 = vsel %vm2875_vm2, %v1013_v2, %v984_v8  ;;  %v1028_v11 = vsel %vm2875_vm2, %v1012_v53, %v982_v37 }
 0x1b2   : > { %v1125_v13 = vmul.f32 %v1999_v4, %v1029_v10  ;;  %v1124_v14 = vmul.f32 %v1998_v0, %v1028_v11  ;;  %v1139_v16 = vadd.f32 %v1123_v5, %v1075_v41 }
 0x1b4   : > { %v1141_v43 = vadd.f32 %v1125_v13, %v1077_v15  ;;  %v1140_v17 = vadd.f32 %v1124_v14, %v1076_v12  ;;  %v1148_v18 = vpack.c.bf16 %v1139_v16, %v1138_v47 }
 0x1b6   : > { %1205 = vrot.lane.b32.xlu1 %v1141_v43, %s2461_s13  ;;  %v1149_v19 = vpack.c.bf16 %v1141_v43, %v1140_v17  ;;  %1203 = vrot.lane.b32.xlu0 %v1140_v17, %s2461_s13  ;;  %1157 = vst.msk [vmem:[#allocation2 + $0x30] sm:$0xff] %vm1150_vm3, %v1148_v18 }
 0x1b8   : > { %1158 = vst.msk [vmem:[#allocation2 + $0x38] sm:$0xff] %vm1150_vm3, %v1149_v19 }
 0x1ba   : > { %1201 = vrot.lane.b32.xlu1 %v1139_v16, %s2461_s13  ;;  %845 = vperm.xlu0 %2369, %v842_v9  }
 0x1d8   : > { %v2135_v7 = vpop.f32.mrb[16].mxu1 }
 0x1d9   : > { %v751_v23 = vadd.f32 %v2135_v7, %v1904_v6  ;;  %v745_v20 = vpop.f32.mrb[17].mxu1 }
 0x1da   : > { %v746_v21 = vadd.f32 %v1904_v6, %v745_v20 }
 0x1db   : > { %826 = vst.msk [vmem:[#allocation4 + $0x8] sm:$0xff] %vm824_vm4, %v751_v23 }
 0x1dc   : > { %825 = vst.msk [vmem:[#allocation4] sm:$0xff] %vm824_vm4, %v746_v21  ;;  %v2138_v22 = vpop.f32.mrb[18].mxu1 }
 0x1dd   : > { %v761_v24 = vadd.f32 %v2138_v22, %v1904_v6  ;;  %v755_v25 = vpop.f32.mrb[19].mxu1 }
 0x1de   : > { %v756_v26 = vadd.f32 %v1904_v6, %v755_v25 }
 0x1df   : > { %828 = vst.msk [vmem:[#allocation4 + $0x18] sm:$0xff] %vm824_vm4, %v761_v24 }
 0x1e0   : > { %827 = vst.msk [vmem:[#allocation4 + $0x10] sm:$0xff] %vm824_vm4, %v756_v26  ;;  %v2141_v27 = vpop.f32.mrb[20].mxu1 }
 0x1e1   : > { %v771_v28 = vadd.f32 %v2141_v27, %v1904_v6  ;;  %v765_v29 = vpop.f32.mrb[21].mxu1 }
 0x1e2   : > { %v766_v58 = vadd.f32 %v1904_v6, %v765_v29 }
 0x1e3   : > { %830 = vst.msk [vmem:[#allocation4 + $0x28] sm:$0xff] %vm824_vm4, %v771_v28 }
 0x1e4   : > { %829 = vst.msk [vmem:[#allocation4 + $0x20] sm:$0xff] %vm824_vm4, %v766_v58  ;;  %v2144_v30 = vpop.f32.mrb[22].mxu1 }
 0x1e5   : > { %v781_v31 = vadd.f32 %v2144_v30, %v1904_v6  ;;  %v775_v32 = vpop.f32.mrb[23].mxu1 }
 0x1e6   : > { %v776_v33 = vadd.f32 %v1904_v6, %v775_v32 }
 0x1e7   : > { %832 = vst.msk [vmem:[#allocation4 + $0x38] sm:$0xff] %vm824_vm4, %v781_v31 }
 0x1e8   : > { %831 = vst.msk [vmem:[#allocation4 + $0x30] sm:$0xff] %vm824_vm4, %v776_v33  ;;  %v2147_v34 = vpop.f32.mrb[24].mxu1 }
 0x1e9   : > { %v791_v35 = vadd.f32 %v2147_v34, %v1904_v6  ;;  %v785_v36 = vpop.f32.mrb[25].mxu1 }
 0x1ea   : > { %v786_v38 = vadd.f32 %v1904_v6, %v785_v36 }
 0x1eb   : > { %834 = vst.msk [vmem:[#allocation4 + $0x48] sm:$0xff] %vm824_vm4, %v791_v35 }
 0x1ec   : > { %833 = vst.msk [vmem:[#allocation4 + $0x40] sm:$0xff] %vm824_vm4, %v786_v38  ;;  %v2150_v61 = vpop.f32.mrb[26].mxu1 }
 0x1ed   : > { %v801_v60 = vadd.f32 %v2150_v61, %v1904_v6  ;;  %v795_v40 = vpop.f32.mrb[27].mxu1 }
 0x1ee   : > { %v796_v42 = vadd.f32 %v1904_v6, %v795_v40 }
 0x1ef   : > { %836 = vst.msk [vmem:[#allocation4 + $0x58] sm:$0xff] %vm824_vm4, %v801_v60 }
 0x1f0   : > { %835 = vst.msk [vmem:[#allocation4 + $0x50] sm:$0xff] %vm824_vm4, %v796_v42  ;;  %v2153_v44 = vpop.f32.mrb[28].mxu1 }
 0x1f1   : > { %v811_v45 = vadd.f32 %v2153_v44, %v1904_v6  ;;  %v805_v46 = vpop.f32.mrb[29].mxu1 }
 0x1f2   : > { %v1176_v49 = vpop.permute.xlu0 %1175  ;;  %v806_v48 = vadd.f32 %v1904_v6, %v805_v46 }
 0x1f3   : > { %1223 = vxpose.xlu1.b32.start [1/16] (narrow) %v1176_v49, 64  ;;  %838 = vst.msk [vmem:[#allocation4 + $0x68] sm:$0xff] %vm824_vm4, %v811_v45 }
 0x1f4   : > { %837 = vst.msk [vmem:[#allocation4 + $0x60] sm:$0xff] %vm824_vm4, %v806_v48  ;;  %v2156_v50 = vpop.f32.mrb[30].mxu1 }
 0x1f5   : > { %v821_v52 = vadd.f32 %v2156_v50, %v1904_v6  ;;  %v815_v54 = vpop.f32.mrb[31].mxu1 }
 0x1f6   : > { %v816_v55 = vadd.f32 %v1904_v6, %v815_v54  ;;  %v1182_v63 = vpop.permute.xlu1 %1181  ;;  %v1180_v57 = vpop.permute.xlu0 %1179 }
 0x1f7   : > { %840 = vst.msk [vmem:[#allocation4 + $0x78] sm:$0xff] %vm824_vm4, %v821_v52 }
 0x1f8   : > { %839 = vst.msk [vmem:[#allocation4 + $0x70] sm:$0xff] %vm824_vm4, %v816_v55 }
 0x1fc   : > { %v1178_v56 = vpop.permute.xlu1 %1177 }
 0x1fd   : > { %1224 = vxpose.xlu1.b32.cont [2/16] (narrow) %v1178_v56, 64 }
 0x201   : > { %1225 = vxpose.xlu1.b32.cont [3/16] (narrow) %v1180_v57, 64 }
 0x204   : > { %v1184_v51 = vpop.permute.xlu0 %1183 }
 0x205   : > { %1226 = vxpose.xlu1.b32.cont [4/16] (narrow) %v1182_v63, 64 }
 0x208   : > { %v1190_v47 = vpop.permute.xlu1 %1189  ;;  %v1188_v59 = vpop.permute.xlu0 %1187 }
 0x209   : > { %1227 = vxpose.xlu1.b32.cont [5/16] (narrow) %v1184_v51, 64 }
 0x20c   : > { %v1186_v39 = vpop.permute.xlu1 %1185 }
 0x20d   : > { %1228 = vxpose.xlu1.b32.cont [6/16] (narrow) %v1186_v39, 64 }
 0x211   : > { %1229 = vxpose.xlu1.b32.cont [7/16] (narrow) %v1188_v59, 64 }
 0x214   : > { %v1192_v62 = vpop.permute.xlu0 %1191 }
 0x215   : > { %1230 = vxpose.xlu1.b32.cont [8/16] (narrow) %v1190_v47, 64 }
 0x218   : > { %v1198_v4 = vpop.permute.xlu1 %1197  ;;  %v1196_v2 = vpop.permute.xlu0 %1195 }
 0x219   : > { %1231 = vxpose.xlu1.b32.cont [9/16] (narrow) %v1192_v62, 64  ;;  %v914_v0 = vpop.f32.mrb[0].mxu0 }
 0x21a   : > { %v2191_v1 = vpop.f32.mrb[1].mxu0 }
 0x21c   : > { %v1194_v53 = vpop.permute.xlu1 %1193 }
 0x21d   : > { %1232 = vxpose.xlu1.b32.cont [10/16] (narrow) %v1194_v53, 64 }
 0x220   : > { %v1200_v3 = vpop.permute.xlu0 %1199 }
 0x221   : > { %1233 = vxpose.xlu1.b32.cont [11/16] (narrow) %v1196_v2, 64 }
 0x225   : > { %1234 = vxpose.xlu1.b32.cont [12/16] (narrow) %v1198_v4, 64 }
 0x228   : > { %v1206_v5 = vpop.permute.xlu1 %1205  ;;  %v1204_v37 = vpop.permute.xlu0 %1203 }
 0x229   : > { %1235 = vxpose.xlu1.b32.cont [13/16] (narrow) %v1200_v3, 64 }
 0x22c   : > { %v1202_v8 = vpop.permute.xlu1 %1201 }
 0x22d   : > { %1236 = vxpose.xlu1.b32.cont [14/16] (narrow) %v1202_v8, 64 }
 0x231   : > { %1237 = vxpose.xlu1.b32.cont [15/16] (narrow) %v1204_v37, 64 }
 0x235   : > { %1238 = vxpose.xlu1.b32.end [16/16] (narrow) %v1206_v5, 64 }
 0x239   : > { %v846_v41 = vpop.permute.xlu0 %845 }
 0x23a   : > { %v915_v10 = vadd.f32 %v914_v0, %v846_v41 }
 0x23c   : > { %918 = vst [vmem:[#allocation5] sm:$0x3f] %v915_v10 }
 0x279   : > { %v1239_v11 = vpop.trf.xlu1 }
 0x27d   : > { %v1240_v12 = vpop.trf.xlu1 }
 0x27e   : > { %v1255_v13 = vpack.c.bf16 %v1240_v12, %v1239_v11 }
 0x280   : > { %1259 = vst [vmem:[#allocation3] sm:$0xff] %v1255_v13 }
 0x281   : > { %v1241_v14 = vpop.trf.xlu1 }
 0x285   : > { %v1242_v15 = vpop.trf.xlu1 }
 0x286   : > { %v1256_v16 = vpack.c.bf16 %v1242_v15, %v1241_v14 }
 0x288   : > { %1260 = vst [vmem:[#allocation3 + $0x8] sm:$0xff] %v1256_v16 }
 0x289   : > { %v1243_v43 = vpop.trf.xlu1 }
 0x28d   : > { %v1244_v17 = vpop.trf.xlu1 }
 0x28e   : > { %v1257_v18 = vpack.c.bf16 %v1244_v17, %v1243_v43 }
 0x290   : > { %1261 = vst [vmem:[#allocation3 + $0x10] sm:$0xff] %v1257_v18 }
 0x291   : > { %v1245_v19 = vpop.trf.xlu1 }
 0x295   : > { %v1246_v9 = vpop.trf.xlu1 }
 0x296   : > { %v1258_v6 = vpack.c.bf16 %v1246_v9, %v1245_v19 }
 0x298   : > { %1262 = vst [vmem:[#allocation3 + $0x18] sm:$0xff] %v1258_v6 }
 0x299 PF: > { %v1272_v7 = vld [vmem:[#allocation3] sm:$0xff]  ;;  %v1273_v23 = vld [vmem:[#allocation3 + $0x8] sm:$0xff]  ;;  %s3013_s13 = sshll.u32 %s2438_s20, 6  ;;  %vm1276_vm5 = vcmask 523264   ;;  %v1274_v20 = vld [vmem:[#allocation3 + $0x10] sm:$0xff]  ;;  %v2463_v24 = vmov 0   ;;  %v1417_v2 = vlaneseq }
 0x29a   : > { %2192 = vmatprep.subr.bf16.mxu0 %v1272_v7  ;;  %2264 = vmatprep.subr.bf16.mxu1 %v1272_v7  ;;  %s1264_s17 = sshra.s32 %s3013_s13, 4  ;;  %v1356_v25 = vld [vmem:[%s2631_s30 + $0x10] sm:$0xff]  ;;  %v1354_v26 = vld [vmem:[%s2631_s30] sm:$0xff]  ;;  %v1357_v28 = vld [vmem:[%s2631_s30 + $0x18] sm:$0xff]  ;;  %s1486_s20 = scalar_lea.vmem [#allocation4], %s3013_s13  ;;  %v2464_v38 = vmov 1   ;;  %v1426_v11 = vstv %s3013_s13 }
 0x29b   : > { %2193 = vmatpush3.bf16.msra.mxu0 %v1272_v7  ;;  %2268 = vmatpush3.bf16.msra.mxu1 %v1272_v7  ;;  %s1906_s23 = sshll.u32 %s1264_s17, 3  ;;  %v1355_v29 = vld [vmem:[%s2631_s30 + $0x8] sm:$0xff]  ;;  %v1358_v30 = vld [vmem:[%s2631_s30 + $0x20] sm:$0xff]  ;;  %v1361_v33 = vld [vmem:[%s2631_s30 + $0x38] sm:$0xff]  ;;  %v2465_v46 = vmov 3   ;;  %v2466_v49 = vmov 5  }
 0x29c   : > { %2194 = vmatprep.subr.bf16.mxu0 %v1273_v23  ;;  %2265 = vmatprep.subr.bf16.mxu1 %v1273_v23  ;;  %s1267_s24 = scalar_lea.vmem [#allocation2], %s1906_s23  ;;  %v1359_v58 = vld [vmem:[%s2631_s30 + $0x28] sm:$0xff]  ;;  %v1360_v34 = vld [vmem:[%s2631_s30 + $0x30] sm:$0xff]  ;;  %v1487_v36 = vld [vmem:[%s1486_s20] sm:$0xff]  ;;  %v1418_v8 = vshrl.u32 %v1417_v2, 7  ;;  %v1436_v16 = vand.u32 127, %v1417_v2 }
 0x29d   : > { %v1268_v21 = vld [vmem:[%s1267_s24] sm:$0xff]  ;;  %v1270_v22 = vld [vmem:[%s1267_s24 + $0x10] sm:$0xff]  ;;  %2381 = vset.pattern.permute.xlu1 %v2463_v24  ;;  %2380 = vset.pattern.permute.xlu0 %v2463_v24  ;;  %v1269_v31 = vld [vmem:[%s1267_s24 + $0x8] sm:$0xff]  ;;  %s3241_s28 = sand.u32 1, %s2430_s18  }
 0x29e   : > { %2200 = vmatprep.mubr.msk.bf16.mxu0 %vm1276_vm5, %v1268_v21  ;;  %2204 = vmatprep.mubr.msk.bf16.mxu1 %vm1276_vm5, %v1270_v22  ;;  %v1271_v32 = vld [vmem:[%s1267_s24 + $0x18] sm:$0xff]  ;;  %v1488_v35 = vld [vmem:[%s1486_s20 + $0x8] sm:$0xff]  ;;  %v1489_v61 = vld [vmem:[%s1486_s20 + $0x10] sm:$0xff]  ;;  %v1420_v10 = vadd.s32 16, %v1418_v8  ;;  %v1421_v13 = vadd.s32 24, %v1418_v8  ;;  %v1423_v14 = vadd.s32 40, %v1418_v8  ;;  %v1427_v19 = vadd.s32 %v1426_v11, %v1418_v8 }
 0x29f   : > { %2195 = vmatpush3.bf16.msra.mxu0 %v1273_v23  ;;  %2269 = vmatpush3.bf16.msra.mxu1 %v1273_v23  ;;  %v1275_v27 = vld [vmem:[#allocation3 + $0x18] sm:$0xff]  ;;  %v1491_v40 = vld [vmem:[%s1486_s20 + $0x20] sm:$0xff]  ;;  %v1492_v42 = vld [vmem:[%s1486_s20 + $0x28] sm:$0xff]  ;;  %v1419_v15 = vadd.s32 8, %v1418_v8  ;;  %v1424_v17 = vadd.s32 48, %v1418_v8  ;;  %v1425_v9 = vadd.s32 56, %v1418_v8 }
 0x2a0   : > { %2196 = vmatprep.subr.bf16.mxu0 %v1274_v20  ;;  %2266 = vmatprep.subr.bf16.mxu1 %v1274_v20  ;;  %v1490_v60 = vld [vmem:[%s1486_s20 + $0x18] sm:$0xff]  ;;  %v1493_v44 = vld [vmem:[%s1486_s20 + $0x30] sm:$0xff]  ;;  %v1429_v43 = vadd.s32 %v1426_v11, %v1420_v10  ;;  %v1422_v6 = vadd.s32 32, %v1418_v8  ;;  %v1430_v7 = vadd.s32 %v1426_v11, %v1421_v13  ;;  %v1432_v23 = vadd.s32 %v1426_v11, %v1423_v14 }
 0x2a1   : > { %1375 = vperm.xlu1 %2381, %v1356_v25   ;;  %1365 = vperm.xlu0 %2380, %v1354_v26   ;;  %v1494_v45 = vld [vmem:[%s1486_s20 + $0x38] sm:$0xff]  ;;  %v1433_v21 = vadd.s32 %v1426_v11, %v1424_v17  ;;  %v1911_v25 = vld [vmem:[%s438_s15] ss:$0 sm:$0xff]  ;;  %vm1437_vm7 = vcmp.gt.s32.totalorder %v1427_v19, %v1436_v16  ;;  %v1434_v26 = vadd.s32 %v1426_v11, %v1425_v9  ;;  %s1720_s15 = scalar_lea.sflag [#allocation7], %s3241_s28 }
 0x2a2   : > { %vm1439_vm6 = vcmp.gt.s32.totalorder %v1429_v43, %v1436_v16  ;;  %vm1440_vm8 = vcmp.gt.s32.totalorder %v1430_v7, %v1436_v16  ;;  %vm1442_vm9 = vcmp.gt.s32.totalorder %v1432_v23, %v1436_v16 }
 0x2a3   : > { %2197 = vmatpush3.bf16.msra.mxu0 %v1274_v20  ;;  %2270 = vmatpush3.bf16.msra.mxu1 %v1274_v20  ;;  %v1428_v20 = vadd.s32 %v1426_v11, %v1419_v15  ;;  %vm1443_vm11 = vcmp.gt.s32.totalorder %v1433_v21, %v1436_v16  ;;  %vm1444_vm12 = vcmp.gt.s32.totalorder %v1434_v26, %v1436_v16 }
 0x2a4   : > { %2198 = vmatprep.subr.bf16.mxu0 %v1275_v27  ;;  %2267 = vmatprep.subr.bf16.mxu1 %v1275_v27 }
 0x2a5   : > { %1380 = vperm.xlu1 %2381, %v1357_v28   ;;  %1370 = vperm.xlu0 %2380, %v1355_v29   ;;  %v2467_v28 = vmov 1.0   ;;  %vm1438_vm10 = vcmp.gt.s32.totalorder %v1428_v20, %v1436_v16 }
 0x2a6   : > { %v1447_v29 = vsel %vm1439_vm6, 2.0, %v2467_v28 }
 0x2a7   : > { %2199 = vmatpush3.bf16.msra.mxu0 %v1275_v27  ;;  %2271 = vmatpush3.bf16.msra.mxu1 %v1275_v27  ;;  %v1431_v27 = vadd.s32 %v1426_v11, %v1422_v6 }
 0x2a9   : > { %1390 = vperm.xlu1 %2381, %v1359_v58   ;;  %1385 = vperm.xlu0 %2380, %v1358_v30   ;;  %vm1441_vm13 = vcmp.gt.s32.totalorder %v1431_v27, %v1436_v16 }
 0x2aa   : > { %2201 = vmatmul.mubr.msk.bf16.vlgmr.msra.gmra.mrb[0].mxu0 %vm1276_vm5, %v1269_v31  ;;  %2205 = vmatmul.mubr.msk.bf16.vlgmr.msra.gmra.mrb[0].mxu1 %vm1276_vm5, %v1271_v32  ;;  %v1445_v31 = vsel %vm1437_vm7, 2.0, %v2467_v28 }
 0x2ad   : > { %1400 = vperm.xlu1 %2381, %v1361_v33   ;;  %1395 = vperm.xlu0 %2380, %v1360_v34   ;;  %v1448_v34 = vsel %vm1440_vm8, 2.0, %v2467_v28 }
 0x2b1   : > { %2383 = vset.pattern.permute.xlu1 %v2464_v38  ;;  %2382 = vset.pattern.permute.xlu0 %v2464_v38 }
 0x2b2   : > { %1502 = vperm.xlu1 %2383, %v1488_v35   ;;  %1497 = vperm.xlu0 %2382, %v1487_v36  }
 0x2b6   : > { %1507 = vperm.xlu1 %2383, %v1489_v61   ;;  %1512 = vperm.xlu0 %2382, %v1490_v60  }
 0x2ba   : > { %1517 = vperm.xlu1 %2383, %v1491_v40   ;;  %1522 = vperm.xlu0 %2382, %v1492_v42  }
 0x2be   : > { %1527 = vperm.xlu1 %2383, %v1493_v44   ;;  %1532 = vperm.xlu0 %2382, %v1494_v45  }
 0x2c2   : > { %2384 = vset.pattern.permute.xlu1 %v2465_v46  ;;  %2385 = vset.pattern.permute.xlu0 %v2465_v46 }
 0x2c3   : > { %1574 = vperm.xlu1 %2384, %v1487_v36   ;;  %1579 = vperm.xlu0 %2385, %v1488_v35  }
 0x2c7   : > { %1584 = vperm.xlu1 %2384, %v1489_v61   ;;  %1594 = vperm.xlu0 %2385, %v1491_v40  }
 0x2cb   : > { %1589 = vperm.xlu1 %2384, %v1490_v60   ;;  %1604 = vperm.xlu0 %2385, %v1493_v44  }
 0x2cf   : > { %1599 = vperm.xlu1 %2384, %v1492_v42   ;;  %2386 = vset.pattern.permute.xlu0 %v2466_v49 }
 0x2d0   : > { %1652 = vperm.xlu0 %2386, %v1487_v36   ;;  %v1446_v36 = vsel %vm1438_vm10, 2.0, %v2467_v28 }
 0x2d3   : > { %1609 = vperm.xlu1 %2384, %v1494_v45  }
 0x2d4   : > { %1667 = vperm.xlu0 %2386, %v1490_v60  }
 0x2d7   : > { %2387 = vset.pattern.permute.xlu1 %v2466_v49 }
 0x2d8   : > { %1657 = vperm.xlu1 %2387, %v1488_v35   ;;  %1677 = vperm.xlu0 %2386, %v1492_v42  }
 0x2dc   : > { %1662 = vperm.xlu1 %2387, %v1489_v61   ;;  %1687 = vperm.xlu0 %2386, %v1494_v45   ;;  %v1451_v45 = vsel %vm1443_vm11, 2.0, %v2467_v28 }
 0x2e0   : > { %1672 = vperm.xlu1 %2387, %v1491_v40   ;;  %v1450_v40 = vsel %vm1442_vm9, 2.0, %v2467_v28 }
 0x2e4   : > { %1682 = vperm.xlu1 %2387, %v1493_v44  }
 0x320   : > { %v1376_v48 = vpop.permute.xlu1 %1375  ;;  %v1366_v54 = vpop.permute.xlu0 %1365 }
 0x321   : > { %v1411_v58 = vmul.f32 %v1911_v25, %v1376_v48  ;;  %v1409_v30 = vmul.f32 %v1911_v25, %v1366_v54  ;;  %v1452_v48 = vsel %vm1444_vm12, 2.0, %v2467_v28 }
 0x323   : > { %v1463_v46 = vsub.f32 %v1411_v58, %v1447_v29  ;;  %v1461_v49 = vsub.f32 %v1409_v30, %v1445_v31 }
 0x324   : > { %v1381_v50 = vpop.permute.xlu1 %1380  ;;  %v1371_v63 = vpop.permute.xlu0 %1370 }
 0x325   : > { %v1412_v32 = vmul.f32 %v1911_v25, %v1381_v50  ;;  %v1410_v33 = vmul.f32 %v1911_v25, %v1371_v63  ;;  %v1449_v50 = vsel %vm1441_vm13, 2.0, %v2467_v28  ;;  %v1469_v11 = vmul.f32 1e+12, %v1461_v49 }
 0x327   : > { %v1464_v54 = vsub.f32 %v1412_v32, %v1448_v34  ;;  %v1462_v63 = vsub.f32 %v1410_v33, %v1446_v36 }
 0x328   : > { %v1391_v52 = vpop.permute.xlu1 %1390  ;;  %v1386_v57 = vpop.permute.xlu0 %1385 }
 0x329   : > { %v1414_v35 = vmul.f32 %v1911_v25, %v1391_v52  ;;  %v1413_v44 = vmul.f32 %v1911_v25, %v1386_v57  ;;  %v1472_v15 = vmul.f32 1e+12, %v1464_v54  ;;  %v1470_v16 = vmul.f32 1e+12, %v1462_v63 }
 0x32b   : > { %v1466_v2 = vsub.f32 %v1414_v35, %v1450_v40  ;;  %v1465_v10 = vsub.f32 %v1413_v44, %v1449_v50 }
 0x32c   : > { %v3029_v55 = vpop.permute.xlu1 %1400  ;;  %v1396_v47 = vpop.permute.xlu0 %1395 }
 0x32d   : > { %v1415_v38 = vmul.f32 %v1911_v25, %v1396_v47  ;;  %v1416_v42 = vmul.f32 %v1911_v25, %v3029_v55  ;;  %v1471_v47 = vmul.f32 1e+12, %v1463_v46  ;;  %v1474_v43 = vmul.f32 1e+12, %v1466_v2  ;;  %v3079_v46 = vld [vmem:[#allocation5 + $0x2] ss:$0 sm:$0xff] }
 0x32e   : > { %v1473_v20 = vmul.f32 1e+12, %v1465_v10 }
 0x32f   : > { %v1467_v8 = vsub.f32 %v1415_v38, %v1451_v45  ;;  %v1468_v52 = vsub.f32 %v1416_v42, %v1452_v48  ;;  %v3077_v45 = vld [vmem:[#allocation5] ss:$0 sm:$0xff] }
 0x331   : > { %v3031_v56 = vpop.permute.xlu1 %1502  ;;  %v3037_v59 = vpop.permute.xlu0 %1497  ;;  %v1475_v17 = vmul.f32 1e+12, %v1467_v8  ;;  %v1476_v23 = vmul.f32 1e+12, %v1468_v52 }
 0x335   : > { %v3033_v51 = vpop.permute.xlu1 %1507  ;;  %v3041_v4 = vpop.permute.xlu0 %1512 }
 0x339   : > { %v3035_v39 = vpop.permute.xlu1 %1517  ;;  %v3045_v1 = vpop.permute.xlu0 %1522 }
 0x33d   : > { %v3039_v62 = vpop.permute.xlu1 %1527  ;;  %v3049_v3 = vpop.permute.xlu0 %1532 }
 0x342   : > { %v3043_v0 = vpop.permute.xlu1 %1574  ;;  %v3053_v37 = vpop.permute.xlu0 %1579 }
 0x346   : > { %v3047_v53 = vpop.permute.xlu1 %1584  ;;  %v3058_v12 = vpop.permute.xlu0 %1594 }
 0x34a   : > { %v3051_v5 = vpop.permute.xlu1 %1589  ;;  %v3062_v22 = vpop.permute.xlu0 %1604 }
 0x34e   : > { %v3055_v41 = vpop.permute.xlu1 %1599 }
 0x34f   : > { %v3071_v61 = vpop.permute.xlu0 %1652 }
 0x352   : > { %v3060_v18 = vpop.permute.xlu1 %1609 }
 0x353   : > { %v3075_v13 = vpop.permute.xlu0 %1667 }
 0x357   : > { %v3064_v24 = vpop.permute.xlu1 %1657  ;;  %v1678_v63 = vpop.permute.xlu0 %1677 }
 0x35b   : > { %v1663_v60 = vpop.permute.xlu1 %1662 }
 0x35f   : > { %v1673_v14 = vpop.permute.xlu1 %1672 }
 0x37d   : > { %v2202_v55 = vpop.f32.mrb[0].mxu0  ;;  %v2206_v57 = vpop.f32.mrb[0].mxu1 }
 0x37e   : > { %v1455_v19 = vmul.f32 %v2202_v55, %v1411_v58  ;;  %v1459_v9 = vmul.f32 %v2206_v57, %v1415_v38  ;;  %v1323_v6 = vpop.f32.mrb[1].mxu0  ;;  %v1339_v7 = vpop.f32.mrb[1].mxu1  ;;  %v3081_v58 = vld [vmem:[#allocation5 + $0x4] ss:$0 sm:$0xff] }
 0x37f   : > { %v1453_v21 = vmul.f32 %v1409_v30, %v1323_v6  ;;  %v1457_v25 = vmul.f32 %v1413_v44, %v1339_v7  ;;  %v2203_v26 = vpop.f32.mrb[2].mxu0  ;;  %v2207_v27 = vpop.f32.mrb[2].mxu1 }
 0x380   : > { %v1479_v28 = vadd.f32 %v1471_v47, %v1455_v19  ;;  %v1483_v29 = vadd.f32 %v1475_v17, %v1459_v9  ;;  %v1456_v31 = vmul.f32 %v2203_v26, %v1412_v32  ;;  %v1460_v34 = vmul.f32 %v2207_v27, %v1416_v42  ;;  %v1326_v36 = vpop.f32.mrb[3].mxu0  ;;  %v1342_v40 = vpop.f32.mrb[3].mxu1 }
 0x381   : > { %v1477_v38 = vadd.f32 %v1469_v11, %v1453_v21  ;;  %v1481_v49 = vadd.f32 %v1473_v20, %v1457_v25  ;;  %v1454_v48 = vmul.f32 %v1410_v33, %v1326_v36  ;;  %v1458_v50 = vmul.f32 %v1414_v35, %v1342_v40  ;;  %v1683_v30 = vpop.permute.xlu1 %1682 }
 0x382   : > { %v1537_v44 = vadd.f32 %v3033_v51, %v1479_v28  ;;  %v1614_v54 = vadd.f32 %v3047_v53, %v1479_v28  ;;  %v1692_v32 = vadd.f32 %v1663_v60, %v1479_v28  ;;  %v1541_v42 = vadd.f32 %v3039_v62, %v1483_v29 }
 0x383   : > { %v1618_v2 = vadd.f32 %v3062_v22, %v1483_v29  ;;  %v1696_v8 = vadd.f32 %v1683_v30, %v1483_v29  ;;  %v1535_v52 = vadd.f32 %v3037_v59, %v1477_v38  ;;  %v1612_v33 = vadd.f32 %v3043_v0, %v1477_v38 }
 0x384   : > { %v1549_v35 = vadd.f32 %v3077_v45, %v1537_v44  ;;  %v1626_v51 = vadd.f32 %v3079_v46, %v1614_v54  ;;  %v1704_v53 = vadd.f32 %v3081_v58, %v1692_v32  ;;  %v1553_v62 = vadd.f32 %v3077_v45, %v1541_v42 }
 0x385   : > { %v1630_v60 = vadd.f32 %v3079_v46, %v1618_v2  ;;  %v1708_v22 = vadd.f32 %v3081_v58, %v1696_v8  ;;  %v1547_v59 = vadd.f32 %v3077_v45, %v1535_v52  ;;  %v1624_v0 = vadd.f32 %v3079_v46, %v1612_v33 }
 0x386   : > { %1557 = vst [vmem:[%s2633_s21 + $0x10] sm:$0xff] %v1549_v35  ;;  %1916 = vst [vmem:[%s2633_s21 + $0x50] sm:$0xff] %v1626_v51  ;;  %v1690_v10 = vadd.f32 %v3071_v61, %v1477_v38  ;;  %v1539_v47 = vadd.f32 %v3035_v39, %v1481_v49  ;;  %v1616_v11 = vadd.f32 %v3058_v12, %v1481_v49 }
 0x387   : > { %1925 = vst [vmem:[%s2633_s21 + $0x90] sm:$0xff] %v1704_v53  ;;  %1561 = vst [vmem:[%s2633_s21 + $0x30] sm:$0xff] %v1553_v62  ;;  %v1694_v55 = vadd.f32 %v1673_v14, %v1481_v49  ;;  %v1480_v57 = vadd.f32 %v1472_v15, %v1456_v31  ;;  %v1484_v17 = vadd.f32 %v1476_v23, %v1460_v34  ;;  %v1688_v14 = vpop.permute.xlu0 %1687 }
 0x388   : > { %1920 = vst [vmem:[%s2633_s21 + $0x70] sm:$0xff] %v1630_v60  ;;  %1929 = vst [vmem:[%s2633_s21 + $0xb0] sm:$0xff] %v1708_v22  ;;  %v1478_v19 = vadd.f32 %v1470_v16, %v1454_v48  ;;  %v1482_v9 = vadd.f32 %v1474_v43, %v1458_v50  ;;  %v1702_v6 = vadd.f32 %v3081_v58, %v1690_v10 }
 0x389   : > { %1555 = vst [vmem:[%s2633_s21] sm:$0xff] %v1547_v59  ;;  %1914 = vst [vmem:[%s2633_s21 + $0x40] sm:$0xff] %v1624_v0  ;;  %v1551_v61 = vadd.f32 %v3077_v45, %v1539_v47  ;;  %v1628_v39 = vadd.f32 %v3079_v46, %v1616_v11  ;;  %v1706_v12 = vadd.f32 %v3081_v58, %v1694_v55 }
 0x38a   : > { %v1538_v7 = vadd.f32 %v3041_v4, %v1480_v57  ;;  %v1615_v20 = vadd.f32 %v3051_v5, %v1480_v57  ;;  %v1693_v21 = vadd.f32 %v3075_v13, %v1480_v57  ;;  %v1542_v15 = vadd.f32 %v3049_v3, %v1484_v17  ;;  %1923 = vst [vmem:[%s2633_s21 + $0x80] sm:$0xff] %v1702_v6 }
 0x38b   : > { %1559 = vst [vmem:[%s2633_s21 + $0x20] sm:$0xff] %v1551_v61  ;;  %1918 = vst [vmem:[%s2633_s21 + $0x60] sm:$0xff] %v1628_v39  ;;  %v1619_v16 = vadd.f32 %v3060_v18, %v1484_v17  ;;  %v1697_v43 = vadd.f32 %v1688_v14, %v1484_v17  ;;  %v1536_v23 = vadd.f32 %v3031_v56, %v1478_v19 }
 0x38c   : > { %1927 = vst [vmem:[%s2633_s21 + $0xa0] sm:$0xff] %v1706_v12  ;;  %v1613_v4 = vadd.f32 %v3053_v37, %v1478_v19  ;;  %v1550_v5 = vadd.f32 %v3077_v45, %v1538_v7  ;;  %v1627_v3 = vadd.f32 %v3079_v46, %v1615_v20  ;;  %v1705_v13 = vadd.f32 %v3081_v58, %v1693_v21 }
 0x38d   : > { %v1554_v25 = vadd.f32 %v3077_v45, %v1542_v15  ;;  %v1631_v26 = vadd.f32 %v3079_v46, %v1619_v16  ;;  %v1709_v18 = vadd.f32 %v3081_v58, %v1697_v43  ;;  %v1548_v56 = vadd.f32 %v3077_v45, %v1536_v23 }
 0x38e   : > { %v1625_v37 = vadd.f32 %v3079_v46, %v1613_v4  ;;  %1558 = vst [vmem:[%s2633_s21 + $0x18] sm:$0xff] %v1550_v5  ;;  %1917 = vst [vmem:[%s2633_s21 + $0x58] sm:$0xff] %v1627_v3  ;;  %v1691_v27 = vadd.f32 %v3064_v24, %v1478_v19  ;;  %v1540_v28 = vadd.f32 %v3045_v1, %v1482_v9 }
 0x38f   : > { %1926 = vst [vmem:[%s2633_s21 + $0x98] sm:$0xff] %v1705_v13  ;;  %1562 = vst [vmem:[%s2633_s21 + $0x38] sm:$0xff] %v1554_v25  ;;  %v1617_v29 = vadd.f32 %v3055_v41, %v1482_v9  ;;  %v1695_v31 = vadd.f32 %v1678_v63, %v1482_v9 }
 0x390   : > { %1921 = vst [vmem:[%s2633_s21 + $0x78] sm:$0xff] %v1631_v26  ;;  %1930 = vst [vmem:[%s2633_s21 + $0xb8] sm:$0xff] %v1709_v18  ;;  %v1703_v34 = vadd.f32 %v3081_v58, %v1691_v27  ;;  %v1552_v36 = vadd.f32 %v3077_v45, %v1540_v28 }
 0x391   : > { %1556 = vst [vmem:[%s2633_s21 + $0x8] sm:$0xff] %v1548_v56  ;;  %1915 = vst [vmem:[%s2633_s21 + $0x48] sm:$0xff] %v1625_v37  ;;  %v1629_v40 = vadd.f32 %v3079_v46, %v1617_v29  ;;  %v1707_v38 = vadd.f32 %v3081_v58, %v1695_v31 }
 0x392   : > { %1924 = vst [vmem:[%s2633_s21 + $0x88] sm:$0xff] %v1703_v34  ;;  %1560 = vst [vmem:[%s2633_s21 + $0x28] sm:$0xff] %v1552_v36 }
 0x393   : > { %1919 = vst [vmem:[%s2633_s21 + $0x68] sm:$0xff] %v1629_v40  ;;  %1928 = vst [vmem:[%s2633_s21 + $0xa8] sm:$0xff] %v1707_v38 }
 0x394   : > { %s3242_s25 = sld [smem:[#allocation13_spill]]  ;;  %s1751_s16 = sshll.u32 %s2633_s21, 4  ;;  %s1752_s16 = int_to_ptr.vmem [resolvable:$true] %s1751_s16 }
 0x395   : > { %s2468_s22 = smov 1024   ;;  %s3244_s17 = sld [smem:[#allocation22_spill]] }
 0x396   : > { %2274 = sst [smem:[#allocation9]] (%p2585_p3), %s2468_s22  ;;  %s2469_s24 = smov 2048  }
 0x397   : > { %2275 = sst [smem:[#allocation9 + $0x1]] (%p2585_p3), %s2469_s24  ;;  %s2470_s20 = smov 8  }
 0x398   : > { %2276 = sst [smem:[#allocation9 + $0x2]] (%p2585_p3), %s2470_s20  ;;  %s2471_s30 = smov 128  }
 0x399   : > { %2277 = sst [smem:[#allocation9 + $0x3]] (%p2585_p3), %s2471_s30  ;;  %s2472_s21 = smov [#allocation8]  }
 0x39a   : > { %s2273_s29 = smul.u32 48, %s3242_s25  ;;  %2278 = sst [smem:[#allocation9 + $0x4]] (%p2585_p3), %s2471_s30 }
 0x39b   : > { %2279 = sst [smem:[#allocation9 + $0x5]] (%p2585_p3), %s2470_s20 }
 0x39c   : > { %s1732_s14 = sadd.s32 %s2273_s29, %s2610_s27  ;;  %s2473_s27 = smov 0  }
 0x39d   : > { %s1932_s19 = sshll.u32 %s1732_s14, 7 }
 0x39e   : > { %s1734_s23 = scalar_lea.hbm %s3244_s17, %s1932_s19 }
 0x39f   : > { %2280 = dma.general (%p2585_p3), %s1752_s16, 3072, %s1734_s23, %s1720_s15, %s2472_s21, [#allocation9], %s2473_s27, 0  }
 0x3a0 PF: > { %s3245_s12 = sld [smem:[#allocation16_spill]]  ;;  %s3246_s28 = sld [smem:[#allocation11_spill]] }
 0x3a6   : > { %p2286_p1 = scmp.ge.s32.totalorder %s3245_s12, 2  ;;  %s1779_s29 = sand.u32 1, %s3246_s28  }
 0x3a7   : > { %s1780_s14 = scalar_lea.sflag [#allocation7], %s1779_s29 }
 0x3a8   : > { %p2283_p2 = pnand %p2286_p1, %p2594_p8 }
 0x3aa   : > { %2421 = dma.done.wait (!%p2283_p2), %s1780_s14, 3072  }
 0x3ab   : > { %2423 = vsyncadd (!%p2283_p2), %s1780_s14, 4294964224  ;;  %s24_s24 = sadd.s32 1, %s3245_s12   ;;  %s3248_s22 = sld [smem:[#allocation12_spill]] }
 0x3ac   : > { %p21_p4 = scmp.ge.s32.totalorder %s24_s24, 6   ;;  %s3249_s19 = sld [smem:[#allocation21_spill]] }
 0x3ad   : > { %s3250_s20 = sld [smem:[#allocation14_spill]]  ;;  %s3251_s21 = sld [smem:[#allocation15_spill]] }
 0x3ae   : > { %s3252_s15 = sld [smem:[#allocation17_spill]]  ;;  %s3253_s23 = sld [smem:[#allocation19_spill]] }
 0x3af   : > { %s3254_s17 = smov %s2430_s18  ;;  %23 = sbr.rel (!%p21_p4) target bundleno = 7 (0x7), region = 118 }
 0x3b1   : > { %s3255_s18 = smov %s3248_s22 }
 0x3b4   : > { %s3256_s22 = smov %s3252_s15 }
 0x3b6   :  { %1785 = vsyncpa [#allocation7], 1 }
 0x3b7   :  { %1787 = vsyncpa [#allocation7 + $0x1], 1 }

// kernel: tpu_custom_call.1
= control target key start
LH: loop header
LB: loop body
LE: loop exit
PB: predicated region body
PF: predicated region fallthrough
CT: control target
= control target key end

     0   :  { %s3197_s0 = inlined_call_operand.vmem [shape: bf16[2,128,32], index: 0, kind: input, shape index: {}]   ;;  %s3198_s1 = inlined_call_operand.vmem [shape: bf16[32,128], index: 1, kind: input, shape index: {}]   ;;  %s3199_s2 = inlined_call_operand.vmem [shape: f32[1,128], index: 2, kind: input, shape index: {}]   ;;  %s3200_s3 = inlined_call_operand.vmem [shape: f32[128,6], index: 3, kind: input, shape index: {}]   ;;  %s3201_s4 = inlined_call_operand.vmem [shape: f32[6,128], index: 4, kind: input, shape index: {}]   ;;  %s3202_s5 = inlined_call_operand.vmem [shape: f32[1,6], index: 5, kind: input, shape index: {}]   ;;  %s3203_s6 = inlined_call_operand.vmem [shape: f32[6,1], index: 6, kind: input, shape index: {}]   ;;  %s3204_s7 = inlined_call_operand.vmem [shape: f32[2,1,128], index: 7, kind: input, shape index: {}]   ;;  %s3205_s8 = inlined_call_operand.vmem [shape: f32[2,128,1], index: 8, kind: input, shape index: {}]   ;;  %s3206_s9 = inlined_call_operand.vmem [shape: bf16[128,128], index: 9, kind: input, shape index: {}]   ;;  %s3207_s10 = inlined_call_operand.vmem [shape: bf16[128,128], index: 10, kind: input, shape index: {}]   ;;  %s3208_s11 = inlined_call_operand.hbm [shape: f32[2,3,128,128], index: 11, kind: output, shape index: {}]  }
   0x1   :  { %3222 = sst [smem:[#allocation22_spill]] %s3208_s11 }
   0x2   :  { %16 = vsyncpa [#allocation7], 0 }
   0x3   :  { %18 = vsyncpa [#allocation7 + $0x1], 0  ;;  %s2531_s17 = smov 0   ;;  %s2533_s18 = smov 0  }
   0x4   :  { %s2535_s19 = smov 0   ;;  %s2537_s20 = smov 0  }
   0x5   :  { %s2539_s21 = smov 0   ;;  %s2541_s22 = smov 0  }
   0x6   :  { %s2543_s23 = smov 0   ;;  %s2545_s24 = smov 0  }
   0x7 LB: > { %3223 = sst [smem:[#allocation11_spill]] %s2423_s17  ;;  %s1871_s25 = sadd.s32 4294967295, %s2451_s24   ;;  %s2451_s24 = sphi %s2545_s24, %s24_s24   ;;  %s2447_s23 = sphi %s2543_s23, %s3250_s23   ;;  %s2443_s22 = sphi %s2541_s22, %s3253_s22   ;;  %s2439_s21 = sphi %s2539_s21, %s3248_s21   ;;  %s2435_s20 = sphi %s2537_s20, %s3247_s20   ;;  %s2431_s19 = sphi %s2535_s19, %s3246_s19   ;;  %s2427_s18 = sphi %s2533_s18, %s3252_s18   ;;  %s2423_s17 = sphi %s2531_s17, %s3251_s17  }
   0x8   : > { %3224 = sst [smem:[#allocation12_spill]] %s2431_s19  ;;  %s1872_s26 = sadd.s32 4294967294, %s2451_s24  }
   0x9   : > { %3225 = sst [smem:[#allocation13_spill]] %s2439_s21  ;;  %s33_s27 = sadd.s32 1, %s2443_s22 }
   0xa   : > { %3226 = sst [smem:[#allocation14_spill]] %s2443_s22  ;;  %p34_p0 = scmp.ge.s32.totalorder %s33_s27, 2 }
   0xb   : > { %3227 = sst [smem:[#allocation15_spill]] %s2447_s23  ;;  %s36_s28 = sadd.s32 1, %s2447_s23 }
   0xc   : > { %3228 = sst [smem:[#allocation16_spill]] %s2451_s24  ;;  %p303_p1 = scmp.ne.s32.totalorder %s2431_s19, %s2427_s18 }
   0xd   : > { %p304_p2 = scmp.eq.s32.totalorder %s1871_s25, 3  ;;  %s3255_s27 = smov (%p34_p0, %s33_s27), 0 }
   0xe   : > { %3229 = sst [smem:[#allocation17_spill]] %s3255_s27  ;;  %s3257_s28 = smov (!%p34_p0, %s36_s28), %s2447_s23 }
   0xf   : > { %s289_s29 = ssub.s32 %s2443_s22, %s3255_s27  ;;  %p2582_p3 = por %p304_p2, %p303_p1 }
  0x10   : > { %p38_p4 = scmp.ge.s32.totalorder %s3257_s28, 2  ;;  %p309_p5 = scmp.ne.s32.totalorder %s2427_s18, %s2423_s17 }
  0x11   : > { %s3230_s30 = scalar_select %p2582_p3, 1, 0 }
  0x12   : > { %p310_p6 = scmp.eq.s32.totalorder %s1872_s26, 3  ;;  %p1875_p7 = scmp.ge.s32.totalorder %s2451_s24, 1 }
  0x13   : > { %3231 = sst [smem:[#allocation18_spill]] %s3230_s30  ;;  %s3259_s28 = smov (%p38_p4, %s3257_s28), 0 }
  0x14   : > { %3232 = sst [smem:[#allocation19_spill]] %s3259_s28  ;;  %p2591_p8 = por %p310_p6, %p309_p5 }
  0x15   : > { %p379_p9 = scmp.lt.s32.totalorder %s2451_s24, 5  ;;  %s288_s13 = ssub.s32 %s2447_s23, %s3259_s28 }
  0x16   : > { %s3233_s12 = scalar_select %p2591_p8, 1, 0 }
  0x17   : > { %s293_s14 = sadd.s32 1, %s2431_s19  ;;  %s290_s15 = sor.u32 %s289_s29, %s288_s13 }
  0x18   : > { %3234 = sst [smem:[#allocation20_spill]] %s3233_s12  ;;  %p380_p10 = pnand %p1875_p7, %p379_p9 }
  0x19   : > { %p291_p11 = scmp.eq.s32.totalorder %s290_s15, 0  ;;  %s3213_s25 = sand.u32 (!%p380_p10), 1, %s2427_s18  }
  0x1a   : > { %383 = sbr.rel (%p380_p10) target bundleno = 928 (0x3a0), region = 64  ;;  %p431_p12 = scmp.lt.s32.totalorder (!%p380_p10), %s2439_s21, 1 }
  0x1b   : > { %s2600_s16 = scalar_select %p291_p11, %s2431_s19, %s293_s14  }
  0x1c   : > { %s2269_s26 = smul.u32 (!%p380_p10), 192, %s3213_s25  ;;  %s2607_s27 = sshll.u32 (!%p380_p10), %s2435_s20, 3 }
  0x1d   : > { %3235 = sst [smem:[#allocation21_spill]] %s2600_s16  ;;  %p442_p13 = scmp.lt.s32.totalorder (!%p380_p10), %s2607_s27, 15 }
  0x1e   : > { %p1881_p0 = scmp.ne.s32.totalorder (!%p380_p10), %s2435_s20, 0 }
  0x21   : > { %s2610_s28 = scalar_select %p431_p12, %s2439_s21, 1 }
  0x22   : > { %s443_s19 = scalar_select %p442_p13, %s2607_s27, 15 }
  0x23   : > { %s1932_s29 = sshll.u32 %s2610_s28, 6  ;;  %s438_s15 = scalar_lea.vmem %s3204_s7, %s2610_s28  ;;  %v2367_v0 = vld [vmem:[%s3198_s1] sm:$0xff] (!%p1881_p0)   ;;  %v2368_v1 = vld [vmem:[%s3198_s1 + $0x8] sm:$0xff] (!%p1881_p0)   ;;  %vm534_vm0 = vcmask (!%p1881_p0), 261120   ;;  %v658_v7 = vld [vmem:[%s3200_s3 + $0x10] sm:$0xff] (!%p1881_p0)  ;;  %v2453_v34 = vmov (!%p1881_p0), 0.0|0.0  }
  0x24   : > { %s2621_s16 = scalar_lea.vmem %s3197_s0, %s1932_s29  ;;  %s1879_s25 = sshll.u32 %s2610_s28, 4  ;;  %2078 = vmatprep.subr.bf16.mxu1 (!%p1881_p0), %v2367_v0  ;;  %v656_v5 = vld [vmem:[%s3200_s3] sm:$0xff] (!%p1881_p0)  ;;  %v657_v6 = vld [vmem:[%s3200_s3 + $0x8] sm:$0xff] (!%p1881_p0)  ;;  %v659_v9 = vld [vmem:[%s3200_s3 + $0x18] sm:$0xff] (!%p1881_p0)  ;;  %2237 = vmatprep.subr.bf16.mxu0 (!%p1881_p0), %v2453_v34  ;;  %vm2456_vm1 = vmmov (!%p1881_p0), 0   ;;  %vm1150_vm3 = vcmask (!%p1881_p0), 523264  }
  0x25   : > { %s445_s12 = sadd.s32 %s1879_s25, %s443_s19  ;;  %s2630_s21 = scalar_lea.vmem [#allocation6], %s2269_s26  ;;  %v2369_v2 = vld [vmem:[%s2621_s16] sm:$0xff] (!%p1881_p0)   ;;  %2079 = vmatpush3.bf16.msra.mxu1 (!%p1881_p0), %v2367_v0  ;;  %v2370_v3 = vld [vmem:[%s2621_s16 + $0x8] sm:$0xff] (!%p1881_p0)   ;;  %v2371_v4 = vld [vmem:[%s2621_s16 + $0x10] sm:$0xff] (!%p1881_p0)   ;;  %v2205_v8 = vpack.c.bf16 (!%p1881_p0), %v657_v6, %v656_v5  ;;  %v2209_v10 = vpack.c.bf16 (!%p1881_p0), %v659_v9, %v658_v7  ;;  %vm824_vm4 = vcmask (!%p1881_p0), 48128  }
  0x26   : > { %s1880_s17 = sshll.u32 %s445_s12, 3  ;;  %454 = sbr.rel (%p1881_p0) target bundleno = 665 (0x299), region = 68  ;;  %2080 = vmatprep.subr.bf16.mxu1 (!%p1881_p0), %v2368_v1  ;;  %2082 = vmatprep.mubr.msk.bf16.mxu1 (!%p1881_p0), %vm534_vm0, %v2369_v2  ;;  %v660_v11 = vld [vmem:[%s3200_s3 + $0x20] sm:$0xff] (!%p1881_p0)  ;;  %v661_v12 = vld [vmem:[%s3200_s3 + $0x28] sm:$0xff] (!%p1881_p0)  ;;  %v2372_v13 = vld [vmem:[%s2621_s16 + $0x18] sm:$0xff] (!%p1881_p0)  }
  0x27   : > { %s2628_s30 = scalar_lea.vmem %s3205_s8, %s1880_s17  ;;  %v2373_v14 = vld [vmem:[%s2621_s16 + $0x20] sm:$0xff] (!%p1881_p0)   ;;  %v2213_v15 = vpack.c.bf16 (!%p1881_p0), %v661_v12, %v660_v11  ;;  %v662_v16 = vld [vmem:[%s3200_s3 + $0x30] sm:$0xff] (!%p1881_p0)  ;;  %v663_v17 = vld [vmem:[%s3200_s3 + $0x38] sm:$0xff] (!%p1881_p0)  ;;  %s2454_s14 = smov (!%p1881_p0), 1   ;;  %v2457_v12 = vmov (!%p1881_p0), 0.0  }
  0x28   : > { %v2217_v18 = vpack.c.bf16 (!%p1881_p0), %v663_v17, %v662_v16  ;;  %v664_v19 = vld [vmem:[%s3200_s3 + $0x40] sm:$0xff] (!%p1881_p0)  ;;  %v665_v20 = vld [vmem:[%s3200_s3 + $0x48] sm:$0xff] (!%p1881_p0)  ;;  %v2375_v22 = vld [vmem:[%s2621_s16 + $0x30] sm:$0xff] (!%p1881_p0)   ;;  %s2455_s22 = smov (!%p1881_p0), 127   ;;  %2186 = vmatprep.mubr.msk.f32.mxu0 (!%p1881_p0), %vm2456_vm1, %v2457_v12  ;;  %s2458_s13 = smov (!%p1881_p0), 64  }
  0x29   : > { %2081 = vmatpush3.bf16.msra.mxu1 (!%p1881_p0), %v2368_v1  ;;  %v2374_v21 = vld [vmem:[%s2621_s16 + $0x28] sm:$0xff] (!%p1881_p0)   ;;  %v2221_v23 = vpack.c.bf16 (!%p1881_p0), %v665_v20, %v664_v19  ;;  %v666_v24 = vld [vmem:[%s3200_s3 + $0x50] sm:$0xff] (!%p1881_p0)  ;;  %v667_v25 = vld [vmem:[%s3200_s3 + $0x58] sm:$0xff] (!%p1881_p0) }
  0x2a   : > { %2206 = vmatprep.subr.bf16.mxu1 (!%p1881_p0), %v2205_v8  ;;  %v2225_v26 = vpack.c.bf16 (!%p1881_p0), %v667_v25, %v666_v24  ;;  %v668_v27 = vld [vmem:[%s3200_s3 + $0x60] sm:$0xff] (!%p1881_p0)  ;;  %v669_v28 = vld [vmem:[%s3200_s3 + $0x68] sm:$0xff] (!%p1881_p0)  ;;  %v2376_v29 = vld [vmem:[%s2621_s16 + $0x38] sm:$0xff] (!%p1881_p0)  }
  0x2b   : > { %v2229_v30 = vpack.c.bf16 (!%p1881_p0), %v669_v28, %v668_v27  ;;  %v670_v31 = vld [vmem:[%s3200_s3 + $0x70] sm:$0xff] (!%p1881_p0)  ;;  %v671_v32 = vld [vmem:[%s3200_s3 + $0x78] sm:$0xff] (!%p1881_p0)  ;;  %v2707_v35 = vld [vmem:[%s3199_s2] ss:$0 sm:$0xff] (!%p1881_p0) }
  0x2c   : > { %2083 = vmatmul.mubr.msk.bf16.vlgmr.msra.gmra.mrb[0].mxu1 (!%p1881_p0), %vm534_vm0, %v2370_v3  ;;  %v2233_v33 = vpack.c.bf16 (!%p1881_p0), %v671_v32, %v670_v31  ;;  %v1934_v19 = vld [vmem:[%s3206_s9] sm:$0xff] (!%p1881_p0)   ;;  %v1997_v28 = vld [vmem:[%s3206_s9 + $0x8] sm:$0xff] (!%p1881_p0)  }
  0x2d   : > { %2086 = vmatprep.mubr.msk.bf16.mxu1 %vm534_vm0, %v2371_v4  ;;  %2208 = vmatpush3.bf16.msra.mxu1 %v2205_v8  ;;  %v1966_v20 = vld [vmem:[%s3207_s10] sm:$0xff]  }
  0x2e   : > { %2210 = vmatprep.subr.bf16.mxu1 %v2209_v10  ;;  %v1967_v27 = vunpack.c.l.bf16 %v1966_v20 }
  0x31   : > { %2212 = vmatpush3.bf16.msra.mxu1 %v2209_v10 }
  0x32   : > { %2214 = vmatprep.subr.bf16.mxu1 %v2213_v15 }
  0x34   : > { %2087 = vmatmul.mubr.msk.bf16.gmra.mrb[4].mxu1 %vm534_vm0, %v2372_v13  ;;  %v841_v13 = vld [vmem:[%s3201_s4] sm:$0x3f] }
  0x35   : > { %2090 = vmatprep.mubr.msk.bf16.mxu1 %vm534_vm0, %v2373_v14  ;;  %2216 = vmatpush3.bf16.msra.mxu1 %v2213_v15  ;;  %v919_v14 = vlaneseq }
  0x36   : > { %2218 = vmatprep.subr.bf16.mxu1 %v2217_v18 }
  0x37   : > { %v920_v15 = vand.u32 127, %v919_v14  ;;  %v2006_v14 = vld [vmem:[%s3207_s10 + $0x18] sm:$0xff]  }
  0x39   : > { %2220 = vmatpush3.bf16.msra.mxu1 %v2217_v18  ;;  %v989_v17 = vand.u32 1, %v920_v15 }
  0x3a   : > { %2222 = vmatprep.subr.bf16.mxu1 %v2221_v23 }
  0x3b   : > { %vm2872_vm2 = vcmp.eq.s32.totalorder %v989_v17, 0  ;;  %v1999_v17 = vld [vmem:[%s3206_s9 + $0x18] sm:$0xff]  }
  0x3c   : > { %2091 = vmatmul.mubr.msk.bf16.gmra.mrb[8].mxu1 %vm534_vm0, %v2374_v21 }
  0x3d   : > { %2094 = vmatprep.mubr.msk.bf16.mxu1 %vm534_vm0, %v2375_v22  ;;  %2224 = vmatpush3.bf16.msra.mxu1 %v2221_v23  ;;  %v2004_v22 = vld [vmem:[%s3207_s10 + $0x8] sm:$0xff]  }
  0x3e   : > { %2226 = vmatprep.subr.bf16.mxu1 %v2225_v26 }
  0x41   : > { %2228 = vmatpush3.bf16.msra.mxu1 %v2225_v26  ;;  %v1935_v26 = vunpack.c.l.bf16 %v1934_v19 }
  0x42   : > { %2230 = vmatprep.subr.bf16.mxu1 %v2229_v30 }
  0x44   : > { %2095 = vmatmul.mubr.msk.bf16.gmra.mrb[12].mxu1 %vm534_vm0, %v2376_v29 }
  0x45   : > { %2232 = vmatpush3.bf16.msra.mxu1 %v2229_v30  ;;  %v1971_v30 = vunpack.c.l.bf16 %v2004_v22 }
  0x46   : > { %2234 = vmatprep.subr.bf16.mxu1 %v2233_v33 }
  0x49   : > { %2236 = vmatpush3.bf16.msra.mxu1 %v2233_v33  ;;  %v1939_v33 = vunpack.c.l.bf16 %v1997_v28 }
  0xff   : > { %v2084_v36 = vpop.f32.mrb[0].mxu1 }
 0x100   : > { %v2710_v37 = vadd.f32 %v2084_v36, %v2707_v35  ;;  %v593_v38 = vpop.f32.mrb[1].mxu1 }
 0x101   : > { %v2713_v39 = vadd.f32 %v2707_v35, %v593_v38  ;;  %v2085_v40 = vpop.f32.mrb[2].mxu1 }
 0x102   : > { %v2716_v41 = vadd.f32 %v2085_v40, %v2707_v35  ;;  %957 = vrot.lane.b32.xlu0 %v2710_v37, %s2454_s14  ;;  %925 = vrot.lane.b32.xlu1 %v2710_v37, %s2455_s22  ;;  %v596_v42 = vpop.f32.mrb[3].mxu1 }
 0x103   : > { %v2723_v43 = vadd.f32 %v2707_v35, %v596_v42  ;;  %2130 = vmatprep.mubr.f32.mxu1 %v2713_v39  ;;  %v1062_v38 = vmul.f32 %v1935_v26, %v2713_v39  ;;  %v1940_v42 = vunpack.c.h.bf16 %v1997_v28  ;;  %v1948_v26 = vunpack.c.h.bf16 %v1999_v17 }
 0x104   : > { %v2241_v44 = vpack.c.bf16 %v2716_v41, %v2710_v37  ;;  %v1980_v28 = vunpack.c.h.bf16 %v2006_v14 }
 0x105   : > { %2131 = vmatmul.mubr.f32.vlgmr.msra.gmra.mrb[16].mxu1 %v2723_v43  ;;  %v2238_v45 = vpack.c.bf16 %v2723_v43, %v2713_v39 }
 0x106   : > { %953 = vrot.lane.b32.xlu1 %v2713_v39, %s2454_s14  ;;  %921 = vrot.lane.b32.xlu0 %v2713_v39, %s2455_s22  ;;  %v1968_v39 = vunpack.c.h.bf16 %v1966_v20  ;;  %v1979_v20 = vunpack.c.l.bf16 %v2006_v14 }
 0x107   : > { %2133 = vmatprep.mubr.f32.mxu1 %v2710_v37  ;;  %v2088_v46 = vpop.f32.mrb[4].mxu1  ;;  %2239 = vmatpush3.bf16.xpose.msra.mxu0 %v2238_v45 }
 0x108   : > { %v2737_v47 = vadd.f32 %v2088_v46, %v2707_v35  ;;  %v609_v48 = vpop.f32.mrb[5].mxu1  ;;  %2240 = vmatprep.subr.bf16.mxu0 %v2453_v34 }
 0x109   : > { %v2741_v49 = vadd.f32 %v2707_v35, %v609_v48  ;;  %v2089_v50 = vpop.f32.mrb[6].mxu1  ;;  %2134 = vmatmul.mubr.f32.gmra.mrb[18].mxu1 %v2716_v41 }
 0x10a   : > { %v2745_v51 = vadd.f32 %v2089_v50, %v2707_v35  ;;  %v612_v52 = vpop.f32.mrb[7].mxu1  ;;  %927 = vrot.lane.b32.xlu1 %v2716_v41, %s2455_s22  ;;  %959 = vrot.lane.b32.xlu0 %v2716_v41, %s2454_s14 }
 0x10b   : > { %v2752_v53 = vadd.f32 %v2707_v35, %v612_v52  ;;  %2136 = vmatprep.mubr.f32.mxu1 %v2741_v49 }
 0x10c   : > { %v2247_v54 = vpack.c.bf16 %v2745_v51, %v2737_v47 }
 0x10d   : > { %2137 = vmatmul.mubr.f32.gmra.mrb[20].mxu1 %v2752_v53  ;;  %v2244_v55 = vpack.c.bf16 %v2752_v53, %v2741_v49 }
 0x10e   : > { %933 = vrot.lane.b32.xlu1 %v2737_v47, %s2455_s22  ;;  %923 = vrot.lane.b32.xlu0 %v2723_v43, %s2455_s22 }
 0x10f   : > { %2139 = vmatprep.mubr.f32.mxu1 %v2737_v47  ;;  %2242 = vmatpush3.bf16.xpose.msra.mxu0 %v2241_v44  ;;  %v2092_v56 = vpop.f32.mrb[8].mxu1 }
 0x110   : > { %v625_v57 = vpop.f32.mrb[9].mxu1  ;;  %2243 = vmatprep.subr.bf16.mxu0 %v2453_v34  ;;  %v2775_v60 = vadd.f32 %v2092_v56, %v2707_v35  ;;  %v1064_v56 = vmul.f32 %v1939_v33, %v2710_v37 }
 0x111   : > { %2140 = vmatmul.mubr.f32.gmra.mrb[22].mxu1 %v2745_v51  ;;  %v2768_v58 = vadd.f32 %v2707_v35, %v625_v57  ;;  %v2093_v59 = vpop.f32.mrb[10].mxu1 }
 0x112   : > { %929 = vrot.lane.b32.xlu1 %v2741_v49, %s2455_s22  ;;  %955 = vrot.lane.b32.xlu0 %v2723_v43, %s2454_s14  ;;  %v2778_v61 = vadd.f32 %v2093_v59, %v2707_v35  ;;  %v628_v62 = vpop.f32.mrb[11].mxu1 }
 0x113   : > { %v2781_v63 = vadd.f32 %v2707_v35, %v628_v62  ;;  %2142 = vmatprep.mubr.f32.mxu1 %v2768_v58  ;;  %v1936_v62 = vunpack.c.h.bf16 %v1934_v19 }
 0x114   : > { %v2253_v0 = vpack.c.bf16 %v2778_v61, %v2775_v60 }
 0x115   : > { %2143 = vmatmul.mubr.f32.gmra.mrb[24].mxu1 %v2781_v63  ;;  %v2250_v1 = vpack.c.bf16 %v2781_v63, %v2768_v58  ;;  %v1063_v37 = vmul.f32 %v1936_v62, %v2723_v43 }
 0x116   : > { %935 = vrot.lane.b32.xlu1 %v2745_v51, %s2455_s22  ;;  %965 = vrot.lane.b32.xlu0 %v2737_v47, %s2454_s14 }
 0x117   : > { %2245 = vmatpush3.bf16.xpose.msra.mxu0 %v2244_v55  ;;  %2145 = vmatprep.mubr.f32.mxu1 %v2775_v60  ;;  %v2096_v2 = vpop.f32.mrb[12].mxu1  ;;  %v1065_v55 = vmul.f32 %v1940_v42, %v2716_v41  ;;  %v2005_v41 = vld [vmem:[%s3207_s10 + $0x10] sm:$0xff]  }
 0x118   : > { %2246 = vmatprep.subr.bf16.mxu0 %v2453_v34  ;;  %v641_v3 = vpop.f32.mrb[13].mxu1  ;;  %v2804_v6 = vadd.f32 %v2096_v2, %v2707_v35  ;;  %v1976_v42 = vunpack.c.h.bf16 %v2005_v41 }
 0x119   : > { %2146 = vmatmul.mubr.f32.gmra.mrb[26].mxu1 %v2778_v61  ;;  %v2797_v4 = vadd.f32 %v2707_v35, %v641_v3  ;;  %v2097_v5 = vpop.f32.mrb[14].mxu1 }
 0x11a   : > { %931 = vrot.lane.b32.xlu1 %v2752_v53, %s2455_s22  ;;  %961 = vrot.lane.b32.xlu0 %v2741_v49, %s2454_s14  ;;  %v2807_v7 = vadd.f32 %v2097_v5, %v2707_v35  ;;  %v644_v8 = vpop.f32.mrb[15].mxu1 }
 0x11b   : > { %v2810_v9 = vadd.f32 %v2707_v35, %v644_v8  ;;  %2148 = vmatprep.mubr.f32.mxu1 %v2797_v4  ;;  %v1972_v35 = vunpack.c.h.bf16 %v2004_v22 }
 0x11c   : > { %v2259_v10 = vpack.c.bf16 %v2807_v7, %v2804_v6 }
 0x11d   : > { %2149 = vmatmul.mubr.f32.gmra.mrb[28].mxu1 %v2810_v9  ;;  %v2256_v11 = vpack.c.bf16 %v2810_v9, %v2797_v4 }
 0x11e   : > { %941 = vrot.lane.b32.xlu1 %v2775_v60, %s2455_s22  ;;  %967 = vrot.lane.b32.xlu0 %v2745_v51, %s2454_s14 }
 0x11f   : > { %2248 = vmatpush3.bf16.xpose.msra.mxu0 %v2247_v54  ;;  %2151 = vmatprep.mubr.f32.mxu1 %v2804_v6 }
 0x120   : > { %2249 = vmatprep.subr.bf16.mxu0 %v2453_v34 }
 0x121   : > { %2152 = vmatmul.mubr.f32.gmra.mrb[30].mxu1 %v2807_v7 }
 0x122   : > { %937 = vrot.lane.b32.xlu1 %v2768_v58, %s2455_s22  ;;  %963 = vrot.lane.b32.xlu0 %v2752_v53, %s2454_s14 }
 0x126   : > { %943 = vrot.lane.b32.xlu1 %v2778_v61, %s2455_s22  ;;  %973 = vrot.lane.b32.xlu0 %v2775_v60, %s2454_s14 }
 0x127   : > { %2251 = vmatpush3.bf16.xpose.msra.mxu0 %v2250_v1 }
 0x128   : > { %2252 = vmatprep.subr.bf16.mxu0 %v2453_v34 }
 0x12a   : > { %939 = vrot.lane.b32.xlu1 %v2781_v63, %s2455_s22  ;;  %969 = vrot.lane.b32.xlu0 %v2768_v58, %s2454_s14 }
 0x12e   : > { %949 = vrot.lane.b32.xlu1 %v2804_v6, %s2455_s22  ;;  %975 = vrot.lane.b32.xlu0 %v2778_v61, %s2454_s14 }
 0x12f   : > { %2254 = vmatpush3.bf16.xpose.msra.mxu0 %v2253_v0 }
 0x130   : > { %2255 = vmatprep.subr.bf16.mxu0 %v2453_v34 }
 0x132   : > { %945 = vrot.lane.b32.xlu1 %v2797_v4, %s2455_s22  ;;  %971 = vrot.lane.b32.xlu0 %v2781_v63, %s2454_s14 }
 0x136   : > { %951 = vrot.lane.b32.xlu1 %v2807_v7, %s2455_s22  ;;  %977 = vrot.lane.b32.xlu0 %v2797_v4, %s2454_s14 }
 0x137   : > { %2257 = vmatpush3.bf16.xpose.msra.mxu0 %v2256_v11 }
 0x138   : > { %2258 = vmatprep.subr.bf16.mxu0 %v2453_v34 }
 0x13a   : > { %947 = vrot.lane.b32.xlu1 %v2810_v9, %s2455_s22  ;;  %979 = vrot.lane.b32.xlu0 %v2810_v9, %s2454_s14 }
 0x13e   : > { %983 = vrot.lane.b32.xlu1 %v2807_v7, %s2454_s14  ;;  %981 = vrot.lane.b32.xlu0 %v2804_v6, %s2454_s14 }
 0x13f   : > { %2260 = vmatpush3.bf16.xpose.msra.mxu0 %v2259_v10  ;;  %v1998_v10 = vld [vmem:[%s3206_s9 + $0x10] sm:$0xff]  }
 0x140   : > { %v1943_v43 = vunpack.c.l.bf16 %v1998_v10 }
 0x146   : > { %2187 = vmatmul.mubr.f32.vlgmr.msra.gmra.mrb[0].mxu0 %v841_v13 }
 0x174   : > { %v958_v16 = vpop.permute.xlu0 %957  ;;  %v926_v18 = vpop.permute.xlu1 %925 }
 0x175   : > { %v1000_v21 = vsub.f32 0.0, %v926_v18 }
 0x177   : > { %v1016_v31 = vsel %vm2872_vm2, %v1000_v21, %v958_v16  ;;  %v1975_v16 = vunpack.c.l.bf16 %v2005_v41 }
 0x178   : > { %v954_v24 = vpop.permute.xlu1 %953  ;;  %v922_v25 = vpop.permute.xlu0 %921  ;;  %v1112_v46 = vmul.f32 %v1971_v30, %v1016_v31  ;;  %v1947_v30 = vunpack.c.l.bf16 %v1999_v17 }
 0x179   : > { %v998_v29 = vsub.f32 0.0, %v922_v25 }
 0x17a   : > { %v1128_v59 = vadd.f32 %v1112_v46, %v1064_v56 }
 0x17b   : > { %v1014_v32 = vsel %vm2872_vm2, %v998_v29, %v954_v24  ;;  %v1066_v29 = vmul.f32 %v1943_v43, %v2741_v49 }
 0x17c   : > { %v928_v34 = vpop.permute.xlu1 %927  ;;  %v960_v36 = vpop.permute.xlu0 %959  ;;  %v1110_v40 = vmul.f32 %v1967_v27, %v1014_v32 }
 0x17d   : > { %v1001_v44 = vsub.f32 0.0, %v928_v34 }
 0x17e   : > { %v1126_v45 = vadd.f32 %v1110_v40, %v1062_v38  ;;  %v1944_v38 = vunpack.c.h.bf16 %v1998_v10 }
 0x17f   : > { %v1017_v48 = vsel %vm2872_vm2, %v1001_v44, %v960_v36  ;;  %v1069_v44 = vmul.f32 %v1948_v26, %v2745_v51 }
 0x180   : > { %v1113_v50 = vmul.f32 %v1972_v35, %v1017_v48  ;;  %v934_v52 = vpop.permute.xlu1 %933  ;;  %v924_v54 = vpop.permute.xlu0 %923  ;;  %1175 = vrot.lane.b32.xlu0 %v1126_v45, %s2458_s13  ;;  %v1067_v51 = vmul.f32 %v1944_v38, %v2752_v53 }
 0x181   : > { %v999_v0 = vsub.f32 0.0, %v924_v54  ;;  %v1004_v18 = vsub.f32 0.0, %v934_v52 }
 0x182   : > { %v1129_v57 = vadd.f32 %v1113_v50, %v1065_v55  ;;  %v2459_v55 = vmov 0  }
 0x183   : > { %2366 = vset.pattern.permute.xlu0 %v2459_v55  ;;  %v2003_v55 = vld [vmem:[%s3206_s9 + $0x38] sm:$0xff]  }
 0x184   : > { %v930_v1 = vpop.permute.xlu1 %929  ;;  %1181 = vrot.lane.b32.xlu1 %v1129_v57, %s2458_s13  ;;  %v956_v2 = vpop.permute.xlu0 %955  ;;  %v1143_v3 = vpack.c.bf16 %v1129_v57, %v1128_v59  ;;  %1179 = vrot.lane.b32.xlu0 %v1128_v59, %s2458_s13 }
 0x185   : > { %v1015_v5 = vsel %vm2872_vm2, %v999_v0, %v956_v2  ;;  %v1002_v19 = vsub.f32 0.0, %v930_v1  ;;  %v2008_v1 = vld [vmem:[%s3207_s10 + $0x28] sm:$0xff]  }
 0x186   : > { %v1111_v8 = vmul.f32 %v1968_v39, %v1015_v5  ;;  %1152 = vst.msk [vmem:[#allocation2 + $0x8] sm:$0xff] %vm1150_vm3, %v1143_v3  ;;  %v2000_v39 = vld [vmem:[%s3206_s9 + $0x20] sm:$0xff]   ;;  %v2001_v5 = vld [vmem:[%s3206_s9 + $0x28] sm:$0xff]   ;;  %v1987_v41 = vunpack.c.l.bf16 %v2008_v1 }
 0x187   : > { %v1951_v3 = vunpack.c.l.bf16 %v2000_v39  ;;  %v1956_v14 = vunpack.c.h.bf16 %v2001_v5  ;;  %v1955_v17 = vunpack.c.l.bf16 %v2001_v5 }
 0x188   : > { %v936_v11 = vpop.permute.xlu1 %935  ;;  %v966_v12 = vpop.permute.xlu0 %965  ;;  %v1127_v13 = vadd.f32 %v1111_v8, %v1063_v37 }
 0x189   : > { %v1020_v24 = vsel %vm2872_vm2, %v1004_v18, %v966_v12  ;;  %v1005_v31 = vsub.f32 0.0, %v936_v11  ;;  %v1070_v43 = vmul.f32 %v1951_v3, %v2768_v58  ;;  %v2002_v58 = vld [vmem:[%s3206_s9 + $0x30] sm:$0xff]  }
 0x18a   : > { %1177 = vrot.lane.b32.xlu1 %v1127_v13, %s2458_s13  ;;  %v1142_v15 = vpack.c.bf16 %v1127_v13, %v1126_v45  ;;  %v1116_v32 = vmul.f32 %v1979_v20, %v1020_v24  ;;  %v1068_v45 = vmul.f32 %v1947_v30, %v2737_v47  ;;  %v2007_v47 = vld [vmem:[%s3207_s10 + $0x20] sm:$0xff]   ;;  %v1959_v38 = vunpack.c.l.bf16 %v2002_v58 }
 0x18b   : > { %v1983_v2 = vunpack.c.l.bf16 %v2007_v47 }
 0x18c   : > { %1151 = vst.msk [vmem:[#allocation2] sm:$0xff] %vm1150_vm3, %v1142_v15  ;;  %v932_v21 = vpop.permute.xlu1 %931  ;;  %v962_v22 = vpop.permute.xlu0 %961  ;;  %v1132_v52 = vadd.f32 %v1116_v32, %v1068_v45 }
 0x18d   : > { %v1018_v25 = vsel %vm2872_vm2, %v1002_v19, %v962_v22  ;;  %v1003_v46 = vsub.f32 0.0, %v932_v21 }
 0x18e   : > { %v1114_v27 = vmul.f32 %v1975_v16, %v1018_v25  ;;  %v1988_v16 = vunpack.c.h.bf16 %v2008_v1  ;;  %v1952_v25 = vunpack.c.h.bf16 %v2000_v39  ;;  %v1960_v39 = vunpack.c.h.bf16 %v2002_v58 }
 0x18f   : > { %v1964_v1 = vunpack.c.h.bf16 %v2003_v55 }
 0x190   : > { %v942_v33 = vpop.permute.xlu1 %941  ;;  %v968_v34 = vpop.permute.xlu0 %967  ;;  %v1130_v35 = vadd.f32 %v1114_v27, %v1066_v29  ;;  %v1984_v27 = vunpack.c.h.bf16 %v2007_v47  ;;  %v1072_v29 = vmul.f32 %v1955_v17, %v2775_v60 }
 0x191   : > { %v1021_v36 = vsel %vm2872_vm2, %v1005_v31, %v968_v34  ;;  %v1008_v8 = vsub.f32 0.0, %v942_v33  ;;  %v2009_v31 = vld [vmem:[%s3207_s10 + $0x30] sm:$0xff]  }
 0x192   : > { %v1117_v40 = vmul.f32 %v1980_v28, %v1021_v36  ;;  %1183 = vrot.lane.b32.xlu0 %v1130_v35, %s2458_s13  ;;  %v1073_v28 = vmul.f32 %v1956_v14, %v2778_v61 }
 0x194   : > { %v938_v49 = vpop.permute.xlu1 %937  ;;  %v964_v48 = vpop.permute.xlu0 %963  ;;  %v1133_v50 = vadd.f32 %v1117_v40, %v1069_v44  ;;  %v1991_v40 = vunpack.c.l.bf16 %v2009_v31 }
 0x195   : > { %v1019_v54 = vsel %vm2872_vm2, %v1003_v46, %v964_v48  ;;  %v1006_v37 = vsub.f32 0.0, %v938_v49 }
 0x196   : > { %v1115_v56 = vmul.f32 %v1976_v42, %v1019_v54  ;;  %1189 = vrot.lane.b32.xlu1 %v1133_v50, %s2458_s13  ;;  %v1145_v57 = vpack.c.bf16 %v1133_v50, %v1132_v52  ;;  %1187 = vrot.lane.b32.xlu0 %v1132_v52, %s2458_s13  ;;  %v1071_v42 = vmul.f32 %v1952_v25, %v2781_v63  ;;  %v2010_v63 = vld [vmem:[%s3207_s10 + $0x38] sm:$0xff]  }
 0x197   : > { %v1074_v54 = vmul.f32 %v1959_v38, %v2797_v4  ;;  %v1996_v4 = vunpack.c.h.bf16 %v2010_v63 }
 0x198   : > { %1154 = vst.msk [vmem:[#allocation2 + $0x18] sm:$0xff] %vm1150_vm3, %v1145_v57  ;;  %v944_v59 = vpop.permute.xlu1 %943  ;;  %v974_v62 = vpop.permute.xlu0 %973  ;;  %v1131_v0 = vadd.f32 %v1115_v56, %v1067_v51  ;;  %v1992_v57 = vunpack.c.h.bf16 %v2009_v31 }
 0x199   : > { %v1024_v12 = vsel %vm2872_vm2, %v1008_v8, %v974_v62  ;;  %v1009_v18 = vsub.f32 0.0, %v944_v59  ;;  %v1963_v62 = vunpack.c.l.bf16 %v2003_v55 }
 0x19a   : > { %1185 = vrot.lane.b32.xlu1 %v1131_v0, %s2458_s13  ;;  %v1144_v53 = vpack.c.bf16 %v1131_v0, %v1130_v35  ;;  %v1120_v19 = vmul.f32 %v1987_v41, %v1024_v12  ;;  %v1995_v0 = vunpack.c.l.bf16 %v2010_v63  ;;  %v1075_v41 = vmul.f32 %v1960_v39, %v2810_v9  ;;  %v842_v9 = vld [vmem:[%s3203_s6] sm:$0x3f] }
 0x19b   : > { %v1076_v12 = vmul.f32 %v1963_v62, %v2804_v6  ;;  %v1901_v6 = vld [vmem:[%s3202_s5] ss:$0 sm:$0xff] }
 0x19c   : > { %1153 = vst.msk [vmem:[#allocation2 + $0x10] sm:$0xff] %vm1150_vm3, %v1144_v53  ;;  %v940_v10 = vpop.permute.xlu1 %939  ;;  %v970_v11 = vpop.permute.xlu0 %969  ;;  %v1136_v35 = vadd.f32 %v1120_v19, %v1072_v29 }
 0x19d   : > { %v1022_v13 = vsel %vm2872_vm2, %v1006_v37, %v970_v11  ;;  %v1007_v30 = vsub.f32 0.0, %v940_v10 }
 0x19e   : > { %v1118_v15 = vmul.f32 %v1983_v2, %v1022_v13 }
 0x1a0   : > { %v950_v20 = vpop.permute.xlu1 %949  ;;  %v976_v21 = vpop.permute.xlu0 %975  ;;  %v1134_v22 = vadd.f32 %v1118_v15, %v1070_v43  ;;  %v1077_v15 = vmul.f32 %v1964_v1, %v2807_v7 }
 0x1a1   : > { %v1025_v24 = vsel %vm2872_vm2, %v1009_v18, %v976_v21  ;;  %v1012_v53 = vsub.f32 0.0, %v950_v20 }
 0x1a2   : > { %v1121_v26 = vmul.f32 %v1988_v16, %v1025_v24  ;;  %1191 = vrot.lane.b32.xlu0 %v1134_v22, %s2458_s13 }
 0x1a4   : > { %v946_v32 = vpop.permute.xlu1 %945  ;;  %v972_v33 = vpop.permute.xlu0 %971  ;;  %v1137_v34 = vadd.f32 %v1121_v26, %v1073_v28 }
 0x1a5   : > { %v1023_v36 = vsel %vm2872_vm2, %v1007_v30, %v972_v33  ;;  %v1010_v44 = vsub.f32 0.0, %v946_v32 }
 0x1a6   : > { %v1119_v61 = vmul.f32 %v1984_v27, %v1023_v36  ;;  %1197 = vrot.lane.b32.xlu1 %v1137_v34, %s2458_s13  ;;  %v1147_v60 = vpack.c.bf16 %v1137_v34, %v1136_v35  ;;  %1195 = vrot.lane.b32.xlu0 %v1136_v35, %s2458_s13 }
 0x1a8   : > { %1156 = vst.msk [vmem:[#allocation2 + $0x28] sm:$0xff] %vm1150_vm3, %v1147_v60  ;;  %v952_v45 = vpop.permute.xlu1 %951  ;;  %v978_v46 = vpop.permute.xlu0 %977  ;;  %v1135_v49 = vadd.f32 %v1119_v61, %v1071_v42 }
 0x1a9   : > { %v1026_v48 = vsel %vm2872_vm2, %v1010_v44, %v978_v46  ;;  %v1013_v2 = vsub.f32 0.0, %v952_v45 }
 0x1aa   : > { %v1122_v50 = vmul.f32 %v1991_v40, %v1026_v48  ;;  %1193 = vrot.lane.b32.xlu1 %v1135_v49, %s2458_s13  ;;  %v1146_v52 = vpack.c.bf16 %v1135_v49, %v1134_v22 }
 0x1ac   : > { %1155 = vst.msk [vmem:[#allocation2 + $0x20] sm:$0xff] %vm1150_vm3, %v1146_v52  ;;  %v948_v56 = vpop.permute.xlu1 %947  ;;  %v980_v51 = vpop.permute.xlu0 %979  ;;  %v1138_v47 = vadd.f32 %v1122_v50, %v1074_v54 }
 0x1ad   : > { %v1011_v59 = vsub.f32 0.0, %v948_v56 }
 0x1ae   : > { %1199 = vrot.lane.b32.xlu0 %v1138_v47, %s2458_s13 }
 0x1af   : > { %v1027_v3 = vsel %vm2872_vm2, %v1011_v59, %v980_v51 }
 0x1b0   : > { %v1123_v5 = vmul.f32 %v1992_v57, %v1027_v3  ;;  %v984_v8 = vpop.permute.xlu1 %983  ;;  %v982_v37 = vpop.permute.xlu0 %981 }
 0x1b1   : > { %v1029_v10 = vsel %vm2872_vm2, %v1013_v2, %v984_v8  ;;  %v1028_v11 = vsel %vm2872_vm2, %v1012_v53, %v982_v37 }
 0x1b2   : > { %v1125_v13 = vmul.f32 %v1996_v4, %v1029_v10  ;;  %v1124_v14 = vmul.f32 %v1995_v0, %v1028_v11  ;;  %v1139_v16 = vadd.f32 %v1123_v5, %v1075_v41 }
 0x1b4   : > { %v1141_v43 = vadd.f32 %v1125_v13, %v1077_v15  ;;  %v1140_v17 = vadd.f32 %v1124_v14, %v1076_v12  ;;  %v1148_v18 = vpack.c.bf16 %v1139_v16, %v1138_v47 }
 0x1b6   : > { %1205 = vrot.lane.b32.xlu1 %v1141_v43, %s2458_s13  ;;  %v1149_v19 = vpack.c.bf16 %v1141_v43, %v1140_v17  ;;  %1203 = vrot.lane.b32.xlu0 %v1140_v17, %s2458_s13  ;;  %1157 = vst.msk [vmem:[#allocation2 + $0x30] sm:$0xff] %vm1150_vm3, %v1148_v18 }
 0x1b8   : > { %1158 = vst.msk [vmem:[#allocation2 + $0x38] sm:$0xff] %vm1150_vm3, %v1149_v19 }
 0x1ba   : > { %1201 = vrot.lane.b32.xlu1 %v1139_v16, %s2458_s13  ;;  %845 = vperm.xlu0 %2366, %v842_v9  }
 0x1d8   : > { %v2132_v7 = vpop.f32.mrb[16].mxu1 }
 0x1d9   : > { %v751_v23 = vadd.f32 %v2132_v7, %v1901_v6  ;;  %v745_v20 = vpop.f32.mrb[17].mxu1 }
 0x1da   : > { %v746_v21 = vadd.f32 %v1901_v6, %v745_v20 }
 0x1db   : > { %826 = vst.msk [vmem:[#allocation4 + $0x8] sm:$0xff] %vm824_vm4, %v751_v23 }
 0x1dc   : > { %825 = vst.msk [vmem:[#allocation4] sm:$0xff] %vm824_vm4, %v746_v21  ;;  %v2135_v22 = vpop.f32.mrb[18].mxu1 }
 0x1dd   : > { %v761_v24 = vadd.f32 %v2135_v22, %v1901_v6  ;;  %v755_v25 = vpop.f32.mrb[19].mxu1 }
 0x1de   : > { %v756_v26 = vadd.f32 %v1901_v6, %v755_v25 }
 0x1df   : > { %828 = vst.msk [vmem:[#allocation4 + $0x18] sm:$0xff] %vm824_vm4, %v761_v24 }
 0x1e0   : > { %827 = vst.msk [vmem:[#allocation4 + $0x10] sm:$0xff] %vm824_vm4, %v756_v26  ;;  %v2138_v27 = vpop.f32.mrb[20].mxu1 }
 0x1e1   : > { %v771_v28 = vadd.f32 %v2138_v27, %v1901_v6  ;;  %v765_v29 = vpop.f32.mrb[21].mxu1 }
 0x1e2   : > { %v766_v58 = vadd.f32 %v1901_v6, %v765_v29 }
 0x1e3   : > { %830 = vst.msk [vmem:[#allocation4 + $0x28] sm:$0xff] %vm824_vm4, %v771_v28 }
 0x1e4   : > { %829 = vst.msk [vmem:[#allocation4 + $0x20] sm:$0xff] %vm824_vm4, %v766_v58  ;;  %v2141_v30 = vpop.f32.mrb[22].mxu1 }
 0x1e5   : > { %v781_v31 = vadd.f32 %v2141_v30, %v1901_v6  ;;  %v775_v32 = vpop.f32.mrb[23].mxu1 }
 0x1e6   : > { %v776_v33 = vadd.f32 %v1901_v6, %v775_v32 }
 0x1e7   : > { %832 = vst.msk [vmem:[#allocation4 + $0x38] sm:$0xff] %vm824_vm4, %v781_v31 }
 0x1e8   : > { %831 = vst.msk [vmem:[#allocation4 + $0x30] sm:$0xff] %vm824_vm4, %v776_v33  ;;  %v2144_v34 = vpop.f32.mrb[24].mxu1 }
 0x1e9   : > { %v791_v35 = vadd.f32 %v2144_v34, %v1901_v6  ;;  %v785_v36 = vpop.f32.mrb[25].mxu1 }
 0x1ea   : > { %v786_v38 = vadd.f32 %v1901_v6, %v785_v36 }
 0x1eb   : > { %834 = vst.msk [vmem:[#allocation4 + $0x48] sm:$0xff] %vm824_vm4, %v791_v35 }
 0x1ec   : > { %833 = vst.msk [vmem:[#allocation4 + $0x40] sm:$0xff] %vm824_vm4, %v786_v38  ;;  %v2147_v61 = vpop.f32.mrb[26].mxu1 }
 0x1ed   : > { %v801_v60 = vadd.f32 %v2147_v61, %v1901_v6  ;;  %v795_v40 = vpop.f32.mrb[27].mxu1 }
 0x1ee   : > { %v796_v42 = vadd.f32 %v1901_v6, %v795_v40 }
 0x1ef   : > { %836 = vst.msk [vmem:[#allocation4 + $0x58] sm:$0xff] %vm824_vm4, %v801_v60 }
 0x1f0   : > { %835 = vst.msk [vmem:[#allocation4 + $0x50] sm:$0xff] %vm824_vm4, %v796_v42  ;;  %v2150_v44 = vpop.f32.mrb[28].mxu1 }
 0x1f1   : > { %v811_v45 = vadd.f32 %v2150_v44, %v1901_v6  ;;  %v805_v46 = vpop.f32.mrb[29].mxu1 }
 0x1f2   : > { %v1176_v49 = vpop.permute.xlu0 %1175  ;;  %v806_v48 = vadd.f32 %v1901_v6, %v805_v46 }
 0x1f3   : > { %1223 = vxpose.xlu1.b32.start [1/16] (narrow) %v1176_v49, 64  ;;  %838 = vst.msk [vmem:[#allocation4 + $0x68] sm:$0xff] %vm824_vm4, %v811_v45 }
 0x1f4   : > { %837 = vst.msk [vmem:[#allocation4 + $0x60] sm:$0xff] %vm824_vm4, %v806_v48  ;;  %v2153_v50 = vpop.f32.mrb[30].mxu1 }
 0x1f5   : > { %v821_v52 = vadd.f32 %v2153_v50, %v1901_v6  ;;  %v815_v54 = vpop.f32.mrb[31].mxu1 }
 0x1f6   : > { %v816_v55 = vadd.f32 %v1901_v6, %v815_v54  ;;  %v1182_v63 = vpop.permute.xlu1 %1181  ;;  %v1180_v57 = vpop.permute.xlu0 %1179 }
 0x1f7   : > { %840 = vst.msk [vmem:[#allocation4 + $0x78] sm:$0xff] %vm824_vm4, %v821_v52 }
 0x1f8   : > { %839 = vst.msk [vmem:[#allocation4 + $0x70] sm:$0xff] %vm824_vm4, %v816_v55 }
 0x1fc   : > { %v1178_v56 = vpop.permute.xlu1 %1177 }
 0x1fd   : > { %1224 = vxpose.xlu1.b32.cont [2/16] (narrow) %v1178_v56, 64 }
 0x201   : > { %1225 = vxpose.xlu1.b32.cont [3/16] (narrow) %v1180_v57, 64 }
 0x204   : > { %v1184_v51 = vpop.permute.xlu0 %1183 }
 0x205   : > { %1226 = vxpose.xlu1.b32.cont [4/16] (narrow) %v1182_v63, 64 }
 0x208   : > { %v1190_v47 = vpop.permute.xlu1 %1189  ;;  %v1188_v59 = vpop.permute.xlu0 %1187 }
 0x209   : > { %1227 = vxpose.xlu1.b32.cont [5/16] (narrow) %v1184_v51, 64 }
 0x20c   : > { %v1186_v39 = vpop.permute.xlu1 %1185 }
 0x20d   : > { %1228 = vxpose.xlu1.b32.cont [6/16] (narrow) %v1186_v39, 64 }
 0x211   : > { %1229 = vxpose.xlu1.b32.cont [7/16] (narrow) %v1188_v59, 64 }
 0x214   : > { %v1192_v62 = vpop.permute.xlu0 %1191 }
 0x215   : > { %1230 = vxpose.xlu1.b32.cont [8/16] (narrow) %v1190_v47, 64 }
 0x218   : > { %v1198_v4 = vpop.permute.xlu1 %1197  ;;  %v1196_v2 = vpop.permute.xlu0 %1195 }
 0x219   : > { %1231 = vxpose.xlu1.b32.cont [9/16] (narrow) %v1192_v62, 64  ;;  %v914_v0 = vpop.f32.mrb[0].mxu0 }
 0x21a   : > { %v2188_v1 = vpop.f32.mrb[1].mxu0 }
 0x21c   : > { %v1194_v53 = vpop.permute.xlu1 %1193 }
 0x21d   : > { %1232 = vxpose.xlu1.b32.cont [10/16] (narrow) %v1194_v53, 64 }
 0x220   : > { %v1200_v3 = vpop.permute.xlu0 %1199 }
 0x221   : > { %1233 = vxpose.xlu1.b32.cont [11/16] (narrow) %v1196_v2, 64 }
 0x225   : > { %1234 = vxpose.xlu1.b32.cont [12/16] (narrow) %v1198_v4, 64 }
 0x228   : > { %v1206_v5 = vpop.permute.xlu1 %1205  ;;  %v1204_v37 = vpop.permute.xlu0 %1203 }
 0x229   : > { %1235 = vxpose.xlu1.b32.cont [13/16] (narrow) %v1200_v3, 64 }
 0x22c   : > { %v1202_v8 = vpop.permute.xlu1 %1201 }
 0x22d   : > { %1236 = vxpose.xlu1.b32.cont [14/16] (narrow) %v1202_v8, 64 }
 0x231   : > { %1237 = vxpose.xlu1.b32.cont [15/16] (narrow) %v1204_v37, 64 }
 0x235   : > { %1238 = vxpose.xlu1.b32.end [16/16] (narrow) %v1206_v5, 64 }
 0x239   : > { %v846_v41 = vpop.permute.xlu0 %845 }
 0x23a   : > { %v915_v10 = vadd.f32 %v914_v0, %v846_v41 }
 0x23c   : > { %918 = vst [vmem:[#allocation5] sm:$0x3f] %v915_v10 }
 0x279   : > { %v1239_v11 = vpop.trf.xlu1 }
 0x27d   : > { %v1240_v12 = vpop.trf.xlu1 }
 0x27e   : > { %v1255_v13 = vpack.c.bf16 %v1240_v12, %v1239_v11 }
 0x280   : > { %1259 = vst [vmem:[#allocation3] sm:$0xff] %v1255_v13 }
 0x281   : > { %v1241_v14 = vpop.trf.xlu1 }
 0x285   : > { %v1242_v15 = vpop.trf.xlu1 }
 0x286   : > { %v1256_v16 = vpack.c.bf16 %v1242_v15, %v1241_v14 }
 0x288   : > { %1260 = vst [vmem:[#allocation3 + $0x8] sm:$0xff] %v1256_v16 }
 0x289   : > { %v1243_v43 = vpop.trf.xlu1 }
 0x28d   : > { %v1244_v17 = vpop.trf.xlu1 }
 0x28e   : > { %v1257_v18 = vpack.c.bf16 %v1244_v17, %v1243_v43 }
 0x290   : > { %1261 = vst [vmem:[#allocation3 + $0x10] sm:$0xff] %v1257_v18 }
 0x291   : > { %v1245_v19 = vpop.trf.xlu1 }
 0x295   : > { %v1246_v9 = vpop.trf.xlu1 }
 0x296   : > { %v1258_v6 = vpack.c.bf16 %v1246_v9, %v1245_v19 }
 0x298   : > { %1262 = vst [vmem:[#allocation3 + $0x18] sm:$0xff] %v1258_v6 }
 0x299 PF: > { %v1272_v7 = vld [vmem:[#allocation3] sm:$0xff]  ;;  %v1273_v23 = vld [vmem:[#allocation3 + $0x8] sm:$0xff]  ;;  %s3010_s13 = sshll.u32 %s2435_s20, 6  ;;  %vm1276_vm5 = vcmask 523264   ;;  %v1274_v20 = vld [vmem:[#allocation3 + $0x10] sm:$0xff]  ;;  %v2460_v24 = vmov 0   ;;  %v1417_v2 = vlaneseq }
 0x29a   : > { %2189 = vmatprep.subr.bf16.mxu0 %v1272_v7  ;;  %2261 = vmatprep.subr.bf16.mxu1 %v1272_v7  ;;  %s1264_s17 = sshra.s32 %s3010_s13, 4  ;;  %v1356_v25 = vld [vmem:[%s2628_s30 + $0x10] sm:$0xff]  ;;  %v1354_v26 = vld [vmem:[%s2628_s30] sm:$0xff]  ;;  %v1357_v28 = vld [vmem:[%s2628_s30 + $0x18] sm:$0xff]  ;;  %s1486_s20 = scalar_lea.vmem [#allocation4], %s3010_s13  ;;  %v2461_v38 = vmov 1   ;;  %v1426_v11 = vstv %s3010_s13 }
 0x29b   : > { %2190 = vmatpush3.bf16.msra.mxu0 %v1272_v7  ;;  %2265 = vmatpush3.bf16.msra.mxu1 %v1272_v7  ;;  %s1903_s23 = sshll.u32 %s1264_s17, 3  ;;  %v1355_v29 = vld [vmem:[%s2628_s30 + $0x8] sm:$0xff]  ;;  %v1358_v30 = vld [vmem:[%s2628_s30 + $0x20] sm:$0xff]  ;;  %v1361_v33 = vld [vmem:[%s2628_s30 + $0x38] sm:$0xff]  ;;  %v2462_v46 = vmov 3   ;;  %v2463_v49 = vmov 5  }
 0x29c   : > { %2191 = vmatprep.subr.bf16.mxu0 %v1273_v23  ;;  %2262 = vmatprep.subr.bf16.mxu1 %v1273_v23  ;;  %s1267_s24 = scalar_lea.vmem [#allocation2], %s1903_s23  ;;  %v1359_v58 = vld [vmem:[%s2628_s30 + $0x28] sm:$0xff]  ;;  %v1360_v34 = vld [vmem:[%s2628_s30 + $0x30] sm:$0xff]  ;;  %v1487_v36 = vld [vmem:[%s1486_s20] sm:$0xff]  ;;  %v1418_v8 = vshrl.u32 %v1417_v2, 7  ;;  %v1436_v16 = vand.u32 127, %v1417_v2 }
 0x29d   : > { %v1268_v21 = vld [vmem:[%s1267_s24] sm:$0xff]  ;;  %v1270_v22 = vld [vmem:[%s1267_s24 + $0x10] sm:$0xff]  ;;  %2378 = vset.pattern.permute.xlu1 %v2460_v24  ;;  %2377 = vset.pattern.permute.xlu0 %v2460_v24  ;;  %v1269_v31 = vld [vmem:[%s1267_s24 + $0x8] sm:$0xff]  ;;  %s3238_s28 = sand.u32 1, %s2427_s18  }
 0x29e   : > { %2197 = vmatprep.mubr.msk.bf16.mxu0 %vm1276_vm5, %v1268_v21  ;;  %2201 = vmatprep.mubr.msk.bf16.mxu1 %vm1276_vm5, %v1270_v22  ;;  %v1271_v32 = vld [vmem:[%s1267_s24 + $0x18] sm:$0xff]  ;;  %v1488_v35 = vld [vmem:[%s1486_s20 + $0x8] sm:$0xff]  ;;  %v1489_v61 = vld [vmem:[%s1486_s20 + $0x10] sm:$0xff]  ;;  %v1420_v10 = vadd.s32 16, %v1418_v8  ;;  %v1421_v13 = vadd.s32 24, %v1418_v8  ;;  %v1423_v14 = vadd.s32 40, %v1418_v8  ;;  %v1427_v19 = vadd.s32 %v1426_v11, %v1418_v8 }
 0x29f   : > { %2192 = vmatpush3.bf16.msra.mxu0 %v1273_v23  ;;  %2266 = vmatpush3.bf16.msra.mxu1 %v1273_v23  ;;  %v1275_v27 = vld [vmem:[#allocation3 + $0x18] sm:$0xff]  ;;  %v1491_v40 = vld [vmem:[%s1486_s20 + $0x20] sm:$0xff]  ;;  %v1492_v42 = vld [vmem:[%s1486_s20 + $0x28] sm:$0xff]  ;;  %v1419_v15 = vadd.s32 8, %v1418_v8  ;;  %v1424_v17 = vadd.s32 48, %v1418_v8  ;;  %v1425_v9 = vadd.s32 56, %v1418_v8 }
 0x2a0   : > { %2193 = vmatprep.subr.bf16.mxu0 %v1274_v20  ;;  %2263 = vmatprep.subr.bf16.mxu1 %v1274_v20  ;;  %v1490_v60 = vld [vmem:[%s1486_s20 + $0x18] sm:$0xff]  ;;  %v1493_v44 = vld [vmem:[%s1486_s20 + $0x30] sm:$0xff]  ;;  %v1429_v43 = vadd.s32 %v1426_v11, %v1420_v10  ;;  %v1422_v6 = vadd.s32 32, %v1418_v8  ;;  %v1430_v7 = vadd.s32 %v1426_v11, %v1421_v13  ;;  %v1432_v23 = vadd.s32 %v1426_v11, %v1423_v14 }
 0x2a1   : > { %1375 = vperm.xlu1 %2378, %v1356_v25   ;;  %1365 = vperm.xlu0 %2377, %v1354_v26   ;;  %v1494_v45 = vld [vmem:[%s1486_s20 + $0x38] sm:$0xff]  ;;  %v1433_v21 = vadd.s32 %v1426_v11, %v1424_v17  ;;  %v1908_v25 = vld [vmem:[%s438_s15] ss:$0 sm:$0xff]  ;;  %vm1437_vm7 = vcmp.gt.s32.totalorder %v1427_v19, %v1436_v16  ;;  %v1434_v26 = vadd.s32 %v1426_v11, %v1425_v9  ;;  %s1720_s15 = scalar_lea.sflag [#allocation7], %s3238_s28 }
 0x2a2   : > { %vm1439_vm6 = vcmp.gt.s32.totalorder %v1429_v43, %v1436_v16  ;;  %vm1440_vm8 = vcmp.gt.s32.totalorder %v1430_v7, %v1436_v16  ;;  %vm1442_vm9 = vcmp.gt.s32.totalorder %v1432_v23, %v1436_v16 }
 0x2a3   : > { %2194 = vmatpush3.bf16.msra.mxu0 %v1274_v20  ;;  %2267 = vmatpush3.bf16.msra.mxu1 %v1274_v20  ;;  %v1428_v20 = vadd.s32 %v1426_v11, %v1419_v15  ;;  %vm1443_vm11 = vcmp.gt.s32.totalorder %v1433_v21, %v1436_v16  ;;  %vm1444_vm12 = vcmp.gt.s32.totalorder %v1434_v26, %v1436_v16 }
 0x2a4   : > { %2195 = vmatprep.subr.bf16.mxu0 %v1275_v27  ;;  %2264 = vmatprep.subr.bf16.mxu1 %v1275_v27 }
 0x2a5   : > { %1380 = vperm.xlu1 %2378, %v1357_v28   ;;  %1370 = vperm.xlu0 %2377, %v1355_v29   ;;  %v2464_v28 = vmov 1.0   ;;  %vm1438_vm10 = vcmp.gt.s32.totalorder %v1428_v20, %v1436_v16 }
 0x2a6   : > { %v1447_v29 = vsel %vm1439_vm6, 2.0, %v2464_v28 }
 0x2a7   : > { %2196 = vmatpush3.bf16.msra.mxu0 %v1275_v27  ;;  %2268 = vmatpush3.bf16.msra.mxu1 %v1275_v27  ;;  %v1431_v27 = vadd.s32 %v1426_v11, %v1422_v6 }
 0x2a9   : > { %1390 = vperm.xlu1 %2378, %v1359_v58   ;;  %1385 = vperm.xlu0 %2377, %v1358_v30   ;;  %vm1441_vm13 = vcmp.gt.s32.totalorder %v1431_v27, %v1436_v16 }
 0x2aa   : > { %2198 = vmatmul.mubr.msk.bf16.vlgmr.msra.gmra.mrb[0].mxu0 %vm1276_vm5, %v1269_v31  ;;  %2202 = vmatmul.mubr.msk.bf16.vlgmr.msra.gmra.mrb[0].mxu1 %vm1276_vm5, %v1271_v32  ;;  %v1445_v31 = vsel %vm1437_vm7, 2.0, %v2464_v28 }
 0x2ad   : > { %1400 = vperm.xlu1 %2378, %v1361_v33   ;;  %1395 = vperm.xlu0 %2377, %v1360_v34   ;;  %v1448_v34 = vsel %vm1440_vm8, 2.0, %v2464_v28 }
 0x2b1   : > { %2380 = vset.pattern.permute.xlu1 %v2461_v38  ;;  %2379 = vset.pattern.permute.xlu0 %v2461_v38 }
 0x2b2   : > { %1502 = vperm.xlu1 %2380, %v1488_v35   ;;  %1497 = vperm.xlu0 %2379, %v1487_v36  }
 0x2b6   : > { %1507 = vperm.xlu1 %2380, %v1489_v61   ;;  %1512 = vperm.xlu0 %2379, %v1490_v60  }
 0x2ba   : > { %1517 = vperm.xlu1 %2380, %v1491_v40   ;;  %1522 = vperm.xlu0 %2379, %v1492_v42  }
 0x2be   : > { %1527 = vperm.xlu1 %2380, %v1493_v44   ;;  %1532 = vperm.xlu0 %2379, %v1494_v45  }
 0x2c2   : > { %2381 = vset.pattern.permute.xlu1 %v2462_v46  ;;  %2382 = vset.pattern.permute.xlu0 %v2462_v46 }
 0x2c3   : > { %1574 = vperm.xlu1 %2381, %v1487_v36   ;;  %1579 = vperm.xlu0 %2382, %v1488_v35  }
 0x2c7   : > { %1584 = vperm.xlu1 %2381, %v1489_v61   ;;  %1594 = vperm.xlu0 %2382, %v1491_v40  }
 0x2cb   : > { %1589 = vperm.xlu1 %2381, %v1490_v60   ;;  %1604 = vperm.xlu0 %2382, %v1493_v44  }
 0x2cf   : > { %1599 = vperm.xlu1 %2381, %v1492_v42   ;;  %2383 = vset.pattern.permute.xlu0 %v2463_v49 }
 0x2d0   : > { %1652 = vperm.xlu0 %2383, %v1487_v36   ;;  %v1446_v36 = vsel %vm1438_vm10, 2.0, %v2464_v28 }
 0x2d3   : > { %1609 = vperm.xlu1 %2381, %v1494_v45  }
 0x2d4   : > { %1667 = vperm.xlu0 %2383, %v1490_v60  }
 0x2d7   : > { %2384 = vset.pattern.permute.xlu1 %v2463_v49 }
 0x2d8   : > { %1657 = vperm.xlu1 %2384, %v1488_v35   ;;  %1677 = vperm.xlu0 %2383, %v1492_v42  }
 0x2dc   : > { %1662 = vperm.xlu1 %2384, %v1489_v61   ;;  %1687 = vperm.xlu0 %2383, %v1494_v45   ;;  %v1451_v45 = vsel %vm1443_vm11, 2.0, %v2464_v28 }
 0x2e0   : > { %1672 = vperm.xlu1 %2384, %v1491_v40   ;;  %v1450_v40 = vsel %vm1442_vm9, 2.0, %v2464_v28 }
 0x2e4   : > { %1682 = vperm.xlu1 %2384, %v1493_v44  }
 0x320   : > { %v1376_v48 = vpop.permute.xlu1 %1375  ;;  %v1366_v54 = vpop.permute.xlu0 %1365 }
 0x321   : > { %v1411_v58 = vmul.f32 %v1908_v25, %v1376_v48  ;;  %v1409_v30 = vmul.f32 %v1908_v25, %v1366_v54  ;;  %v1452_v48 = vsel %vm1444_vm12, 2.0, %v2464_v28 }
 0x323   : > { %v1463_v46 = vsub.f32 %v1411_v58, %v1447_v29  ;;  %v1461_v49 = vsub.f32 %v1409_v30, %v1445_v31 }
 0x324   : > { %v1381_v50 = vpop.permute.xlu1 %1380  ;;  %v1371_v63 = vpop.permute.xlu0 %1370 }
 0x325   : > { %v1412_v32 = vmul.f32 %v1908_v25, %v1381_v50  ;;  %v1410_v33 = vmul.f32 %v1908_v25, %v1371_v63  ;;  %v1449_v50 = vsel %vm1441_vm13, 2.0, %v2464_v28  ;;  %v1469_v11 = vmul.f32 1e+12, %v1461_v49 }
 0x327   : > { %v1464_v54 = vsub.f32 %v1412_v32, %v1448_v34  ;;  %v1462_v63 = vsub.f32 %v1410_v33, %v1446_v36 }
 0x328   : > { %v1391_v52 = vpop.permute.xlu1 %1390  ;;  %v1386_v57 = vpop.permute.xlu0 %1385 }
 0x329   : > { %v1414_v35 = vmul.f32 %v1908_v25, %v1391_v52  ;;  %v1413_v44 = vmul.f32 %v1908_v25, %v1386_v57  ;;  %v1472_v15 = vmul.f32 1e+12, %v1464_v54  ;;  %v1470_v16 = vmul.f32 1e+12, %v1462_v63 }
 0x32b   : > { %v1466_v2 = vsub.f32 %v1414_v35, %v1450_v40  ;;  %v1465_v10 = vsub.f32 %v1413_v44, %v1449_v50 }
 0x32c   : > { %v3026_v55 = vpop.permute.xlu1 %1400  ;;  %v1396_v47 = vpop.permute.xlu0 %1395 }
 0x32d   : > { %v1415_v38 = vmul.f32 %v1908_v25, %v1396_v47  ;;  %v1416_v42 = vmul.f32 %v1908_v25, %v3026_v55  ;;  %v1471_v47 = vmul.f32 1e+12, %v1463_v46  ;;  %v1474_v43 = vmul.f32 1e+12, %v1466_v2  ;;  %v3076_v46 = vld [vmem:[#allocation5 + $0x2] ss:$0 sm:$0xff] }
 0x32e   : > { %v1473_v20 = vmul.f32 1e+12, %v1465_v10 }
 0x32f   : > { %v1467_v8 = vsub.f32 %v1415_v38, %v1451_v45  ;;  %v1468_v52 = vsub.f32 %v1416_v42, %v1452_v48  ;;  %v3074_v45 = vld [vmem:[#allocation5] ss:$0 sm:$0xff] }
 0x331   : > { %v3028_v56 = vpop.permute.xlu1 %1502  ;;  %v3034_v59 = vpop.permute.xlu0 %1497  ;;  %v1475_v17 = vmul.f32 1e+12, %v1467_v8  ;;  %v1476_v23 = vmul.f32 1e+12, %v1468_v52 }
 0x335   : > { %v3030_v51 = vpop.permute.xlu1 %1507  ;;  %v3038_v4 = vpop.permute.xlu0 %1512 }
 0x339   : > { %v3032_v39 = vpop.permute.xlu1 %1517  ;;  %v3042_v1 = vpop.permute.xlu0 %1522 }
 0x33d   : > { %v3036_v62 = vpop.permute.xlu1 %1527  ;;  %v3046_v3 = vpop.permute.xlu0 %1532 }
 0x342   : > { %v3040_v0 = vpop.permute.xlu1 %1574  ;;  %v3050_v37 = vpop.permute.xlu0 %1579 }
 0x346   : > { %v3044_v53 = vpop.permute.xlu1 %1584  ;;  %v3055_v12 = vpop.permute.xlu0 %1594 }
 0x34a   : > { %v3048_v5 = vpop.permute.xlu1 %1589  ;;  %v3059_v22 = vpop.permute.xlu0 %1604 }
 0x34e   : > { %v3052_v41 = vpop.permute.xlu1 %1599 }
 0x34f   : > { %v3068_v61 = vpop.permute.xlu0 %1652 }
 0x352   : > { %v3057_v18 = vpop.permute.xlu1 %1609 }
 0x353   : > { %v3072_v13 = vpop.permute.xlu0 %1667 }
 0x357   : > { %v3061_v24 = vpop.permute.xlu1 %1657  ;;  %v1678_v63 = vpop.permute.xlu0 %1677 }
 0x35b   : > { %v1663_v60 = vpop.permute.xlu1 %1662 }
 0x35f   : > { %v1673_v14 = vpop.permute.xlu1 %1672 }
 0x37d   : > { %v2199_v55 = vpop.f32.mrb[0].mxu0  ;;  %v2203_v57 = vpop.f32.mrb[0].mxu1 }
 0x37e   : > { %v1455_v19 = vmul.f32 %v2199_v55, %v1411_v58  ;;  %v1459_v9 = vmul.f32 %v2203_v57, %v1415_v38  ;;  %v1323_v6 = vpop.f32.mrb[1].mxu0  ;;  %v1339_v7 = vpop.f32.mrb[1].mxu1  ;;  %v3078_v58 = vld [vmem:[#allocation5 + $0x4] ss:$0 sm:$0xff] }
 0x37f   : > { %v1453_v21 = vmul.f32 %v1409_v30, %v1323_v6  ;;  %v1457_v25 = vmul.f32 %v1413_v44, %v1339_v7  ;;  %v2200_v26 = vpop.f32.mrb[2].mxu0  ;;  %v2204_v27 = vpop.f32.mrb[2].mxu1 }
 0x380   : > { %v1479_v28 = vadd.f32 %v1471_v47, %v1455_v19  ;;  %v1483_v29 = vadd.f32 %v1475_v17, %v1459_v9  ;;  %v1456_v31 = vmul.f32 %v2200_v26, %v1412_v32  ;;  %v1460_v34 = vmul.f32 %v2204_v27, %v1416_v42  ;;  %v1326_v36 = vpop.f32.mrb[3].mxu0  ;;  %v1342_v40 = vpop.f32.mrb[3].mxu1 }
 0x381   : > { %v1477_v38 = vadd.f32 %v1469_v11, %v1453_v21  ;;  %v1481_v49 = vadd.f32 %v1473_v20, %v1457_v25  ;;  %v1454_v48 = vmul.f32 %v1410_v33, %v1326_v36  ;;  %v1458_v50 = vmul.f32 %v1414_v35, %v1342_v40  ;;  %v1683_v30 = vpop.permute.xlu1 %1682 }
 0x382   : > { %v1537_v44 = vadd.f32 %v3030_v51, %v1479_v28  ;;  %v1614_v54 = vadd.f32 %v3044_v53, %v1479_v28  ;;  %v1692_v32 = vadd.f32 %v1663_v60, %v1479_v28  ;;  %v1541_v42 = vadd.f32 %v3036_v62, %v1483_v29 }
 0x383   : > { %v1618_v2 = vadd.f32 %v3059_v22, %v1483_v29  ;;  %v1696_v8 = vadd.f32 %v1683_v30, %v1483_v29  ;;  %v1535_v52 = vadd.f32 %v3034_v59, %v1477_v38  ;;  %v1612_v33 = vadd.f32 %v3040_v0, %v1477_v38 }
 0x384   : > { %v1549_v35 = vadd.f32 %v3074_v45, %v1537_v44  ;;  %v1626_v51 = vadd.f32 %v3076_v46, %v1614_v54  ;;  %v1704_v53 = vadd.f32 %v3078_v58, %v1692_v32  ;;  %v1553_v62 = vadd.f32 %v3074_v45, %v1541_v42 }
 0x385   : > { %v1630_v60 = vadd.f32 %v3076_v46, %v1618_v2  ;;  %v1708_v22 = vadd.f32 %v3078_v58, %v1696_v8  ;;  %v1547_v59 = vadd.f32 %v3074_v45, %v1535_v52  ;;  %v1624_v0 = vadd.f32 %v3076_v46, %v1612_v33 }
 0x386   : > { %1557 = vst [vmem:[%s2630_s21 + $0x10] sm:$0xff] %v1549_v35  ;;  %1913 = vst [vmem:[%s2630_s21 + $0x50] sm:$0xff] %v1626_v51  ;;  %v1690_v10 = vadd.f32 %v3068_v61, %v1477_v38  ;;  %v1539_v47 = vadd.f32 %v3032_v39, %v1481_v49  ;;  %v1616_v11 = vadd.f32 %v3055_v12, %v1481_v49 }
 0x387   : > { %1922 = vst [vmem:[%s2630_s21 + $0x90] sm:$0xff] %v1704_v53  ;;  %1561 = vst [vmem:[%s2630_s21 + $0x30] sm:$0xff] %v1553_v62  ;;  %v1694_v55 = vadd.f32 %v1673_v14, %v1481_v49  ;;  %v1480_v57 = vadd.f32 %v1472_v15, %v1456_v31  ;;  %v1484_v17 = vadd.f32 %v1476_v23, %v1460_v34  ;;  %v1688_v14 = vpop.permute.xlu0 %1687 }
 0x388   : > { %1917 = vst [vmem:[%s2630_s21 + $0x70] sm:$0xff] %v1630_v60  ;;  %1926 = vst [vmem:[%s2630_s21 + $0xb0] sm:$0xff] %v1708_v22  ;;  %v1478_v19 = vadd.f32 %v1470_v16, %v1454_v48  ;;  %v1482_v9 = vadd.f32 %v1474_v43, %v1458_v50  ;;  %v1702_v6 = vadd.f32 %v3078_v58, %v1690_v10 }
 0x389   : > { %1555 = vst [vmem:[%s2630_s21] sm:$0xff] %v1547_v59  ;;  %1911 = vst [vmem:[%s2630_s21 + $0x40] sm:$0xff] %v1624_v0  ;;  %v1551_v61 = vadd.f32 %v3074_v45, %v1539_v47  ;;  %v1628_v39 = vadd.f32 %v3076_v46, %v1616_v11  ;;  %v1706_v12 = vadd.f32 %v3078_v58, %v1694_v55 }
 0x38a   : > { %v1538_v7 = vadd.f32 %v3038_v4, %v1480_v57  ;;  %v1615_v20 = vadd.f32 %v3048_v5, %v1480_v57  ;;  %v1693_v21 = vadd.f32 %v3072_v13, %v1480_v57  ;;  %v1542_v15 = vadd.f32 %v3046_v3, %v1484_v17  ;;  %1920 = vst [vmem:[%s2630_s21 + $0x80] sm:$0xff] %v1702_v6 }
 0x38b   : > { %1559 = vst [vmem:[%s2630_s21 + $0x20] sm:$0xff] %v1551_v61  ;;  %1915 = vst [vmem:[%s2630_s21 + $0x60] sm:$0xff] %v1628_v39  ;;  %v1619_v16 = vadd.f32 %v3057_v18, %v1484_v17  ;;  %v1697_v43 = vadd.f32 %v1688_v14, %v1484_v17  ;;  %v1536_v23 = vadd.f32 %v3028_v56, %v1478_v19 }
 0x38c   : > { %1924 = vst [vmem:[%s2630_s21 + $0xa0] sm:$0xff] %v1706_v12  ;;  %v1613_v4 = vadd.f32 %v3050_v37, %v1478_v19  ;;  %v1550_v5 = vadd.f32 %v3074_v45, %v1538_v7  ;;  %v1627_v3 = vadd.f32 %v3076_v46, %v1615_v20  ;;  %v1705_v13 = vadd.f32 %v3078_v58, %v1693_v21 }
 0x38d   : > { %v1554_v25 = vadd.f32 %v3074_v45, %v1542_v15  ;;  %v1631_v26 = vadd.f32 %v3076_v46, %v1619_v16  ;;  %v1709_v18 = vadd.f32 %v3078_v58, %v1697_v43  ;;  %v1548_v56 = vadd.f32 %v3074_v45, %v1536_v23 }
 0x38e   : > { %v1625_v37 = vadd.f32 %v3076_v46, %v1613_v4  ;;  %1558 = vst [vmem:[%s2630_s21 + $0x18] sm:$0xff] %v1550_v5  ;;  %1914 = vst [vmem:[%s2630_s21 + $0x58] sm:$0xff] %v1627_v3  ;;  %v1691_v27 = vadd.f32 %v3061_v24, %v1478_v19  ;;  %v1540_v28 = vadd.f32 %v3042_v1, %v1482_v9 }
 0x38f   : > { %1923 = vst [vmem:[%s2630_s21 + $0x98] sm:$0xff] %v1705_v13  ;;  %1562 = vst [vmem:[%s2630_s21 + $0x38] sm:$0xff] %v1554_v25  ;;  %v1617_v29 = vadd.f32 %v3052_v41, %v1482_v9  ;;  %v1695_v31 = vadd.f32 %v1678_v63, %v1482_v9 }
 0x390   : > { %1918 = vst [vmem:[%s2630_s21 + $0x78] sm:$0xff] %v1631_v26  ;;  %1927 = vst [vmem:[%s2630_s21 + $0xb8] sm:$0xff] %v1709_v18  ;;  %v1703_v34 = vadd.f32 %v3078_v58, %v1691_v27  ;;  %v1552_v36 = vadd.f32 %v3074_v45, %v1540_v28 }
 0x391   : > { %1556 = vst [vmem:[%s2630_s21 + $0x8] sm:$0xff] %v1548_v56  ;;  %1912 = vst [vmem:[%s2630_s21 + $0x48] sm:$0xff] %v1625_v37  ;;  %v1629_v40 = vadd.f32 %v3076_v46, %v1617_v29  ;;  %v1707_v38 = vadd.f32 %v3078_v58, %v1695_v31 }
 0x392   : > { %1921 = vst [vmem:[%s2630_s21 + $0x88] sm:$0xff] %v1703_v34  ;;  %1560 = vst [vmem:[%s2630_s21 + $0x28] sm:$0xff] %v1552_v36 }
 0x393   : > { %1916 = vst [vmem:[%s2630_s21 + $0x68] sm:$0xff] %v1629_v40  ;;  %1925 = vst [vmem:[%s2630_s21 + $0xa8] sm:$0xff] %v1707_v38 }
 0x394   : > { %s3239_s25 = sld [smem:[#allocation13_spill]]  ;;  %s1751_s16 = sshll.u32 %s2630_s21, 4  ;;  %s1752_s16 = int_to_ptr.vmem [resolvable:$true] %s1751_s16 }
 0x395   : > { %s2465_s22 = smov 1024   ;;  %s3241_s17 = sld [smem:[#allocation22_spill]] }
 0x396   : > { %2271 = sst [smem:[#allocation9]] (%p2582_p3), %s2465_s22  ;;  %s2466_s24 = smov 2048  }
 0x397   : > { %2272 = sst [smem:[#allocation9 + $0x1]] (%p2582_p3), %s2466_s24  ;;  %s2467_s20 = smov 8  }
 0x398   : > { %2273 = sst [smem:[#allocation9 + $0x2]] (%p2582_p3), %s2467_s20  ;;  %s2468_s30 = smov 128  }
 0x399   : > { %2274 = sst [smem:[#allocation9 + $0x3]] (%p2582_p3), %s2468_s30  ;;  %s2469_s21 = smov [#allocation8]  }
 0x39a   : > { %s2270_s29 = smul.u32 48, %s3239_s25  ;;  %2275 = sst [smem:[#allocation9 + $0x4]] (%p2582_p3), %s2468_s30 }
 0x39b   : > { %2276 = sst [smem:[#allocation9 + $0x5]] (%p2582_p3), %s2467_s20 }
 0x39c   : > { %s1732_s14 = sadd.s32 %s2270_s29, %s2607_s27  ;;  %s2470_s27 = smov 0  }
 0x39d   : > { %s1929_s19 = sshll.u32 %s1732_s14, 7 }
 0x39e   : > { %s1734_s23 = scalar_lea.hbm %s3241_s17, %s1929_s19 }
 0x39f   : > { %2277 = dma.general (%p2582_p3), %s1752_s16, 3072, %s1734_s23, %s1720_s15, %s2469_s21, [#allocation9], %s2470_s27, 0  }
 0x3a0 PF: > { %s3242_s12 = sld [smem:[#allocation16_spill]]  ;;  %s3243_s28 = sld [smem:[#allocation11_spill]] }
 0x3a6   : > { %p2283_p1 = scmp.ge.s32.totalorder %s3242_s12, 2  ;;  %s1779_s29 = sand.u32 1, %s3243_s28  }
 0x3a7   : > { %s1780_s14 = scalar_lea.sflag [#allocation7], %s1779_s29 }
 0x3a8   : > { %p2280_p2 = pnand %p2283_p1, %p2591_p8 }
 0x3aa   : > { %2418 = dma.done.wait (!%p2280_p2), %s1780_s14, 3072  }
 0x3ab   : > { %2420 = vsyncadd (!%p2280_p2), %s1780_s14, 4294964224  ;;  %s24_s24 = sadd.s32 1, %s3242_s12   ;;  %s3245_s22 = sld [smem:[#allocation12_spill]] }
 0x3ac   : > { %p21_p4 = scmp.ge.s32.totalorder %s24_s24, 6   ;;  %s3246_s19 = sld [smem:[#allocation21_spill]] }
 0x3ad   : > { %s3247_s20 = sld [smem:[#allocation14_spill]]  ;;  %s3248_s21 = sld [smem:[#allocation15_spill]] }
 0x3ae   : > { %s3249_s15 = sld [smem:[#allocation17_spill]]  ;;  %s3250_s23 = sld [smem:[#allocation19_spill]] }
 0x3af   : > { %s3251_s17 = smov %s2427_s18  ;;  %23 = sbr.rel (!%p21_p4) target bundleno = 7 (0x7), region = 118 }
 0x3b1   : > { %s3252_s18 = smov %s3245_s22 }
 0x3b4   : > { %s3253_s22 = smov %s3249_s15 }
 0x3b6   :  { %1785 = vsyncpa [#allocation7], 1 }
 0x3b7   :  { %1787 = vsyncpa [#allocation7 + $0x1], 1 }

</bundles_post_ra>
